<compile_context>
chip_gen: v6e
topology: v6e:2x2x1
jax: 0.10.0
libtpu: 0.0.40
codegen_flags: <defaults>
</compile_context>

<pallas_src>
import jax
import jax.numpy as jnp
import numpy as np
from jax import lax
from jax.experimental import pallas as pl
from jax.experimental.pallas import tpu as pltpu

ACTION_DIMS = (3, 3, 2, 3, 2)            # horizontal, vertical, dash, jump, grab
HEAD_NAMES = ("horizontal", "vertical", "dash", "jump", "grab")
HEAD_PAD = 128                           # lane-dense per-head width
NEG_INF = -1e30                          # bias for padded logit lanes -> prob exactly 0
CONV_CHANNELS = (64, 64, 32)
CONV_KERNELS = (2, 3, 3)                 # first conv is kernel_size=2 (per the spec)


def _round_up(v, m):
    return ((v + m - 1) // m) * m


def _conv_dims(size_image):
    """Static shape bookkeeping for the conv tower (matches the PyTorch module).

    Per stage (flat row index r = h*W + w, channels last):
      A   = number of accumulator rows computed (last kept row + W + 2),
      Rm  = rows of the pre-decimation max needed (last kept row + 1).
    With these bounds every source row read is valid data (no padding needed)."""
    h, w, cin = size_image[0], size_image[1], size_image[2]
    dims = []
    for k, cout in zip(CONV_KERNELS, CONV_CHANNELS):
        ho, wo = h - (k - 1), w - (k - 1)          # 'valid' conv, stride 1
        hp, wp = ho // 2, wo // 2                  # MaxPool2d(2, 2), floor
        assert hp >= 1 and wp >= 1, "image too small for the conv tower"
        r_last = 2 * (hp - 1) * w + 2 * (wp - 1)   # last kept accumulator row
        dims.append(dict(kh=k, kw=k, cin=cin, cout=cout,
                         H=h, W=w, Ho=ho, Wo=wo, Hp=hp, Wp=wp,
                         S=h * w, P=hp * wp, Rm=r_last + 1, A=r_last + w + 2))
        h, w, cin = hp, wp, cout
    return dims, h, w


def _pool_select(d):
    """One 0/1 matrix gathering the (0,0)-corner row of every 2x2 pooling window out of
    the pre-decimation max (gather-via-MXU; built once at init time)."""
    sel = np.zeros((d["P"], d["Rm"]), np.float32)
    for hp in range(d["Hp"]):
        for wp in range(d["Wp"]):
            sel[hp * d["Wp"] + wp, 2 * hp * d["W"] + 2 * wp] = 1.0
    return jnp.asarray(sel)


# --------------------------- parameters (PyTorch layout) --------------------------- #

def init_params(key, state_size, size_image, hidden_size):
    dims, hf, wf = _conv_dims(size_image)
    feat = CONV_CHANNELS[-1] * hf * wf
    keys = iter(jax.random.split(key, 32))

    def unif(k, shape, fan_in):
        bound = 1.0 / float(np.sqrt(fan_in))
        return jax.random.uniform(k, shape, jnp.float32, -bound, bound)

    p = {}
    for i, d in enumerate(dims, start=1):
        fan = d["cin"] * d["kh"] * d["kw"]
        p[f"conv{i}_w"] = unif(next(keys), (d["cout"], d["cin"], d["kh"], d["kw"]), fan)
        p[f"conv{i}_b"] = unif(next(keys), (d["cout"],), fan)
    fin = feat + state_size
    p["fc1_w"] = unif(next(keys), (hidden_size, fin), fin)
    p["fc1_b"] = unif(next(keys), (hidden_size,), fin)
    p["fc2_w"] = unif(next(keys), (hidden_size, hidden_size), hidden_size)
    p["fc2_b"] = unif(next(keys), (hidden_size,), hidden_size)
    for name, n in zip(HEAD_NAMES, ACTION_DIMS):
        p[f"{name}_w"] = unif(next(keys), (n, hidden_size), hidden_size)
        p[f"{name}_b"] = unif(next(keys), (n,), hidden_size)
    return p


def prepare_kernel_params(params, state_size, size_image, hidden_size):
    """One-time layout plumbing: tap-major conv weights, (in,out) linear weights,
    NCHW-flatten permutation folded into a single (hw*C3, hidden) fc1-image weight,
    5 heads packed into one (hidden, 5*128) matrix with -1e30 bias on padded lanes."""
    dims, hf, wf = _conv_dims(size_image)
    hw = hf * wf
    c3 = CONV_CHANNELS[-1]
    kp = {}
    for i, d in enumerate(dims, start=1):
        w = params[f"conv{i}_w"]                                   # (Cout, Cin, kh, kw)
        kp[f"cw{i}"] = jnp.transpose(w, (2, 3, 1, 0)).reshape(
            d["kh"] * d["kw"], d["cin"], d["cout"])                # (taps, Cin, Cout)
        kp[f"cb{i}"] = params[f"conv{i}_b"].reshape(1, d["cout"])
        kp[f"sel{i}"] = _pool_select(d)
    fc1 = params["fc1_w"]                                          # (hidden, state + C3*hw)
    kp["w1s"] = fc1[:, :state_size].T                              # (state, hidden)
    wimg = fc1[:, state_size:]                                     # cols in torch (c, s) order
    kp["w1i"] = (wimg.reshape(hidden_size, c3, hw)
                 .transpose(2, 1, 0)                               # (s, c, hidden)
                 .reshape(hw * c3, hidden_size))                   # row index = s*C3 + c
    kp["fb1"] = params["fc1_b"].reshape(1, hidden_size)
    kp["w2f"] = params["fc2_w"].T
    kp["fb2"] = params["fc2_b"].reshape(1, hidden_size)
    wh = jnp.zeros((hidden_size, len(ACTION_DIMS) * HEAD_PAD), jnp.float32)
    bh = jnp.full((1, len(ACTION_DIMS) * HEAD_PAD), NEG_INF, jnp.float32)
    for i, (name, n) in enumerate(zip(HEAD_NAMES, ACTION_DIMS)):
        wh = wh.at[:, i * HEAD_PAD:i * HEAD_PAD + n].set(params[f"{name}_w"].T)
        bh = bh.at[0, i * HEAD_PAD:i * HEAD_PAD + n].set(params[f"{name}_b"])
    kp["wh"] = wh
    kp["bh"] = bh
    return kp


# --------------------------------- fused kernel ------------------------------------ #

def _make_kernel(dims, hw, b_tile, n_heads):
    d1, d2, d3 = dims
    c3 = d3["cout"]

    def conv_pool(src_ref, w_ref, sel_ref, b_ref, acc_ref, d):
        """Valid conv as kh*kw tap GEMMs (value-accumulated), 2x2/2 max-pool as
        max-before-decimate (VPU maxes over shifted slices) + one selection matmul."""
        kh, kw, W = d["kh"], d["kw"], d["W"]
        A, Rm, C = d["A"], d["Rm"], d["cout"]
        acc = None
        for dy in range(kh):
            for dx in range(kw):
                off = dy * W + dx
                t = jnp.dot(src_ref[off:off + A, :], w_ref[dy * kw + dx],
                            preferred_element_type=jnp.float32)
                acc = t if acc is None else acc + t
        acc_ref[0:A, 0:C] = acc                                    # one dense store
        m = jnp.maximum(
            jnp.maximum(acc_ref[0:Rm, 0:C], acc_ref[1:1 + Rm, 0:C]),
            jnp.maximum(acc_ref[W:W + Rm, 0:C], acc_ref[W + 1:W + 1 + Rm, 0:C]))
        if d["P"] == 1 and Rm == 1:                                # degenerate 1x1 output
            return m + b_ref[...]
        return jnp.dot(sel_ref[...], m, preferred_element_type=jnp.float32) + b_ref[...]

    def kernel(x_ref, img_ref,
               cw1_ref, cb1_ref, sel1_ref,
               cw2_ref, cb2_ref, sel2_ref,
               cw3_ref, cb3_ref, sel3_ref,
               w1s_ref, w1i_ref, fb1_ref, w2f_ref, fb2_ref, wh_ref, bh_ref,
               out_ref,
               x0_ref, acc_ref, p1_ref, p2_ref, feat_ref):

        # ---- conv tower, one sample of the batch tile at a time ---- #
        def per_sample(b, carry):
            x0_ref[...] = img_ref[b]                               # stage the flat image
            p1_ref[...] = conv_pool(x0_ref, cw1_ref, sel1_ref, cb1_ref, acc_ref, d1)
            p2_ref[...] = conv_pool(p1_ref, cw2_ref, sel2_ref, cb2_ref, acc_ref, d2)
            feat = conv_pool(p2_ref, cw3_ref, sel3_ref, cb3_ref, acc_ref, d3)  # (hw, C3)
            feat_ref[pl.ds(b, 1), :] = feat.reshape(1, hw * c3)
            return carry

        lax.fori_loop(0, b_tile, per_sample, 0)

        # ---- shared MLP, batched across the tile (M = B_TILE) ---- #
        h1 = jnp.dot(x_ref[...], w1s_ref[...], preferred_element_type=jnp.float32)
        h1 = h1 + jnp.dot(feat_ref[...], w1i_ref[...], preferred_element_type=jnp.float32)
        h1 = jnp.maximum(h1 + fb1_ref[...], 0.0)
        h2 = jnp.maximum(
            jnp.dot(h1, w2f_ref[...], preferred_element_type=jnp.float32) + fb2_ref[...],
            0.0)

        # ---- 5 heads as ONE packed GEMM, softmax per 128-lane slab, dense stores ---- #
        logits = jnp.dot(h2, wh_ref[...], preferred_element_type=jnp.float32) + bh_ref[...]
        for i in range(n_heads):
            lo = logits[:, i * HEAD_PAD:(i + 1) * HEAD_PAD]        # lane-aligned slice
            mx = jnp.max(lo, axis=-1, keepdims=True)
            e = jnp.exp(lo - mx)                                   # padded lanes -> 0
            denom = jnp.sum(e, axis=-1, keepdims=True)
            # exact reciprocal (still EUP) to keep probabilities within 1e-3 of reference
            out_ref[:, i * HEAD_PAD:(i + 1) * HEAD_PAD] = e * pl.reciprocal(denom,
                                                                            approx=False)

    return kernel


# ------------------------------------ forward -------------------------------------- #

@jax.jit
def actor_forward(kparams, x, image):
    """Returns the 5-tuple of softmax action-probability arrays, matching
    A2CActorNetwork.forward(x, image) with a channels-last (N, H, W, C) image."""
    if x.ndim == 1:
        x = x[None, :]
    if image.ndim == 3:
        image = image[None]
    batch = image.shape[0]
    h, w, cin = image.shape[1], image.shape[2], image.shape[3]
    state_size = x.shape[-1]
    hidden = kparams["fb1"].shape[-1]
    dims, hf, wf = _conv_dims((h, w, cin))
    d1, d2, d3 = dims
    hw = hf * wf
    c3 = CONV_CHANNELS[-1]
    n_heads = len(ACTION_DIMS)
    s_in = h * w

    # batch tiling: >= 8 rows per step (f32 sublane min); multiple steps for megacore
    b_tile = min(32, _round_up(batch, 8))
    bpad = _round_up(batch, b_tile)
    if bpad != batch:
        x = jnp.pad(x, ((0, bpad - batch), (0, 0)))
        image = jnp.pad(image, ((0, bpad - batch), (0, 0), (0, 0), (0, 0)))

    x2 = x.astype(jnp.float32)
    img_flat = image.astype(jnp.float32).reshape(bpad, s_in, cin)   # free reshape

    weight_names = ("cw1", "cb1", "sel1", "cw2", "cb2", "sel2",
                    "cw3", "cb3", "sel3",
                    "w1s", "w1i", "fb1", "w2f", "fb2", "wh", "bh")
    weights = [kparams[k] for k in weight_names]

    def _const_spec(a):
        nd = a.ndim
        return pl.BlockSpec(a.shape, lambda i, _n=nd: (0,) * _n)    # VMEM-resident weights

    in_specs = (
        [pl.BlockSpec((b_tile, state_size), lambda i: (i, 0)),
         pl.BlockSpec((b_tile, s_in, cin), lambda i: (i, 0, 0))]
        + [_const_spec(a) for a in weights])
    out_specs = pl.BlockSpec((b_tile, n_heads * HEAD_PAD), lambda i: (i, 0))

    conv_flops = 0
    for d in dims:
        conv_flops += 2 * d["kh"] * d["kw"] * d["A"] * d["cin"] * d["cout"]
        conv_flops += 2 * d["P"] * d["Rm"] * d["cout"]
    mlp_flops = 2 * (state_size * hidden + hw * c3 * hidden + hidden * hidden
                     + hidden * n_heads * HEAD_PAD)
    w_bytes = int(sum(int(np.prod(a.shape)) for a in weights)) * 4
    cost = pl.CostEstimate(
        flops=int(bpad * (conv_flops + mlp_flops)),
        transcendentals=int(bpad * n_heads * HEAD_PAD),
        bytes_accessed=int(w_bytes
                           + bpad * (s_in * cin + state_size + n_heads * HEAD_PAD) * 4))

    grid_spec = pltpu.PrefetchScalarGridSpec(
        num_scalar_prefetch=0,
        grid=(bpad // b_tile,),
        in_specs=in_specs,
        out_specs=out_specs,
        scratch_shapes=[
            pltpu.VMEM((s_in, cin), jnp.float32),                        # staged image
            pltpu.VMEM((d1["A"], max(CONV_CHANNELS)), jnp.float32),      # shared conv acc
            pltpu.VMEM((d2["S"], d2["cin"]), jnp.float32),               # pooled1
            pltpu.VMEM((d3["S"], d3["cin"]), jnp.float32),               # pooled2
            pltpu.VMEM((b_tile, hw * c3), jnp.float32),                  # per-tile features
        ],
    )

    padded = pl.pallas_call(
        _make_kernel(dims, hw, b_tile, n_heads),
        out_shape=jax.ShapeDtypeStruct((bpad, n_heads * HEAD_PAD), jnp.float32),
        grid_spec=grid_spec,
        compiler_params=pltpu.CompilerParams(dimension_semantics=("parallel",)),
        cost_estimate=cost,
    )(x2, img_flat, *weights)

    # padded lanes carry exact zeros -> slicing recovers each head's softmax
    return tuple(padded[:batch, i * HEAD_PAD:i * HEAD_PAD + n]
                 for i, n in enumerate(ACTION_DIMS))


if __name__ == "__main__":
    key = jax.random.PRNGKey(0)
    state_size = 8
    # (H, W, C); 21 -> conv(2) -> 20 -> pool -> 10 -> conv(3) -> 8 -> pool -> 4
    #            -> conv(3) -> 2 -> pool -> 1
    size_image = (21, 21, 4)
    hidden_size = 32
    batch = 2

    kparam_key, kx, ki = jax.random.split(key, 3)
    params = init_params(kparam_key, state_size, size_image, hidden_size)
    kparams = prepare_kernel_params(params, state_size, size_image, hidden_size)

    x = jax.random.normal(kx, (batch, state_size), jnp.float32)
    image = jax.random.normal(ki, (batch,) + size_image, jnp.float32)

    probs = actor_forward(kparams, x, image)
    probs = jax.block_until_ready(probs)

    assert len(probs) == len(ACTION_DIMS)
    for p, adim in zip(probs, ACTION_DIMS):
        assert p.shape == (batch, adim)
        assert p.dtype == jnp.float32
        assert bool(jnp.all(jnp.isfinite(p)))
        assert bool(jnp.all(p >= 0.0))
        assert bool(jnp.allclose(jnp.sum(p, axis=-1), 1.0, atol=1e-3))
    print("KERNEL_OK")
</pallas_src>

<mosaic_0001>
module attributes {stable_mosaic.version = 11 : i64} {
  func.func @kernel(%arg0: i32, %arg1: memref<8x8xf32, #tpu.memory_space<vmem>>, %arg2: memref<8x441x4xf32, #tpu.memory_space<vmem>>, %arg3: memref<4x4x64xf32, #tpu.memory_space<vmem>>, %arg4: memref<1x64xf32, #tpu.memory_space<vmem>>, %arg5: memref<100x397xf32, #tpu.memory_space<vmem>>, %arg6: memref<9x64x64xf32, #tpu.memory_space<vmem>>, %arg7: memref<1x64xf32, #tpu.memory_space<vmem>>, %arg8: memref<16x67xf32, #tpu.memory_space<vmem>>, %arg9: memref<9x64x32xf32, #tpu.memory_space<vmem>>, %arg10: memref<1x32xf32, #tpu.memory_space<vmem>>, %arg11: memref<1x1xf32, #tpu.memory_space<vmem>>, %arg12: memref<8x32xf32, #tpu.memory_space<vmem>>, %arg13: memref<32x32xf32, #tpu.memory_space<vmem>>, %arg14: memref<1x32xf32, #tpu.memory_space<vmem>>, %arg15: memref<32x32xf32, #tpu.memory_space<vmem>>, %arg16: memref<1x32xf32, #tpu.memory_space<vmem>>, %arg17: memref<32x640xf32, #tpu.memory_space<vmem>>, %arg18: memref<1x640xf32, #tpu.memory_space<vmem>>, %arg19: memref<8x640xf32, #tpu.memory_space<vmem>>, %arg20: memref<441x4xf32, #tpu.memory_space<vmem>>, %arg21: memref<419x64xf32, #tpu.memory_space<vmem>>, %arg22: memref<100x64xf32, #tpu.memory_space<vmem>>, %arg23: memref<16x64xf32, #tpu.memory_space<vmem>>, %arg24: memref<8x32xf32, #tpu.memory_space<vmem>>) attributes {dimension_semantics = [#tpu.dimension_semantics<parallel>], iteration_bounds = array<i64: 1>, scalar_prefetch = 0 : i64, scratch_operands = 5 : i64, tpu.core_type = #tpu.core_type<tc>, window_params = [{transform_indices = @transform_0, window_bounds = array<i64: 8, 8>}, {transform_indices = @transform_1, window_bounds = array<i64: 8, 441, 4>}, {pipeline_mode = #tpu.pipeline_mode<synchronous>, transform_indices = @transform_2, window_bounds = array<i64: 4, 4, 64>}, {pipeline_mode = #tpu.pipeline_mode<synchronous>, transform_indices = @transform_3, window_bounds = array<i64: 1, 64>}, {pipeline_mode = #tpu.pipeline_mode<synchronous>, transform_indices = @transform_4, window_bounds = array<i64: 100, 397>}, {pipeline_mode = #tpu.pipeline_mode<synchronous>, transform_indices = @transform_5, window_bounds = array<i64: 9, 64, 64>}, {pipeline_mode = #tpu.pipeline_mode<synchronous>, transform_indices = @transform_6, window_bounds = array<i64: 1, 64>}, {pipeline_mode = #tpu.pipeline_mode<synchronous>, transform_indices = @transform_7, window_bounds = array<i64: 16, 67>}, {pipeline_mode = #tpu.pipeline_mode<synchronous>, transform_indices = @transform_8, window_bounds = array<i64: 9, 64, 32>}, {pipeline_mode = #tpu.pipeline_mode<synchronous>, transform_indices = @transform_9, window_bounds = array<i64: 1, 32>}, {pipeline_mode = #tpu.pipeline_mode<synchronous>, transform_indices = @transform_10, window_bounds = array<i64: 1, 1>}, {pipeline_mode = #tpu.pipeline_mode<synchronous>, transform_indices = @transform_11, window_bounds = array<i64: 8, 32>}, {pipeline_mode = #tpu.pipeline_mode<synchronous>, transform_indices = @transform_12, window_bounds = array<i64: 32, 32>}, {pipeline_mode = #tpu.pipeline_mode<synchronous>, transform_indices = @transform_13, window_bounds = array<i64: 1, 32>}, {pipeline_mode = #tpu.pipeline_mode<synchronous>, transform_indices = @transform_14, window_bounds = array<i64: 32, 32>}, {pipeline_mode = #tpu.pipeline_mode<synchronous>, transform_indices = @transform_15, window_bounds = array<i64: 1, 32>}, {pipeline_mode = #tpu.pipeline_mode<synchronous>, transform_indices = @transform_16, window_bounds = array<i64: 32, 640>}, {pipeline_mode = #tpu.pipeline_mode<synchronous>, transform_indices = @transform_17, window_bounds = array<i64: 1, 640>}, {transform_indices = @transform_18, window_bounds = array<i64: 8, 640>}]} {
    %c0_i32 = arith.constant 0 : i32
    %c8_i32 = arith.constant 8 : i32
    %0 = arith.addi %c0_i32, %c8_i32 : i32
    %c1_i32 = arith.constant 1 : i32
    scf.for %arg25 = %c0_i32 to %0 step %c1_i32  : i32 {
      %85 = arith.index_cast %arg25 : i32 to index
      %c0_39 = arith.constant 0 : index
      %c0_40 = arith.constant 0 : index
      %86 = vector.load %arg2[%85, %c0_39, %c0_40] : memref<8x441x4xf32, #tpu.memory_space<vmem>>, vector<1x441x4xf32>
      %87 = vector.shape_cast %86 : vector<1x441x4xf32> to vector<441x4xf32>
      %c0_41 = arith.constant 0 : index
      %c0_42 = arith.constant 0 : index
      %88 = vector.load %arg20[%c0_41, %c0_42] : memref<441x4xf32, #tpu.memory_space<vmem>>, vector<441x4xf32>
      tpu.vector_store %arg20[%c0_41, %c0_42], %87 {strides = array<i32>} : memref<441x4xf32, #tpu.memory_space<vmem>>, vector<441x4xf32>,
      %c0_43 = arith.constant 0 : index
      %c0_44 = arith.constant 0 : index
      %89 = vector.load %arg20[%c0_43, %c0_44] : memref<441x4xf32, #tpu.memory_space<vmem>>, vector<419x4xf32>
      %c0_45 = arith.constant 0 : index
      %c0_46 = arith.constant 0 : index
      %c0_47 = arith.constant 0 : index
      %90 = vector.load %arg3[%c0_45, %c0_46, %c0_47] : memref<4x4x64xf32, #tpu.memory_space<vmem>>, vector<1x4x64xf32>
      %91 = vector.shape_cast %90 : vector<1x4x64xf32> to vector<4x64xf32>
      %cst_48 = arith.constant dense<0.000000e+00> : vector<419x64xf32>
      %92 = tpu.matmul %89, %91, %cst_48 {dimension_numbers = #tpu.dot_dimension_numbers<[1], [0], [0], [1], [0, 0, 1, 1], [], []>} : vector<419x4xf32>, vector<4x64xf32>, vector<419x64xf32> -> vector<419x64xf32>
      %c1 = arith.constant 1 : index
      %c0_49 = arith.constant 0 : index
      %93 = vector.load %arg20[%c1, %c0_49] : memref<441x4xf32, #tpu.memory_space<vmem>>, vector<419x4xf32>
      %c1_50 = arith.constant 1 : index
      %c0_51 = arith.constant 0 : index
      %c0_52 = arith.constant 0 : index
      %94 = vector.load %arg3[%c1_50, %c0_51, %c0_52] : memref<4x4x64xf32, #tpu.memory_space<vmem>>, vector<1x4x64xf32>
      %95 = vector.shape_cast %94 : vector<1x4x64xf32> to vector<4x64xf32>
      %cst_53 = arith.constant dense<0.000000e+00> : vector<419x64xf32>
      %96 = tpu.matmul %93, %95, %cst_53 {dimension_numbers = #tpu.dot_dimension_numbers<[1], [0], [0], [1], [0, 0, 1, 1], [], []>} : vector<419x4xf32>, vector<4x64xf32>, vector<419x64xf32> -> vector<419x64xf32>
      %97 = arith.addf %92, %96 : vector<419x64xf32>
      %c21 = arith.constant 21 : index
      %c0_54 = arith.constant 0 : index
      %98 = vector.load %arg20[%c21, %c0_54] : memref<441x4xf32, #tpu.memory_space<vmem>>, vector<419x4xf32>
      %c2 = arith.constant 2 : index
      %c0_55 = arith.constant 0 : index
      %c0_56 = arith.constant 0 : index
      %99 = vector.load %arg3[%c2, %c0_55, %c0_56] : memref<4x4x64xf32, #tpu.memory_space<vmem>>, vector<1x4x64xf32>
      %100 = vector.shape_cast %99 : vector<1x4x64xf32> to vector<4x64xf32>
      %cst_57 = arith.constant dense<0.000000e+00> : vector<419x64xf32>
      %101 = tpu.matmul %98, %100, %cst_57 {dimension_numbers = #tpu.dot_dimension_numbers<[1], [0], [0], [1], [0, 0, 1, 1], [], []>} : vector<419x4xf32>, vector<4x64xf32>, vector<419x64xf32> -> vector<419x64xf32>
      %102 = arith.addf %97, %101 : vector<419x64xf32>
      %c22 = arith.constant 22 : index
      %c0_58 = arith.constant 0 : index
      %103 = vector.load %arg20[%c22, %c0_58] : memref<441x4xf32, #tpu.memory_space<vmem>>, vector<419x4xf32>
      %c3 = arith.constant 3 : index
      %c0_59 = arith.constant 0 : index
      %c0_60 = arith.constant 0 : index
      %104 = vector.load %arg3[%c3, %c0_59, %c0_60] : memref<4x4x64xf32, #tpu.memory_space<vmem>>, vector<1x4x64xf32>
      %105 = vector.shape_cast %104 : vector<1x4x64xf32> to vector<4x64xf32>
      %cst_61 = arith.constant dense<0.000000e+00> : vector<419x64xf32>
      %106 = tpu.matmul %103, %105, %cst_61 {dimension_numbers = #tpu.dot_dimension_numbers<[1], [0], [0], [1], [0, 0, 1, 1], [], []>} : vector<419x4xf32>, vector<4x64xf32>, vector<419x64xf32> -> vector<419x64xf32>
      %107 = arith.addf %102, %106 : vector<419x64xf32>
      %c0_62 = arith.constant 0 : index
      %c0_63 = arith.constant 0 : index
      %108 = vector.load %arg21[%c0_62, %c0_63] : memref<419x64xf32, #tpu.memory_space<vmem>>, vector<419x64xf32>
      tpu.vector_store %arg21[%c0_62, %c0_63], %107 {strides = array<i32>} : memref<419x64xf32, #tpu.memory_space<vmem>>, vector<419x64xf32>,
      %c0_64 = arith.constant 0 : index
      %c0_65 = arith.constant 0 : index
      %109 = vector.load %arg21[%c0_64, %c0_65] : memref<419x64xf32, #tpu.memory_space<vmem>>, vector<397x64xf32>
      %c1_66 = arith.constant 1 : index
      %c0_67 = arith.constant 0 : index
      %110 = vector.load %arg21[%c1_66, %c0_67] : memref<419x64xf32, #tpu.memory_space<vmem>>, vector<397x64xf32>
      %111 = arith.maximumf %109, %110 : vector<397x64xf32>
      %c21_68 = arith.constant 21 : index
      %c0_69 = arith.constant 0 : index
      %112 = vector.load %arg21[%c21_68, %c0_69] : memref<419x64xf32, #tpu.memory_space<vmem>>, vector<397x64xf32>
      %c22_70 = arith.constant 22 : index
      %c0_71 = arith.constant 0 : index
      %113 = vector.load %arg21[%c22_70, %c0_71] : memref<419x64xf32, #tpu.memory_space<vmem>>, vector<397x64xf32>
      %114 = arith.maximumf %112, %113 : vector<397x64xf32>
      %115 = arith.maximumf %111, %114 : vector<397x64xf32>
      %c0_72 = arith.constant 0 : index
      %c0_73 = arith.constant 0 : index
      %116 = vector.load %arg5[%c0_72, %c0_73] : memref<100x397xf32, #tpu.memory_space<vmem>>, vector<100x397xf32>
      %cst_74 = arith.constant dense<0.000000e+00> : vector<100x64xf32>
      %117 = tpu.matmul %116, %115, %cst_74 {dimension_numbers = #tpu.dot_dimension_numbers<[1], [0], [0], [1], [0, 0, 1, 1], [], []>} : vector<100x397xf32>, vector<397x64xf32>, vector<100x64xf32> -> vector<100x64xf32>
      %c0_75 = arith.constant 0 : index
      %c0_76 = arith.constant 0 : index
      %118 = vector.load %arg4[%c0_75, %c0_76] : memref<1x64xf32, #tpu.memory_space<vmem>>, vector<1x64xf32>
      %119 = vector.broadcast %118 : vector<1x64xf32> to vector<100x64xf32>
      %120 = arith.addf %117, %119 : vector<100x64xf32>
      %c0_77 = arith.constant 0 : index
      %c0_78 = arith.constant 0 : index
      %121 = vector.load %arg22[%c0_77, %c0_78] : memref<100x64xf32, #tpu.memory_space<vmem>>, vector<100x64xf32>
      tpu.vector_store %arg22[%c0_77, %c0_78], %120 {strides = array<i32>} : memref<100x64xf32, #tpu.memory_space<vmem>>, vector<100x64xf32>,
      %c0_79 = arith.constant 0 : index
      %c0_80 = arith.constant 0 : index
      %122 = vector.load %arg22[%c0_79, %c0_80] : memref<100x64xf32, #tpu.memory_space<vmem>>, vector<78x64xf32>
      %c0_81 = arith.constant 0 : index
      %c0_82 = arith.constant 0 : index
      %c0_83 = arith.constant 0 : index
      %123 = vector.load %arg6[%c0_81, %c0_82, %c0_83] : memref<9x64x64xf32, #tpu.memory_space<vmem>>, vector<1x64x64xf32>
      %124 = vector.shape_cast %123 : vector<1x64x64xf32> to vector<64x64xf32>
      %cst_84 = arith.constant dense<0.000000e+00> : vector<78x64xf32>
      %125 = tpu.matmul %122, %124, %cst_84 {dimension_numbers = #tpu.dot_dimension_numbers<[1], [0], [0], [1], [0, 0, 1, 1], [], []>} : vector<78x64xf32>, vector<64x64xf32>, vector<78x64xf32> -> vector<78x64xf32>
      %c1_85 = arith.constant 1 : index
      %c0_86 = arith.constant 0 : index
      %126 = vector.load %arg22[%c1_85, %c0_86] : memref<100x64xf32, #tpu.memory_space<vmem>>, vector<78x64xf32>
      %c1_87 = arith.constant 1 : index
      %c0_88 = arith.constant 0 : index
      %c0_89 = arith.constant 0 : index
      %127 = vector.load %arg6[%c1_87, %c0_88, %c0_89] : memref<9x64x64xf32, #tpu.memory_space<vmem>>, vector<1x64x64xf32>
      %128 = vector.shape_cast %127 : vector<1x64x64xf32> to vector<64x64xf32>
      %cst_90 = arith.constant dense<0.000000e+00> : vector<78x64xf32>
      %129 = tpu.matmul %126, %128, %cst_90 {dimension_numbers = #tpu.dot_dimension_numbers<[1], [0], [0], [1], [0, 0, 1, 1], [], []>} : vector<78x64xf32>, vector<64x64xf32>, vector<78x64xf32> -> vector<78x64xf32>
      %130 = arith.addf %125, %129 : vector<78x64xf32>
      %c2_91 = arith.constant 2 : index
      %c0_92 = arith.constant 0 : index
      %131 = vector.load %arg22[%c2_91, %c0_92] : memref<100x64xf32, #tpu.memory_space<vmem>>, vector<78x64xf32>
      %c2_93 = arith.constant 2 : index
      %c0_94 = arith.constant 0 : index
      %c0_95 = arith.constant 0 : index
      %132 = vector.load %arg6[%c2_93, %c0_94, %c0_95] : memref<9x64x64xf32, #tpu.memory_space<vmem>>, vector<1x64x64xf32>
      %133 = vector.shape_cast %132 : vector<1x64x64xf32> to vector<64x64xf32>
      %cst_96 = arith.constant dense<0.000000e+00> : vector<78x64xf32>
      %134 = tpu.matmul %131, %133, %cst_96 {dimension_numbers = #tpu.dot_dimension_numbers<[1], [0], [0], [1], [0, 0, 1, 1], [], []>} : vector<78x64xf32>, vector<64x64xf32>, vector<78x64xf32> -> vector<78x64xf32>
      %135 = arith.addf %130, %134 : vector<78x64xf32>
      %c10 = arith.constant 10 : index
      %c0_97 = arith.constant 0 : index
      %136 = vector.load %arg22[%c10, %c0_97] : memref<100x64xf32, #tpu.memory_space<vmem>>, vector<78x64xf32>
      %c3_98 = arith.constant 3 : index
      %c0_99 = arith.constant 0 : index
      %c0_100 = arith.constant 0 : index
      %137 = vector.load %arg6[%c3_98, %c0_99, %c0_100] : memref<9x64x64xf32, #tpu.memory_space<vmem>>, vector<1x64x64xf32>
      %138 = vector.shape_cast %137 : vector<1x64x64xf32> to vector<64x64xf32>
      %cst_101 = arith.constant dense<0.000000e+00> : vector<78x64xf32>
      %139 = tpu.matmul %136, %138, %cst_101 {dimension_numbers = #tpu.dot_dimension_numbers<[1], [0], [0], [1], [0, 0, 1, 1], [], []>} : vector<78x64xf32>, vector<64x64xf32>, vector<78x64xf32> -> vector<78x64xf32>
      %140 = arith.addf %135, %139 : vector<78x64xf32>
      %c11 = arith.constant 11 : index
      %c0_102 = arith.constant 0 : index
      %141 = vector.load %arg22[%c11, %c0_102] : memref<100x64xf32, #tpu.memory_space<vmem>>, vector<78x64xf32>
      %c4 = arith.constant 4 : index
      %c0_103 = arith.constant 0 : index
      %c0_104 = arith.constant 0 : index
      %142 = vector.load %arg6[%c4, %c0_103, %c0_104] : memref<9x64x64xf32, #tpu.memory_space<vmem>>, vector<1x64x64xf32>
      %143 = vector.shape_cast %142 : vector<1x64x64xf32> to vector<64x64xf32>
      %cst_105 = arith.constant dense<0.000000e+00> : vector<78x64xf32>
      %144 = tpu.matmul %141, %143, %cst_105 {dimension_numbers = #tpu.dot_dimension_numbers<[1], [0], [0], [1], [0, 0, 1, 1], [], []>} : vector<78x64xf32>, vector<64x64xf32>, vector<78x64xf32> -> vector<78x64xf32>
      %145 = arith.addf %140, %144 : vector<78x64xf32>
      %c12 = arith.constant 12 : index
      %c0_106 = arith.constant 0 : index
      %146 = vector.load %arg22[%c12, %c0_106] : memref<100x64xf32, #tpu.memory_space<vmem>>, vector<78x64xf32>
      %c5 = arith.constant 5 : index
      %c0_107 = arith.constant 0 : index
      %c0_108 = arith.constant 0 : index
      %147 = vector.load %arg6[%c5, %c0_107, %c0_108] : memref<9x64x64xf32, #tpu.memory_space<vmem>>, vector<1x64x64xf32>
      %148 = vector.shape_cast %147 : vector<1x64x64xf32> to vector<64x64xf32>
      %cst_109 = arith.constant dense<0.000000e+00> : vector<78x64xf32>
      %149 = tpu.matmul %146, %148, %cst_109 {dimension_numbers = #tpu.dot_dimension_numbers<[1], [0], [0], [1], [0, 0, 1, 1], [], []>} : vector<78x64xf32>, vector<64x64xf32>, vector<78x64xf32> -> vector<78x64xf32>
      %150 = arith.addf %145, %149 : vector<78x64xf32>
      %c20 = arith.constant 20 : index
      %c0_110 = arith.constant 0 : index
      %151 = vector.load %arg22[%c20, %c0_110] : memref<100x64xf32, #tpu.memory_space<vmem>>, vector<78x64xf32>
      %c6 = arith.constant 6 : index
      %c0_111 = arith.constant 0 : index
      %c0_112 = arith.constant 0 : index
      %152 = vector.load %arg6[%c6, %c0_111, %c0_112] : memref<9x64x64xf32, #tpu.memory_space<vmem>>, vector<1x64x64xf32>
      %153 = vector.shape_cast %152 : vector<1x64x64xf32> to vector<64x64xf32>
      %cst_113 = arith.constant dense<0.000000e+00> : vector<78x64xf32>
      %154 = tpu.matmul %151, %153, %cst_113 {dimension_numbers = #tpu.dot_dimension_numbers<[1], [0], [0], [1], [0, 0, 1, 1], [], []>} : vector<78x64xf32>, vector<64x64xf32>, vector<78x64xf32> -> vector<78x64xf32>
      %155 = arith.addf %150, %154 : vector<78x64xf32>
      %c21_114 = arith.constant 21 : index
      %c0_115 = arith.constant 0 : index
      %156 = vector.load %arg22[%c21_114, %c0_115] : memref<100x64xf32, #tpu.memory_space<vmem>>, vector<78x64xf32>
      %c7 = arith.constant 7 : index
      %c0_116 = arith.constant 0 : index
      %c0_117 = arith.constant 0 : index
      %157 = vector.load %arg6[%c7, %c0_116, %c0_117] : memref<9x64x64xf32, #tpu.memory_space<vmem>>, vector<1x64x64xf32>
      %158 = vector.shape_cast %157 : vector<1x64x64xf32> to vector<64x64xf32>
      %cst_118 = arith.constant dense<0.000000e+00> : vector<78x64xf32>
      %159 = tpu.matmul %156, %158, %cst_118 {dimension_numbers = #tpu.dot_dimension_numbers<[1], [0], [0], [1], [0, 0, 1, 1], [], []>} : vector<78x64xf32>, vector<64x64xf32>, vector<78x64xf32> -> vector<78x64xf32>
      %160 = arith.addf %155, %159 : vector<78x64xf32>
      %c22_119 = arith.constant 22 : index
      %c0_120 = arith.constant 0 : index
      %161 = vector.load %arg22[%c22_119, %c0_120] : memref<100x64xf32, #tpu.memory_space<vmem>>, vector<78x64xf32>
      %c8 = arith.constant 8 : index
      %c0_121 = arith.constant 0 : index
      %c0_122 = arith.constant 0 : index
      %162 = vector.load %arg6[%c8, %c0_121, %c0_122] : memref<9x64x64xf32, #tpu.memory_space<vmem>>, vector<1x64x64xf32>
      %163 = vector.shape_cast %162 : vector<1x64x64xf32> to vector<64x64xf32>
      %cst_123 = arith.constant dense<0.000000e+00> : vector<78x64xf32>
      %164 = tpu.matmul %161, %163, %cst_123 {dimension_numbers = #tpu.dot_dimension_numbers<[1], [0], [0], [1], [0, 0, 1, 1], [], []>} : vector<78x64xf32>, vector<64x64xf32>, vector<78x64xf32> -> vector<78x64xf32>
      %165 = arith.addf %160, %164 : vector<78x64xf32>
      %c0_124 = arith.constant 0 : index
      %c0_125 = arith.constant 0 : index
      %166 = vector.load %arg21[%c0_124, %c0_125] : memref<419x64xf32, #tpu.memory_space<vmem>>, vector<78x64xf32>
      tpu.vector_store %arg21[%c0_124, %c0_125], %165 {strides = array<i32>} : memref<419x64xf32, #tpu.memory_space<vmem>>, vector<78x64xf32>,
      %c0_126 = arith.constant 0 : index
      %c0_127 = arith.constant 0 : index
      %167 = vector.load %arg21[%c0_126, %c0_127] : memref<419x64xf32, #tpu.memory_space<vmem>>, vector<67x64xf32>
      %c1_128 = arith.constant 1 : index
      %c0_129 = arith.constant 0 : index
      %168 = vector.load %arg21[%c1_128, %c0_129] : memref<419x64xf32, #tpu.memory_space<vmem>>, vector<67x64xf32>
      %169 = arith.maximumf %167, %168 : vector<67x64xf32>
      %c10_130 = arith.constant 10 : index
      %c0_131 = arith.constant 0 : index
      %170 = vector.load %arg21[%c10_130, %c0_131] : memref<419x64xf32, #tpu.memory_space<vmem>>, vector<67x64xf32>
      %c11_132 = arith.constant 11 : index
      %c0_133 = arith.constant 0 : index
      %171 = vector.load %arg21[%c11_132, %c0_133] : memref<419x64xf32, #tpu.memory_space<vmem>>, vector<67x64xf32>
      %172 = arith.maximumf %170, %171 : vector<67x64xf32>
      %173 = arith.maximumf %169, %172 : vector<67x64xf32>
      %c0_134 = arith.constant 0 : index
      %c0_135 = arith.constant 0 : index
      %174 = vector.load %arg8[%c0_134, %c0_135] : memref<16x67xf32, #tpu.memory_space<vmem>>, vector<16x67xf32>
      %cst_136 = arith.constant dense<0.000000e+00> : vector<16x64xf32>
      %175 = tpu.matmul %174, %173, %cst_136 {dimension_numbers = #tpu.dot_dimension_numbers<[1], [0], [0], [1], [0, 0, 1, 1], [], []>} : vector<16x67xf32>, vector<67x64xf32>, vector<16x64xf32> -> vector<16x64xf32>
      %c0_137 = arith.constant 0 : index
      %c0_138 = arith.constant 0 : index
      %176 = vector.load %arg7[%c0_137, %c0_138] : memref<1x64xf32, #tpu.memory_space<vmem>>, vector<1x64xf32>
      %177 = vector.broadcast %176 : vector<1x64xf32> to vector<16x64xf32>
      %178 = arith.addf %175, %177 : vector<16x64xf32>
      %c0_139 = arith.constant 0 : index
      %c0_140 = arith.constant 0 : index
      %179 = vector.load %arg23[%c0_139, %c0_140] : memref<16x64xf32, #tpu.memory_space<vmem>>, vector<16x64xf32>
      tpu.vector_store %arg23[%c0_139, %c0_140], %178 {strides = array<i32>} : memref<16x64xf32, #tpu.memory_space<vmem>>, vector<16x64xf32>,
      %c0_141 = arith.constant 0 : index
      %c0_142 = arith.constant 0 : index
      %180 = vector.load %arg23[%c0_141, %c0_142] : memref<16x64xf32, #tpu.memory_space<vmem>>, vector<6x64xf32>
      %c0_143 = arith.constant 0 : index
      %c0_144 = arith.constant 0 : index
      %c0_145 = arith.constant 0 : index
      %181 = vector.load %arg9[%c0_143, %c0_144, %c0_145] : memref<9x64x32xf32, #tpu.memory_space<vmem>>, vector<1x64x32xf32>
      %182 = vector.shape_cast %181 : vector<1x64x32xf32> to vector<64x32xf32>
      %cst_146 = arith.constant dense<0.000000e+00> : vector<6x32xf32>
      %183 = tpu.matmul %180, %182, %cst_146 {dimension_numbers = #tpu.dot_dimension_numbers<[1], [0], [0], [1], [0, 0, 1, 1], [], []>} : vector<6x64xf32>, vector<64x32xf32>, vector<6x32xf32> -> vector<6x32xf32>
      %c1_147 = arith.constant 1 : index
      %c0_148 = arith.constant 0 : index
      %184 = vector.load %arg23[%c1_147, %c0_148] : memref<16x64xf32, #tpu.memory_space<vmem>>, vector<6x64xf32>
      %c1_149 = arith.constant 1 : index
      %c0_150 = arith.constant 0 : index
      %c0_151 = arith.constant 0 : index
      %185 = vector.load %arg9[%c1_149, %c0_150, %c0_151] : memref<9x64x32xf32, #tpu.memory_space<vmem>>, vector<1x64x32xf32>
      %186 = vector.shape_cast %185 : vector<1x64x32xf32> to vector<64x32xf32>
      %cst_152 = arith.constant dense<0.000000e+00> : vector<6x32xf32>
      %187 = tpu.matmul %184, %186, %cst_152 {dimension_numbers = #tpu.dot_dimension_numbers<[1], [0], [0], [1], [0, 0, 1, 1], [], []>} : vector<6x64xf32>, vector<64x32xf32>, vector<6x32xf32> -> vector<6x32xf32>
      %188 = arith.addf %183, %187 : vector<6x32xf32>
      %c2_153 = arith.constant 2 : index
      %c0_154 = arith.constant 0 : index
      %189 = vector.load %arg23[%c2_153, %c0_154] : memref<16x64xf32, #tpu.memory_space<vmem>>, vector<6x64xf32>
      %c2_155 = arith.constant 2 : index
      %c0_156 = arith.constant 0 : index
      %c0_157 = arith.constant 0 : index
      %190 = vector.load %arg9[%c2_155, %c0_156, %c0_157] : memref<9x64x32xf32, #tpu.memory_space<vmem>>, vector<1x64x32xf32>
      %191 = vector.shape_cast %190 : vector<1x64x32xf32> to vector<64x32xf32>
      %cst_158 = arith.constant dense<0.000000e+00> : vector<6x32xf32>
      %192 = tpu.matmul %189, %191, %cst_158 {dimension_numbers = #tpu.dot_dimension_numbers<[1], [0], [0], [1], [0, 0, 1, 1], [], []>} : vector<6x64xf32>, vector<64x32xf32>, vector<6x32xf32> -> vector<6x32xf32>
      %193 = arith.addf %188, %192 : vector<6x32xf32>
      %c4_159 = arith.constant 4 : index
      %c0_160 = arith.constant 0 : index
      %194 = vector.load %arg23[%c4_159, %c0_160] : memref<16x64xf32, #tpu.memory_space<vmem>>, vector<6x64xf32>
      %c3_161 = arith.constant 3 : index
      %c0_162 = arith.constant 0 : index
      %c0_163 = arith.constant 0 : index
      %195 = vector.load %arg9[%c3_161, %c0_162, %c0_163] : memref<9x64x32xf32, #tpu.memory_space<vmem>>, vector<1x64x32xf32>
      %196 = vector.shape_cast %195 : vector<1x64x32xf32> to vector<64x32xf32>
      %cst_164 = arith.constant dense<0.000000e+00> : vector<6x32xf32>
      %197 = tpu.matmul %194, %196, %cst_164 {dimension_numbers = #tpu.dot_dimension_numbers<[1], [0], [0], [1], [0, 0, 1, 1], [], []>} : vector<6x64xf32>, vector<64x32xf32>, vector<6x32xf32> -> vector<6x32xf32>
      %198 = arith.addf %193, %197 : vector<6x32xf32>
      %c5_165 = arith.constant 5 : index
      %c0_166 = arith.constant 0 : index
      %199 = vector.load %arg23[%c5_165, %c0_166] : memref<16x64xf32, #tpu.memory_space<vmem>>, vector<6x64xf32>
      %c4_167 = arith.constant 4 : index
      %c0_168 = arith.constant 0 : index
      %c0_169 = arith.constant 0 : index
      %200 = vector.load %arg9[%c4_167, %c0_168, %c0_169] : memref<9x64x32xf32, #tpu.memory_space<vmem>>, vector<1x64x32xf32>
      %201 = vector.shape_cast %200 : vector<1x64x32xf32> to vector<64x32xf32>
      %cst_170 = arith.constant dense<0.000000e+00> : vector<6x32xf32>
      %202 = tpu.matmul %199, %201, %cst_170 {dimension_numbers = #tpu.dot_dimension_numbers<[1], [0], [0], [1], [0, 0, 1, 1], [], []>} : vector<6x64xf32>, vector<64x32xf32>, vector<6x32xf32> -> vector<6x32xf32>
      %203 = arith.addf %198, %202 : vector<6x32xf32>
      %c6_171 = arith.constant 6 : index
      %c0_172 = arith.constant 0 : index
      %204 = vector.load %arg23[%c6_171, %c0_172] : memref<16x64xf32, #tpu.memory_space<vmem>>, vector<6x64xf32>
      %c5_173 = arith.constant 5 : index
      %c0_174 = arith.constant 0 : index
      %c0_175 = arith.constant 0 : index
      %205 = vector.load %arg9[%c5_173, %c0_174, %c0_175] : memref<9x64x32xf32, #tpu.memory_space<vmem>>, vector<1x64x32xf32>
      %206 = vector.shape_cast %205 : vector<1x64x32xf32> to vector<64x32xf32>
      %cst_176 = arith.constant dense<0.000000e+00> : vector<6x32xf32>
      %207 = tpu.matmul %204, %206, %cst_176 {dimension_numbers = #tpu.dot_dimension_numbers<[1], [0], [0], [1], [0, 0, 1, 1], [], []>} : vector<6x64xf32>, vector<64x32xf32>, vector<6x32xf32> -> vector<6x32xf32>
      %208 = arith.addf %203, %207 : vector<6x32xf32>
      %c8_177 = arith.constant 8 : index
      %c0_178 = arith.constant 0 : index
      %209 = vector.load %arg23[%c8_177, %c0_178] : memref<16x64xf32, #tpu.memory_space<vmem>>, vector<6x64xf32>
      %c6_179 = arith.constant 6 : index
      %c0_180 = arith.constant 0 : index
      %c0_181 = arith.constant 0 : index
      %210 = vector.load %arg9[%c6_179, %c0_180, %c0_181] : memref<9x64x32xf32, #tpu.memory_space<vmem>>, vector<1x64x32xf32>
      %211 = vector.shape_cast %210 : vector<1x64x32xf32> to vector<64x32xf32>
      %cst_182 = arith.constant dense<0.000000e+00> : vector<6x32xf32>
      %212 = tpu.matmul %209, %211, %cst_182 {dimension_numbers = #tpu.dot_dimension_numbers<[1], [0], [0], [1], [0, 0, 1, 1], [], []>} : vector<6x64xf32>, vector<64x32xf32>, vector<6x32xf32> -> vector<6x32xf32>
      %213 = arith.addf %208, %212 : vector<6x32xf32>
      %c9 = arith.constant 9 : index
      %c0_183 = arith.constant 0 : index
      %214 = vector.load %arg23[%c9, %c0_183] : memref<16x64xf32, #tpu.memory_space<vmem>>, vector<6x64xf32>
      %c7_184 = arith.constant 7 : index
      %c0_185 = arith.constant 0 : index
      %c0_186 = arith.constant 0 : index
      %215 = vector.load %arg9[%c7_184, %c0_185, %c0_186] : memref<9x64x32xf32, #tpu.memory_space<vmem>>, vector<1x64x32xf32>
      %216 = vector.shape_cast %215 : vector<1x64x32xf32> to vector<64x32xf32>
      %cst_187 = arith.constant dense<0.000000e+00> : vector<6x32xf32>
      %217 = tpu.matmul %214, %216, %cst_187 {dimension_numbers = #tpu.dot_dimension_numbers<[1], [0], [0], [1], [0, 0, 1, 1], [], []>} : vector<6x64xf32>, vector<64x32xf32>, vector<6x32xf32> -> vector<6x32xf32>
      %218 = arith.addf %213, %217 : vector<6x32xf32>
      %c10_188 = arith.constant 10 : index
      %c0_189 = arith.constant 0 : index
      %219 = vector.load %arg23[%c10_188, %c0_189] : memref<16x64xf32, #tpu.memory_space<vmem>>, vector<6x64xf32>
      %c8_190 = arith.constant 8 : index
      %c0_191 = arith.constant 0 : index
      %c0_192 = arith.constant 0 : index
      %220 = vector.load %arg9[%c8_190, %c0_191, %c0_192] : memref<9x64x32xf32, #tpu.memory_space<vmem>>, vector<1x64x32xf32>
      %221 = vector.shape_cast %220 : vector<1x64x32xf32> to vector<64x32xf32>
      %cst_193 = arith.constant dense<0.000000e+00> : vector<6x32xf32>
      %222 = tpu.matmul %219, %221, %cst_193 {dimension_numbers = #tpu.dot_dimension_numbers<[1], [0], [0], [1], [0, 0, 1, 1], [], []>} : vector<6x64xf32>, vector<64x32xf32>, vector<6x32xf32> -> vector<6x32xf32>
      %223 = arith.addf %218, %222 : vector<6x32xf32>
      %c0_194 = arith.constant 0 : index
      %c0_195 = arith.constant 0 : index
      %224 = vector.load %arg21[%c0_194, %c0_195] : memref<419x64xf32, #tpu.memory_space<vmem>>, vector<6x32xf32>
      tpu.vector_store %arg21[%c0_194, %c0_195], %223 {strides = array<i32>} : memref<419x64xf32, #tpu.memory_space<vmem>>, vector<6x32xf32>,
      %c0_196 = arith.constant 0 : index
      %c0_197 = arith.constant 0 : index
      %225 = vector.load %arg21[%c0_196, %c0_197] : memref<419x64xf32, #tpu.memory_space<vmem>>, vector<1x32xf32>
      %c1_198 = arith.constant 1 : index
      %c0_199 = arith.constant 0 : index
      %226 = vector.load %arg21[%c1_198, %c0_199] : memref<419x64xf32, #tpu.memory_space<vmem>>, vector<1x32xf32>
      %227 = arith.maximumf %225, %226 : vector<1x32xf32>
      %c4_200 = arith.constant 4 : index
      %c0_201 = arith.constant 0 : index
      %228 = vector.load %arg21[%c4_200, %c0_201] : memref<419x64xf32, #tpu.memory_space<vmem>>, vector<1x32xf32>
      %c5_202 = arith.constant 5 : index
      %c0_203 = arith.constant 0 : index
      %229 = vector.load %arg21[%c5_202, %c0_203] : memref<419x64xf32, #tpu.memory_space<vmem>>, vector<1x32xf32>
      %230 = arith.maximumf %228, %229 : vector<1x32xf32>
      %231 = arith.maximumf %227, %230 : vector<1x32xf32>
      %c0_204 = arith.constant 0 : index
      %c0_205 = arith.constant 0 : index
      %232 = vector.load %arg10[%c0_204, %c0_205] : memref<1x32xf32, #tpu.memory_space<vmem>>, vector<1x32xf32>
      %233 = arith.addf %231, %232 : vector<1x32xf32>
      %234 = arith.index_cast %arg25 : i32 to index
      %c0_206 = arith.constant 0 : index
      %235 = vector.load %arg24[%234, %c0_206] : memref<8x32xf32, #tpu.memory_space<vmem>>, vector<1x32xf32>
      tpu.vector_store %arg24[%234, %c0_206], %233 {strides = array<i32>} : memref<8x32xf32, #tpu.memory_space<vmem>>, vector<1x32xf32>,
    }
    %c8_i32_0 = arith.constant 8 : i32
    %c0 = arith.constant 0 : index
    %c0_1 = arith.constant 0 : index
    %1 = vector.load %arg1[%c0, %c0_1] : memref<8x8xf32, #tpu.memory_space<vmem>>, vector<8x8xf32>
    %c0_2 = arith.constant 0 : index
    %c0_3 = arith.constant 0 : index
    %2 = vector.load %arg12[%c0_2, %c0_3] : memref<8x32xf32, #tpu.memory_space<vmem>>, vector<8x32xf32>
    %cst = arith.constant dense<0.000000e+00> : vector<8x32xf32>
    %3 = tpu.matmul %1, %2, %cst {dimension_numbers = #tpu.dot_dimension_numbers<[1], [0], [0], [1], [0, 0, 1, 1], [], []>} : vector<8x8xf32>, vector<8x32xf32>, vector<8x32xf32> -> vector<8x32xf32>
    %c0_4 = arith.constant 0 : index
    %c0_5 = arith.constant 0 : index
    %4 = vector.load %arg24[%c0_4, %c0_5] : memref<8x32xf32, #tpu.memory_space<vmem>>, vector<8x32xf32>
    %c0_6 = arith.constant 0 : index
    %c0_7 = arith.constant 0 : index
    %5 = vector.load %arg13[%c0_6, %c0_7] : memref<32x32xf32, #tpu.memory_space<vmem>>, vector<32x32xf32>
    %cst_8 = arith.constant dense<0.000000e+00> : vector<8x32xf32>
    %6 = tpu.matmul %4, %5, %cst_8 {dimension_numbers = #tpu.dot_dimension_numbers<[1], [0], [0], [1], [0, 0, 1, 1], [], []>} : vector<8x32xf32>, vector<32x32xf32>, vector<8x32xf32> -> vector<8x32xf32>
    %7 = arith.addf %3, %6 : vector<8x32xf32>
    %c0_9 = arith.constant 0 : index
    %c0_10 = arith.constant 0 : index
    %8 = vector.load %arg14[%c0_9, %c0_10] : memref<1x32xf32, #tpu.memory_space<vmem>>, vector<1x32xf32>
    %9 = vector.broadcast %8 : vector<1x32xf32> to vector<8x32xf32>
    %10 = arith.addf %7, %9 : vector<8x32xf32>
    %cst_11 = arith.constant 0.000000e+00 : f32
    %11 = vector.broadcast %cst_11 : f32 to vector<8x32xf32>
    %12 = arith.maximumf %10, %11 : vector<8x32xf32>
    %c0_12 = arith.constant 0 : index
    %c0_13 = arith.constant 0 : index
    %13 = vector.load %arg15[%c0_12, %c0_13] : memref<32x32xf32, #tpu.memory_space<vmem>>, vector<32x32xf32>
    %cst_14 = arith.constant dense<0.000000e+00> : vector<8x32xf32>
    %14 = tpu.matmul %12, %13, %cst_14 {dimension_numbers = #tpu.dot_dimension_numbers<[1], [0], [0], [1], [0, 0, 1, 1], [], []>} : vector<8x32xf32>, vector<32x32xf32>, vector<8x32xf32> -> vector<8x32xf32>
    %c0_15 = arith.constant 0 : index
    %c0_16 = arith.constant 0 : index
    %15 = vector.load %arg16[%c0_15, %c0_16] : memref<1x32xf32, #tpu.memory_space<vmem>>, vector<1x32xf32>
    %16 = vector.broadcast %15 : vector<1x32xf32> to vector<8x32xf32>
    %17 = arith.addf %14, %16 : vector<8x32xf32>
    %cst_17 = arith.constant 0.000000e+00 : f32
    %18 = vector.broadcast %cst_17 : f32 to vector<8x32xf32>
    %19 = arith.maximumf %17, %18 : vector<8x32xf32>
    %c0_18 = arith.constant 0 : index
    %c0_19 = arith.constant 0 : index
    %20 = vector.load %arg17[%c0_18, %c0_19] : memref<32x640xf32, #tpu.memory_space<vmem>>, vector<32x640xf32>
    %cst_20 = arith.constant dense<0.000000e+00> : vector<8x640xf32>
    %21 = tpu.matmul %19, %20, %cst_20 {dimension_numbers = #tpu.dot_dimension_numbers<[1], [0], [0], [1], [0, 0, 1, 1], [], []>} : vector<8x32xf32>, vector<32x640xf32>, vector<8x640xf32> -> vector<8x640xf32>
    %c0_21 = arith.constant 0 : index
    %c0_22 = arith.constant 0 : index
    %22 = vector.load %arg18[%c0_21, %c0_22] : memref<1x640xf32, #tpu.memory_space<vmem>>, vector<1x640xf32>
    %23 = vector.broadcast %22 : vector<1x640xf32> to vector<8x640xf32>
    %24 = arith.addf %21, %23 : vector<8x640xf32>
    %25 = vector.extract_strided_slice %24 {offsets = [0, 0], sizes = [8, 128], strides = [1, 1]} : vector<8x640xf32> to vector<8x128xf32>
    %cst_23 = arith.constant dense<0xFF800000> : vector<8xf32>
    %26 = vector.multi_reduction <maximumf>, %25, %cst_23 [1] : vector<8x128xf32> to vector<8xf32>
    %27 = vector.shape_cast %26 : vector<8xf32> to vector<8x1xf32>
    %28 = vector.broadcast %27 : vector<8x1xf32> to vector<8x128xf32>
    %29 = arith.subf %25, %28 : vector<8x128xf32>
    %30 = math.exp %29 : vector<8x128xf32>
    %cst_24 = arith.constant dense<0.000000e+00> : vector<8xf32>
    %31 = vector.multi_reduction <add>, %30, %cst_24 [1] : vector<8x128xf32> to vector<8xf32>
    %32 = vector.shape_cast %31 : vector<8xf32> to vector<8x1xf32>
    %33 = tpu.reciprocal %32 : vector<8x1xf32> -> vector<8x1xf32>
    %34 = vector.broadcast %33 : vector<8x1xf32> to vector<8x128xf32>
    %35 = arith.mulf %30, %34 : vector<8x128xf32>
    %c0_25 = arith.constant 0 : index
    %c0_26 = arith.constant 0 : index
    %36 = vector.load %arg19[%c0_25, %c0_26] : memref<8x640xf32, #tpu.memory_space<vmem>>, vector<8x128xf32>
    tpu.vector_store %arg19[%c0_25, %c0_26], %35 {strides = array<i32>} : memref<8x640xf32, #tpu.memory_space<vmem>>, vector<8x128xf32>,
    %37 = vector.extract_strided_slice %24 {offsets = [0, 128], sizes = [8, 128], strides = [1, 1]} : vector<8x640xf32> to vector<8x128xf32>
    %cst_27 = arith.constant dense<0xFF800000> : vector<8xf32>
    %38 = vector.multi_reduction <maximumf>, %37, %cst_27 [1] : vector<8x128xf32> to vector<8xf32>
    %39 = vector.shape_cast %38 : vector<8xf32> to vector<8x1xf32>
    %40 = vector.broadcast %39 : vector<8x1xf32> to vector<8x128xf32>
    %41 = arith.subf %37, %40 : vector<8x128xf32>
    %42 = math.exp %41 : vector<8x128xf32>
    %cst_28 = arith.constant dense<0.000000e+00> : vector<8xf32>
    %43 = vector.multi_reduction <add>, %42, %cst_28 [1] : vector<8x128xf32> to vector<8xf32>
    %44 = vector.shape_cast %43 : vector<8xf32> to vector<8x1xf32>
    %45 = tpu.reciprocal %44 : vector<8x1xf32> -> vector<8x1xf32>
    %46 = vector.broadcast %45 : vector<8x1xf32> to vector<8x128xf32>
    %47 = arith.mulf %42, %46 : vector<8x128xf32>
    %c0_29 = arith.constant 0 : index
    %c128 = arith.constant 128 : index
    %48 = vector.load %arg19[%c0_29, %c128] : memref<8x640xf32, #tpu.memory_space<vmem>>, vector<8x128xf32>
    tpu.vector_store %arg19[%c0_29, %c128], %47 {strides = array<i32>} : memref<8x640xf32, #tpu.memory_space<vmem>>, vector<8x128xf32>,
    %49 = vector.extract_strided_slice %24 {offsets = [0, 256], sizes = [8, 128], strides = [1, 1]} : vector<8x640xf32> to vector<8x128xf32>
    %cst_30 = arith.constant dense<0xFF800000> : vector<8xf32>
    %50 = vector.multi_reduction <maximumf>, %49, %cst_30 [1] : vector<8x128xf32> to vector<8xf32>
    %51 = vector.shape_cast %50 : vector<8xf32> to vector<8x1xf32>
    %52 = vector.broadcast %51 : vector<8x1xf32> to vector<8x128xf32>
    %53 = arith.subf %49, %52 : vector<8x128xf32>
    %54 = math.exp %53 : vector<8x128xf32>
    %cst_31 = arith.constant dense<0.000000e+00> : vector<8xf32>
    %55 = vector.multi_reduction <add>, %54, %cst_31 [1] : vector<8x128xf32> to vector<8xf32>
    %56 = vector.shape_cast %55 : vector<8xf32> to vector<8x1xf32>
    %57 = tpu.reciprocal %56 : vector<8x1xf32> -> vector<8x1xf32>
    %58 = vector.broadcast %57 : vector<8x1xf32> to vector<8x128xf32>
    %59 = arith.mulf %54, %58 : vector<8x128xf32>
    %c0_32 = arith.constant 0 : index
    %c256 = arith.constant 256 : index
    %60 = vector.load %arg19[%c0_32, %c256] : memref<8x640xf32, #tpu.memory_space<vmem>>, vector<8x128xf32>
    tpu.vector_store %arg19[%c0_32, %c256], %59 {strides = array<i32>} : memref<8x640xf32, #tpu.memory_space<vmem>>, vector<8x128xf32>,
    %61 = vector.extract_strided_slice %24 {offsets = [0, 384], sizes = [8, 128], strides = [1, 1]} : vector<8x640xf32> to vector<8x128xf32>
    %cst_33 = arith.constant dense<0xFF800000> : vector<8xf32>
    %62 = vector.multi_reduction <maximumf>, %61, %cst_33 [1] : vector<8x128xf32> to vector<8xf32>
    %63 = vector.shape_cast %62 : vector<8xf32> to vector<8x1xf32>
    %64 = vector.broadcast %63 : vector<8x1xf32> to vector<8x128xf32>
    %65 = arith.subf %61, %64 : vector<8x128xf32>
    %66 = math.exp %65 : vector<8x128xf32>
    %cst_34 = arith.constant dense<0.000000e+00> : vector<8xf32>
    %67 = vector.multi_reduction <add>, %66, %cst_34 [1] : vector<8x128xf32> to vector<8xf32>
    %68 = vector.shape_cast %67 : vector<8xf32> to vector<8x1xf32>
    %69 = tpu.reciprocal %68 : vector<8x1xf32> -> vector<8x1xf32>
    %70 = vector.broadcast %69 : vector<8x1xf32> to vector<8x128xf32>
    %71 = arith.mulf %66, %70 : vector<8x128xf32>
    %c0_35 = arith.constant 0 : index
    %c384 = arith.constant 384 : index
    %72 = vector.load %arg19[%c0_35, %c384] : memref<8x640xf32, #tpu.memory_space<vmem>>, vector<8x128xf32>
    tpu.vector_store %arg19[%c0_35, %c384], %71 {strides = array<i32>} : memref<8x640xf32, #tpu.memory_space<vmem>>, vector<8x128xf32>,
    %73 = vector.extract_strided_slice %24 {offsets = [0, 512], sizes = [8, 128], strides = [1, 1]} : vector<8x640xf32> to vector<8x128xf32>
    %cst_36 = arith.constant dense<0xFF800000> : vector<8xf32>
    %74 = vector.multi_reduction <maximumf>, %73, %cst_36 [1] : vector<8x128xf32> to vector<8xf32>
    %75 = vector.shape_cast %74 : vector<8xf32> to vector<8x1xf32>
    %76 = vector.broadcast %75 : vector<8x1xf32> to vector<8x128xf32>
    %77 = arith.subf %73, %76 : vector<8x128xf32>
    %78 = math.exp %77 : vector<8x128xf32>
    %cst_37 = arith.constant dense<0.000000e+00> : vector<8xf32>
    %79 = vector.multi_reduction <add>, %78, %cst_37 [1] : vector<8x128xf32> to vector<8xf32>
    %80 = vector.shape_cast %79 : vector<8xf32> to vector<8x1xf32>
    %81 = tpu.reciprocal %80 : vector<8x1xf32> -> vector<8x1xf32>
    %82 = vector.broadcast %81 : vector<8x1xf32> to vector<8x128xf32>
    %83 = arith.mulf %78, %82 : vector<8x128xf32>
    %c0_38 = arith.constant 0 : index
    %c512 = arith.constant 512 : index
    %84 = vector.load %arg19[%c0_38, %c512] : memref<8x640xf32, #tpu.memory_space<vmem>>, vector<8x128xf32>
    tpu.vector_store %arg19[%c0_38, %c512], %83 {strides = array<i32>} : memref<8x640xf32, #tpu.memory_space<vmem>>, vector<8x128xf32>,
    return
  }
  func.func @transform_0(%arg0: i32) -> (i32, i32) {
    %c0_i32 = arith.constant 0 : i32
    %c0_i32_0 = arith.constant 0 : i32
    return %arg0, %c0_i32 : i32, i32
  }
  func.func @transform_1(%arg0: i32) -> (i32, i32, i32) {
    %c0_i32 = arith.constant 0 : i32
    %c0_i32_0 = arith.constant 0 : i32
    %c0_i32_1 = arith.constant 0 : i32
    return %arg0, %c0_i32, %c0_i32_0 : i32, i32, i32
  }
  func.func @transform_2(%arg0: i32) -> (i32, i32, i32) {
    %c0_i32 = arith.constant 0 : i32
    %c0_i32_0 = arith.constant 0 : i32
    %c0_i32_1 = arith.constant 0 : i32
    %c0_i32_2 = arith.constant 0 : i32
    return %c0_i32, %c0_i32_0, %c0_i32_1 : i32, i32, i32
  }
  func.func @transform_3(%arg0: i32) -> (i32, i32) {
    %c0_i32 = arith.constant 0 : i32
    %c0_i32_0 = arith.constant 0 : i32
    %c0_i32_1 = arith.constant 0 : i32
    return %c0_i32, %c0_i32_0 : i32, i32
  }
  func.func @transform_4(%arg0: i32) -> (i32, i32) {
    %c0_i32 = arith.constant 0 : i32
    %c0_i32_0 = arith.constant 0 : i32
    %c0_i32_1 = arith.constant 0 : i32
    return %c0_i32, %c0_i32_0 : i32, i32
  }
  func.func @transform_5(%arg0: i32) -> (i32, i32, i32) {
    %c0_i32 = arith.constant 0 : i32
    %c0_i32_0 = arith.constant 0 : i32
    %c0_i32_1 = arith.constant 0 : i32
    %c0_i32_2 = arith.constant 0 : i32
    return %c0_i32, %c0_i32_0, %c0_i32_1 : i32, i32, i32
  }
  func.func @transform_6(%arg0: i32) -> (i32, i32) {
    %c0_i32 = arith.constant 0 : i32
    %c0_i32_0 = arith.constant 0 : i32
    %c0_i32_1 = arith.constant 0 : i32
    return %c0_i32, %c0_i32_0 : i32, i32
  }
  func.func @transform_7(%arg0: i32) -> (i32, i32) {
    %c0_i32 = arith.constant 0 : i32
    %c0_i32_0 = arith.constant 0 : i32
    %c0_i32_1 = arith.constant 0 : i32
    return %c0_i32, %c0_i32_0 : i32, i32
  }
  func.func @transform_8(%arg0: i32) -> (i32, i32, i32) {
    %c0_i32 = arith.constant 0 : i32
    %c0_i32_0 = arith.constant 0 : i32
    %c0_i32_1 = arith.constant 0 : i32
    %c0_i32_2 = arith.constant 0 : i32
    return %c0_i32, %c0_i32_0, %c0_i32_1 : i32, i32, i32
  }
  func.func @transform_9(%arg0: i32) -> (i32, i32) {
    %c0_i32 = arith.constant 0 : i32
    %c0_i32_0 = arith.constant 0 : i32
    %c0_i32_1 = arith.constant 0 : i32
    return %c0_i32, %c0_i32_0 : i32, i32
  }
  func.func @transform_10(%arg0: i32) -> (i32, i32) {
    %c0_i32 = arith.constant 0 : i32
    %c0_i32_0 = arith.constant 0 : i32
    %c0_i32_1 = arith.constant 0 : i32
    return %c0_i32, %c0_i32_0 : i32, i32
  }
  func.func @transform_11(%arg0: i32) -> (i32, i32) {
    %c0_i32 = arith.constant 0 : i32
    %c0_i32_0 = arith.constant 0 : i32
    %c0_i32_1 = arith.constant 0 : i32
    return %c0_i32, %c0_i32_0 : i32, i32
  }
  func.func @transform_12(%arg0: i32) -> (i32, i32) {
    %c0_i32 = arith.constant 0 : i32
    %c0_i32_0 = arith.constant 0 : i32
    %c0_i32_1 = arith.constant 0 : i32
    return %c0_i32, %c0_i32_0 : i32, i32
  }
  func.func @transform_13(%arg0: i32) -> (i32, i32) {
    %c0_i32 = arith.constant 0 : i32
    %c0_i32_0 = arith.constant 0 : i32
    %c0_i32_1 = arith.constant 0 : i32
    return %c0_i32, %c0_i32_0 : i32, i32
  }
  func.func @transform_14(%arg0: i32) -> (i32, i32) {
    %c0_i32 = arith.constant 0 : i32
    %c0_i32_0 = arith.constant 0 : i32
    %c0_i32_1 = arith.constant 0 : i32
    return %c0_i32, %c0_i32_0 : i32, i32
  }
  func.func @transform_15(%arg0: i32) -> (i32, i32) {
    %c0_i32 = arith.constant 0 : i32
    %c0_i32_0 = arith.constant 0 : i32
    %c0_i32_1 = arith.constant 0 : i32
    return %c0_i32, %c0_i32_0 : i32, i32
  }
  func.func @transform_16(%arg0: i32) -> (i32, i32) {
    %c0_i32 = arith.constant 0 : i32
    %c0_i32_0 = arith.constant 0 : i32
    %c0_i32_1 = arith.constant 0 : i32
    return %c0_i32, %c0_i32_0 : i32, i32
  }
  func.func @transform_17(%arg0: i32) -> (i32, i32) {
    %c0_i32 = arith.constant 0 : i32
    %c0_i32_0 = arith.constant 0 : i32
    %c0_i32_1 = arith.constant 0 : i32
    return %c0_i32, %c0_i32_0 : i32, i32
  }
  func.func @transform_18(%arg0: i32) -> (i32, i32) {
    %c0_i32 = arith.constant 0 : i32
    %c0_i32_0 = arith.constant 0 : i32
    return %arg0, %c0_i32 : i32, i32
  }
}

</mosaic_0001>

<bundles_post_ra>
// kernel: actor_forward.1
= control target key start
LH: loop header
LB: loop body
LE: loop exit
PB: predicated region body
PF: predicated region fallthrough
CT: control target
= control target key end

     0   :  { %s8640_s26 = smov 0   ;;  %s10930_s0 = inlined_call_operand.vmem [shape: f32[8,8], index: 0, kind: input, shape index: {}]   ;;  %s10931_s1 = inlined_call_operand.vmem [shape: f32[8,441,4], index: 1, kind: input, shape index: {}]   ;;  %s10932_s2 = inlined_call_operand.vmem [shape: f32[4,4,64], index: 2, kind: input, shape index: {}]   ;;  %s10933_s3 = inlined_call_operand.vmem [shape: f32[1,64], index: 3, kind: input, shape index: {}]   ;;  %s10934_s4 = inlined_call_operand.vmem [shape: f32[100,397], index: 4, kind: input, shape index: {}]   ;;  %s10935_s5 = inlined_call_operand.vmem [shape: f32[9,64,64], index: 5, kind: input, shape index: {}]   ;;  %s10936_s6 = inlined_call_operand.vmem [shape: f32[1,64], index: 6, kind: input, shape index: {}]   ;;  %s10937_s7 = inlined_call_operand.vmem [shape: f32[16,67], index: 7, kind: input, shape index: {}]   ;;  %s10938_s8 = inlined_call_operand.vmem [shape: f32[9,64,32], index: 8, kind: input, shape index: {}]   ;;  %s10939_s9 = inlined_call_operand.vmem [shape: f32[1,32], index: 9, kind: input, shape index: {}]   ;;  %s10940_s10 = inlined_call_operand.<no memory space> [shape: f32[1,1], index: 10, kind: input, shape index: {}]   ;;  %s10941_s11 = inlined_call_operand.vmem [shape: f32[8,32], index: 11, kind: input, shape index: {}]   ;;  %s10942_s12 = inlined_call_operand.vmem [shape: f32[32,32], index: 12, kind: input, shape index: {}]   ;;  %s10943_s13 = inlined_call_operand.vmem [shape: f32[1,32], index: 13, kind: input, shape index: {}]   ;;  %s10944_s14 = inlined_call_operand.vmem [shape: f32[32,32], index: 14, kind: input, shape index: {}]   ;;  %s10945_s15 = inlined_call_operand.vmem [shape: f32[1,32], index: 15, kind: input, shape index: {}]   ;;  %s10946_s16 = inlined_call_operand.vmem [shape: f32[32,640], index: 16, kind: input, shape index: {}]   ;;  %s10947_s17 = inlined_call_operand.vmem [shape: f32[1,640], index: 17, kind: input, shape index: {}]   ;;  %s10948_s18 = inlined_call_operand.vmem [shape: f32[8,640], index: 18, kind: output, shape index: {}]  }
   0x1   :  { %10952 = sst [smem:[#allocation16_spill]] %s10930_s0 }
   0x2   :  { %10953 = sst [smem:[#allocation17_spill]] %s10931_s1 }
   0x3   :  { %10954 = sst [smem:[#allocation18_spill]] %s10932_s2 }
   0x4 LB: > { %s10955_s29 = sld [smem:[#allocation18_spill]]  ;;  %vm451_vm0 = vcmask 1043456   ;;  %v10950_v1 = vmov 0.0   ;;  %vm8542_vm1 = vmmov 0   ;;  %s67_s19 = smul.u32 448, %s8539_s26  ;;  %vm125_vm2 = vcmask 31744   ;;  %s8539_s26 = sphi %s8640_s26, %s66_s26  }
   0x5   : > { %7346 = vmatprep.subr.mxu0 %v10950_v1  ;;  %7348 = vmatprep.mubr.msk.f32.mxu0 %vm8542_vm1, %v10950_v1  ;;  %s10956_s21 = sld [smem:[#allocation17_spill]]  ;;  %vm181_vm3 = vcmask 24576   ;;  %vm2477_vm4 = vcmask 523264   ;;  %vm2941_vm5 = vcmask 105472   ;;  %vm2530_vm6 = vcmask 518144   ;;  %s5739_s2 = scalar_lea.vmem [#allocation6], %s8539_s26 }
   0x6   : > { %8499 = vmatprep.subr.mxu1 %v10950_v1  ;;  %7512 = vmatprep.mubr.msk.f32.mxu1 %vm8542_vm1, %v10950_v1  ;;  %vm2981_vm7 = vcmask 1044480   ;;  %vm3257_vm8 = vcmask 519168   ;;  %vm4887_vm9 = vcmask 547840   ;;  %vm4813_vm10 = vcmask 521216   ;;  %s66_s26 = sadd.s32 1, %s8539_s26  }
   0x7   : > { %vm4894_vm11 = vcmask 1042432   ;;  %vm5728_vm12 = vcmask 259072   ;;  %vm5740_vm13 = vcmask 253952   ;;  %p63_p0 = scmp.ge.s32.totalorder %s66_s26, 8  }
   0x8   :  { %s10982_s0 = sld [smem:[#allocation16_spill]] (%p63_p0)  ;;  %vm5823_vm14 = vcmask (%p63_p0), 64512   ;;  %vm8544_vm15 = vmmov (%p63_p0), 0  }
   0xa   : > { %v6315_v0 = vld [vmem:[%s10955_s29 + $0x4] sm:$0xf]  ;;  %v8654_v2 = vld [vmem:[%s10955_s29] sm:$0xf] }
   0xb   : > { %7347 = vmatpush3.msk.msra.mxu0 %vm451_vm0, %v6315_v0  ;;  %8500 = vmatpush3.msk.msra.mxu1 %vm451_vm0, %v8654_v2  ;;  %s8666_s22 = scalar_lea.vmem %s10956_s21, %s67_s19 }
   0xc   : > { %7507 = vmatprep.subr.mxu0 %v10950_v1  ;;  %7829 = vmatprep.subr.mxu1 %v10950_v1  ;;  %v69_v3 = vld [vmem:[%s8666_s22] sm:$0xff]  ;;  %v70_v4 = vld [vmem:[%s8666_s22 + $0x8] sm:$0xff]  ;;  %v71_v5 = vld [vmem:[%s8666_s22 + $0x10] sm:$0xff] }
   0xd   : > { %126 = vst.msk [vmem:[#allocation2] sm:$0xff] %vm125_vm2, %v69_v3  ;;  %127 = vst.msk [vmem:[#allocation2 + $0x8] sm:$0xff] %vm125_vm2, %v70_v4  ;;  %v72_v6 = vld [vmem:[%s8666_s22 + $0x18] sm:$0xff]  ;;  %v73_v7 = vld [vmem:[%s8666_s22 + $0x20] sm:$0xff] }
   0xe   : > { %128 = vst.msk [vmem:[#allocation2 + $0x10] sm:$0xff] %vm125_vm2, %v71_v5  ;;  %v74_v8 = vld [vmem:[%s8666_s22 + $0x28] sm:$0xff]  ;;  %129 = vst.msk [vmem:[#allocation2 + $0x18] sm:$0xff] %vm125_vm2, %v72_v6  ;;  %v75_v9 = vld [vmem:[%s8666_s22 + $0x30] sm:$0xff] }
   0xf   : > { %130 = vst.msk [vmem:[#allocation2 + $0x20] sm:$0xff] %vm125_vm2, %v73_v7  ;;  %131 = vst.msk [vmem:[#allocation2 + $0x28] sm:$0xff] %vm125_vm2, %v74_v8  ;;  %v76_v10 = vld [vmem:[%s8666_s22 + $0x38] sm:$0xff]  ;;  %v77_v11 = vld [vmem:[%s8666_s22 + $0x40] sm:$0xff] }
  0x10   : > { %132 = vst.msk [vmem:[#allocation2 + $0x30] sm:$0xff] %vm125_vm2, %v75_v9  ;;  %133 = vst.msk [vmem:[#allocation2 + $0x38] sm:$0xff] %vm125_vm2, %v76_v10  ;;  %v78_v12 = vld [vmem:[%s8666_s22 + $0x48] sm:$0xff]  ;;  %v79_v13 = vld [vmem:[%s8666_s22 + $0x50] sm:$0xff] }
  0x11   : > { %134 = vst.msk [vmem:[#allocation2 + $0x40] sm:$0xff] %vm125_vm2, %v77_v11  ;;  %v80_v14 = vld [vmem:[%s8666_s22 + $0x58] sm:$0xff]  ;;  %135 = vst.msk [vmem:[#allocation2 + $0x48] sm:$0xff] %vm125_vm2, %v78_v12  ;;  %v81_v15 = vld [vmem:[%s8666_s22 + $0x60] sm:$0xff] }
  0x12   : > { %136 = vst.msk [vmem:[#allocation2 + $0x50] sm:$0xff] %vm125_vm2, %v79_v13  ;;  %137 = vst.msk [vmem:[#allocation2 + $0x58] sm:$0xff] %vm125_vm2, %v80_v14  ;;  %v82_v16 = vld [vmem:[%s8666_s22 + $0x68] sm:$0xff]  ;;  %v83_v17 = vld [vmem:[%s8666_s22 + $0x70] sm:$0xff] }
  0x13   : > { %138 = vst.msk [vmem:[#allocation2 + $0x60] sm:$0xff] %vm125_vm2, %v81_v15  ;;  %139 = vst.msk [vmem:[#allocation2 + $0x68] sm:$0xff] %vm125_vm2, %v82_v16  ;;  %v84_v18 = vld [vmem:[%s8666_s22 + $0x78] sm:$0xff]  ;;  %v85_v19 = vld [vmem:[%s8666_s22 + $0x80] sm:$0xff] }
  0x14   : > { %140 = vst.msk [vmem:[#allocation2 + $0x70] sm:$0xff] %vm125_vm2, %v83_v17  ;;  %v86_v20 = vld [vmem:[%s8666_s22 + $0x88] sm:$0xff]  ;;  %141 = vst.msk [vmem:[#allocation2 + $0x78] sm:$0xff] %vm125_vm2, %v84_v18  ;;  %v87_v21 = vld [vmem:[%s8666_s22 + $0x90] sm:$0xff] }
  0x15   : > { %142 = vst.msk [vmem:[#allocation2 + $0x80] sm:$0xff] %vm125_vm2, %v85_v19  ;;  %143 = vst.msk [vmem:[#allocation2 + $0x88] sm:$0xff] %vm125_vm2, %v86_v20  ;;  %v88_v22 = vld [vmem:[%s8666_s22 + $0x98] sm:$0xff]  ;;  %v89_v23 = vld [vmem:[%s8666_s22 + $0xa0] sm:$0xff] }
  0x16   : > { %144 = vst.msk [vmem:[#allocation2 + $0x90] sm:$0xff] %vm125_vm2, %v87_v21  ;;  %145 = vst.msk [vmem:[#allocation2 + $0x98] sm:$0xff] %vm125_vm2, %v88_v22  ;;  %v90_v24 = vld [vmem:[%s8666_s22 + $0xa8] sm:$0xff]  ;;  %v91_v25 = vld [vmem:[%s8666_s22 + $0xb0] sm:$0xff] }
  0x17   : > { %146 = vst.msk [vmem:[#allocation2 + $0xa0] sm:$0xff] %vm125_vm2, %v89_v23  ;;  %v92_v26 = vld [vmem:[%s8666_s22 + $0xb8] sm:$0xff]  ;;  %v237_v27 = vld [vmem:[#allocation2 + $0x1] sm:$0xff]  ;;  %147 = vst.msk [vmem:[#allocation2 + $0xa8] sm:$0xff] %vm125_vm2, %v90_v24 }
  0x18   : > { %v184_v28 = vld [vmem:[#allocation2 + $0x8] sm:$0xff]  ;;  %148 = vst.msk [vmem:[#allocation2 + $0xb0] sm:$0xff] %vm125_vm2, %v91_v25  ;;  %149 = vst.msk [vmem:[#allocation2 + $0xb8] sm:$0xff] %vm125_vm2, %v92_v26  ;;  %7349 = vmatmul.mubr.msk.f32.vlgmr.msra.gmra.mxu0 %vm125_vm2, %v237_v27  ;;  %v185_v30 = vld [vmem:[#allocation2 + $0x10] sm:$0xff] }
  0x19   : > { %7513 = vmatmul.mubr.msk.f32.vlgmr.msra.gmra.mxu1 %vm125_vm2, %v184_v28  ;;  %7351 = vmatprep.mubr.msk.f32.mxu0 %vm8542_vm1, %v10950_v1  ;;  %v238_v29 = vld [vmem:[#allocation2 + $0x9] sm:$0xff]  ;;  %v239_v31 = vld [vmem:[#allocation2 + $0x11] sm:$0xff]  ;;  %v240_v33 = vld [vmem:[#allocation2 + $0x19] sm:$0xff] }
  0x1a   : > { %7515 = vmatprep.mubr.msk.f32.mxu1 %vm8542_vm1, %v10950_v1  ;;  %7508 = vmatpush3.msk.msra.mxu0 %vm451_vm0, %v8654_v2  ;;  %v186_v32 = vld [vmem:[#allocation2 + $0x18] sm:$0xff]  ;;  %v187_v34 = vld [vmem:[#allocation2 + $0x20] sm:$0xff]  ;;  %v188_v36 = vld [vmem:[#allocation2 + $0x28] sm:$0xff] }
  0x1b   : > { %7668 = vmatprep.subr.mxu0 %v10950_v1  ;;  %v241_v35 = vld [vmem:[#allocation2 + $0x21] sm:$0xff]  ;;  %v242_v39 = vld [vmem:[#allocation2 + $0x29] sm:$0xff]  ;;  %v96_v42 = vld [vmem:[%s8666_s22 + $0xd8] sm:$0xff] }
  0x1c   : > { %7352 = vmatmul.mubr.msk.f32.gmra.mxu0 %vm125_vm2, %v238_v29  ;;  %v93_v37 = vld [vmem:[%s8666_s22 + $0xc0] sm:$0xff]  ;;  %v94_v38 = vld [vmem:[%s8666_s22 + $0xc8] sm:$0xff]  ;;  %v189_v40 = vld [vmem:[#allocation2 + $0x30] sm:$0xff]  ;;  %153 = vst.msk [vmem:[#allocation2 + $0xd8] sm:$0xff] %vm125_vm2, %v96_v42 }
  0x1d   : > { %7516 = vmatmul.mubr.msk.f32.gmra.mxu1 %vm125_vm2, %v185_v30  ;;  %7354 = vmatprep.mubr.msk.f32.mxu0 %vm8542_vm1, %v10950_v1  ;;  %150 = vst.msk [vmem:[#allocation2 + $0xc0] sm:$0xff] %vm125_vm2, %v93_v37  ;;  %151 = vst.msk [vmem:[#allocation2 + $0xc8] sm:$0xff] %vm125_vm2, %v94_v38  ;;  %v95_v41 = vld [vmem:[%s8666_s22 + $0xd0] sm:$0xff]  ;;  %v97_v43 = vld [vmem:[%s8666_s22 + $0xe0] sm:$0xff] }
  0x1e   : > { %7518 = vmatprep.mubr.msk.f32.mxu1 %vm8542_vm1, %v10950_v1  ;;  %152 = vst.msk [vmem:[#allocation2 + $0xd0] sm:$0xff] %vm125_vm2, %v95_v41  ;;  %154 = vst.msk [vmem:[#allocation2 + $0xe0] sm:$0xff] %vm125_vm2, %v97_v43  ;;  %v98_v44 = vld [vmem:[%s8666_s22 + $0xe8] sm:$0xff]  ;;  %v99_v45 = vld [vmem:[%s8666_s22 + $0xf0] sm:$0xff] }
  0x1f   : > { %v100_v46 = vld [vmem:[%s8666_s22 + $0xf8] sm:$0xff]  ;;  %155 = vst.msk [vmem:[#allocation2 + $0xe8] sm:$0xff] %vm125_vm2, %v98_v44  ;;  %156 = vst.msk [vmem:[#allocation2 + $0xf0] sm:$0xff] %vm125_vm2, %v99_v45  ;;  %v101_v47 = vld [vmem:[%s8666_s22 + $0x100] sm:$0xff] }
  0x20   : > { %7355 = vmatmul.mubr.msk.f32.gmra.mxu0 %vm125_vm2, %v239_v31  ;;  %157 = vst.msk [vmem:[#allocation2 + $0xf8] sm:$0xff] %vm125_vm2, %v100_v46  ;;  %v102_v48 = vld [vmem:[%s8666_s22 + $0x108] sm:$0xff]  ;;  %v103_v49 = vld [vmem:[%s8666_s22 + $0x110] sm:$0xff]  ;;  %158 = vst.msk [vmem:[#allocation2 + $0x100] sm:$0xff] %vm125_vm2, %v101_v47 }
  0x21   : > { %7519 = vmatmul.mubr.msk.f32.gmra.mxu1 %vm125_vm2, %v186_v32  ;;  %7357 = vmatprep.mubr.msk.f32.mxu0 %vm8542_vm1, %v10950_v1  ;;  %159 = vst.msk [vmem:[#allocation2 + $0x108] sm:$0xff] %vm125_vm2, %v102_v48  ;;  %160 = vst.msk [vmem:[#allocation2 + $0x110] sm:$0xff] %vm125_vm2, %v103_v49  ;;  %v104_v50 = vld [vmem:[%s8666_s22 + $0x118] sm:$0xff]  ;;  %v105_v51 = vld [vmem:[%s8666_s22 + $0x120] sm:$0xff] }
  0x22   : > { %7521 = vmatprep.mubr.msk.f32.mxu1 %vm8542_vm1, %v10950_v1  ;;  %v106_v52 = vld [vmem:[%s8666_s22 + $0x128] sm:$0xff]  ;;  %161 = vst.msk [vmem:[#allocation2 + $0x118] sm:$0xff] %vm125_vm2, %v104_v50  ;;  %162 = vst.msk [vmem:[#allocation2 + $0x120] sm:$0xff] %vm125_vm2, %v105_v51  ;;  %v107_v53 = vld [vmem:[%s8666_s22 + $0x130] sm:$0xff] }
  0x23   : > { %163 = vst.msk [vmem:[#allocation2 + $0x128] sm:$0xff] %vm125_vm2, %v106_v52  ;;  %v108_v54 = vld [vmem:[%s8666_s22 + $0x138] sm:$0xff]  ;;  %v109_v55 = vld [vmem:[%s8666_s22 + $0x140] sm:$0xff]  ;;  %164 = vst.msk [vmem:[#allocation2 + $0x130] sm:$0xff] %vm125_vm2, %v107_v53 }
  0x24   : > { %7358 = vmatmul.mubr.msk.f32.gmra.mxu0 %vm125_vm2, %v240_v33  ;;  %165 = vst.msk [vmem:[#allocation2 + $0x138] sm:$0xff] %vm125_vm2, %v108_v54  ;;  %166 = vst.msk [vmem:[#allocation2 + $0x140] sm:$0xff] %vm125_vm2, %v109_v55  ;;  %v243_v56 = vld [vmem:[#allocation2 + $0x31] sm:$0xff]  ;;  %v244_v58 = vld [vmem:[#allocation2 + $0x39] sm:$0xff] }
  0x25   : > { %7522 = vmatmul.mubr.msk.f32.gmra.mxu1 %vm125_vm2, %v187_v34  ;;  %7360 = vmatprep.mubr.msk.f32.mxu0 %vm8542_vm1, %v10950_v1  ;;  %v190_v57 = vld [vmem:[#allocation2 + $0x38] sm:$0xff]  ;;  %v191_v59 = vld [vmem:[#allocation2 + $0x40] sm:$0xff]  ;;  %v192_v61 = vld [vmem:[#allocation2 + $0x48] sm:$0xff] }
  0x26   : > { %7524 = vmatprep.mubr.msk.f32.mxu1 %vm8542_vm1, %v10950_v1  ;;  %v245_v60 = vld [vmem:[#allocation2 + $0x41] sm:$0xff]  ;;  %v246_v62 = vld [vmem:[#allocation2 + $0x49] sm:$0xff]  ;;  %v112_v3 = vld [vmem:[%s8666_s22 + $0x158] sm:$0xff] }
  0x27   : > { %v193_v63 = vld [vmem:[#allocation2 + $0x50] sm:$0xff]  ;;  %v110_v0 = vld [vmem:[%s8666_s22 + $0x148] sm:$0xff]  ;;  %169 = vst.msk [vmem:[#allocation2 + $0x158] sm:$0xff] %vm125_vm2, %v112_v3  ;;  %v113_v4 = vld [vmem:[%s8666_s22 + $0x160] sm:$0xff] }
  0x28   : > { %7361 = vmatmul.mubr.msk.f32.gmra.mxu0 %vm125_vm2, %v241_v35  ;;  %v111_v2 = vld [vmem:[%s8666_s22 + $0x150] sm:$0xff]  ;;  %167 = vst.msk [vmem:[#allocation2 + $0x148] sm:$0xff] %vm125_vm2, %v110_v0  ;;  %170 = vst.msk [vmem:[#allocation2 + $0x160] sm:$0xff] %vm125_vm2, %v113_v4  ;;  %v194_v6 = vld [vmem:[#allocation2 + $0x58] sm:$0xff] }
  0x29   : > { %7525 = vmatmul.mubr.msk.f32.gmra.mxu1 %vm125_vm2, %v188_v36  ;;  %7363 = vmatprep.mubr.msk.f32.mxu0 %vm8542_vm1, %v10950_v1  ;;  %168 = vst.msk [vmem:[#allocation2 + $0x150] sm:$0xff] %vm125_vm2, %v111_v2  ;;  %v247_v5 = vld [vmem:[#allocation2 + $0x51] sm:$0xff]  ;;  %v114_v7 = vld [vmem:[%s8666_s22 + $0x168] sm:$0xff]  ;;  %v248_v8 = vld [vmem:[#allocation2 + $0x59] sm:$0xff] }
  0x2a   : > { %7527 = vmatprep.mubr.msk.f32.mxu1 %vm8542_vm1, %v10950_v1  ;;  %171 = vst.msk [vmem:[#allocation2 + $0x168] sm:$0xff] %vm125_vm2, %v114_v7  ;;  %v195_v9 = vld [vmem:[#allocation2 + $0x60] sm:$0xff]  ;;  %v115_v10 = vld [vmem:[%s8666_s22 + $0x170] sm:$0xff]  ;;  %v196_v12 = vld [vmem:[#allocation2 + $0x68] sm:$0xff] }
  0x2b   : > { %172 = vst.msk [vmem:[#allocation2 + $0x170] sm:$0xff] %vm125_vm2, %v115_v10  ;;  %v249_v11 = vld [vmem:[#allocation2 + $0x61] sm:$0xff]  ;;  %v116_v13 = vld [vmem:[%s8666_s22 + $0x178] sm:$0xff]  ;;  %v250_v14 = vld [vmem:[#allocation2 + $0x69] sm:$0xff] }
  0x2c   : > { %7364 = vmatmul.mubr.msk.f32.gmra.mxu0 %vm125_vm2, %v242_v39  ;;  %173 = vst.msk [vmem:[#allocation2 + $0x178] sm:$0xff] %vm125_vm2, %v116_v13  ;;  %v197_v15 = vld [vmem:[#allocation2 + $0x70] sm:$0xff]  ;;  %v117_v16 = vld [vmem:[%s8666_s22 + $0x180] sm:$0xff]  ;;  %v198_v18 = vld [vmem:[#allocation2 + $0x78] sm:$0xff] }
  0x2d   : > { %7528 = vmatmul.mubr.msk.f32.gmra.mxu1 %vm125_vm2, %v189_v40  ;;  %7366 = vmatprep.mubr.msk.f32.mxu0 %vm8542_vm1, %v10950_v1  ;;  %174 = vst.msk [vmem:[#allocation2 + $0x180] sm:$0xff] %vm125_vm2, %v117_v16  ;;  %v251_v17 = vld [vmem:[#allocation2 + $0x71] sm:$0xff]  ;;  %v118_v19 = vld [vmem:[%s8666_s22 + $0x188] sm:$0xff]  ;;  %v252_v20 = vld [vmem:[#allocation2 + $0x79] sm:$0xff] }
  0x2e   : > { %7530 = vmatprep.mubr.msk.f32.mxu1 %vm8542_vm1, %v10950_v1  ;;  %175 = vst.msk [vmem:[#allocation2 + $0x188] sm:$0xff] %vm125_vm2, %v118_v19  ;;  %v199_v21 = vld [vmem:[#allocation2 + $0x80] sm:$0xff]  ;;  %v6479_v22 = vld [vmem:[%s10955_s29 + $0xc] sm:$0xf]  ;;  %v119_v23 = vld [vmem:[%s8666_s22 + $0x190] sm:$0xff] }
  0x2f   : > { %7830 = vmatpush3.msk.msra.mxu1 %vm451_vm0, %v6479_v22  ;;  %176 = vst.msk [vmem:[#allocation2 + $0x190] sm:$0xff] %vm125_vm2, %v119_v23  ;;  %v253_v24 = vld [vmem:[#allocation2 + $0x81] sm:$0xff]  ;;  %v120_v26 = vld [vmem:[%s8666_s22 + $0x198] sm:$0xff]  ;;  %v254_v27 = vld [vmem:[#allocation2 + $0x89] sm:$0xff] }
  0x30   : > { %7367 = vmatmul.mubr.msk.f32.gmra.mxu0 %vm125_vm2, %v243_v56  ;;  %3115 = vmatprep.subr.mxu1 %v10950_v1  ;;  %v200_v25 = vld [vmem:[#allocation2 + $0x88] sm:$0xff]  ;;  %177 = vst.msk [vmem:[#allocation2 + $0x198] sm:$0xff] %vm125_vm2, %v120_v26  ;;  %v201_v28 = vld [vmem:[#allocation2 + $0x90] sm:$0xff]  ;;  %v121_v29 = vld [vmem:[%s8666_s22 + $0x1a0] sm:$0xff] }
  0x31   : > { %7531 = vmatmul.mubr.msk.f32.gmra.mxu1 %vm125_vm2, %v190_v57  ;;  %7369 = vmatprep.mubr.msk.f32.mxu0 %vm8542_vm1, %v10950_v1  ;;  %178 = vst.msk [vmem:[#allocation2 + $0x1a0] sm:$0xff] %vm125_vm2, %v121_v29  ;;  %v255_v30 = vld [vmem:[#allocation2 + $0x91] sm:$0xff]  ;;  %v256_v32 = vld [vmem:[#allocation2 + $0x99] sm:$0xff]  ;;  %v257_v34 = vld [vmem:[#allocation2 + $0xa1] sm:$0xff] }
  0x32   : > { %7533 = vmatprep.mubr.msk.f32.mxu1 %vm8542_vm1, %v10950_v1  ;;  %v202_v31 = vld [vmem:[#allocation2 + $0x98] sm:$0xff]  ;;  %v203_v33 = vld [vmem:[#allocation2 + $0xa0] sm:$0xff]  ;;  %v204_v35 = vld [vmem:[#allocation2 + $0xa8] sm:$0xff] }
  0x33   : > { %v258_v36 = vld [vmem:[#allocation2 + $0xa9] sm:$0xff]  ;;  %v259_v38 = vld [vmem:[#allocation2 + $0xb1] sm:$0xff]  ;;  %v260_v40 = vld [vmem:[#allocation2 + $0xb9] sm:$0xff] }
  0x34   : > { %7370 = vmatmul.mubr.msk.f32.gmra.mxu0 %vm125_vm2, %v244_v58  ;;  %v205_v37 = vld [vmem:[#allocation2 + $0xb0] sm:$0xff]  ;;  %v206_v39 = vld [vmem:[#allocation2 + $0xb8] sm:$0xff]  ;;  %v207_v41 = vld [vmem:[#allocation2 + $0xc0] sm:$0xff] }
  0x35   : > { %7534 = vmatmul.mubr.msk.f32.gmra.mxu1 %vm125_vm2, %v191_v59  ;;  %7372 = vmatprep.mubr.msk.f32.mxu0 %vm8542_vm1, %v10950_v1  ;;  %v261_v42 = vld [vmem:[#allocation2 + $0xc1] sm:$0xff]  ;;  %v262_v44 = vld [vmem:[#allocation2 + $0xc9] sm:$0xff]  ;;  %v263_v46 = vld [vmem:[#allocation2 + $0xd1] sm:$0xff] }
  0x36   : > { %7536 = vmatprep.mubr.msk.f32.mxu1 %vm8542_vm1, %v10950_v1  ;;  %v208_v43 = vld [vmem:[#allocation2 + $0xc8] sm:$0xff]  ;;  %v209_v45 = vld [vmem:[#allocation2 + $0xd0] sm:$0xff]  ;;  %v210_v47 = vld [vmem:[#allocation2 + $0xd8] sm:$0xff] }
  0x37   : > { %v264_v48 = vld [vmem:[#allocation2 + $0xd9] sm:$0xff]  ;;  %v265_v50 = vld [vmem:[#allocation2 + $0xe1] sm:$0xff]  ;;  %v266_v52 = vld [vmem:[#allocation2 + $0xe9] sm:$0xff] }
  0x38   : > { %7373 = vmatmul.mubr.msk.f32.gmra.mxu0 %vm125_vm2, %v245_v60  ;;  %v211_v49 = vld [vmem:[#allocation2 + $0xe0] sm:$0xff]  ;;  %v212_v51 = vld [vmem:[#allocation2 + $0xe8] sm:$0xff]  ;;  %v213_v53 = vld [vmem:[#allocation2 + $0xf0] sm:$0xff] }
  0x39   : > { %7537 = vmatmul.mubr.msk.f32.gmra.mxu1 %vm125_vm2, %v192_v61  ;;  %7375 = vmatprep.mubr.msk.f32.mxu0 %vm8542_vm1, %v10950_v1  ;;  %v267_v54 = vld [vmem:[#allocation2 + $0xf1] sm:$0xff]  ;;  %v268_v56 = vld [vmem:[#allocation2 + $0xf9] sm:$0xff]  ;;  %v269_v58 = vld [vmem:[#allocation2 + $0x101] sm:$0xff] }
  0x3a   : > { %7539 = vmatprep.mubr.msk.f32.mxu1 %vm8542_vm1, %v10950_v1  ;;  %v214_v55 = vld [vmem:[#allocation2 + $0xf8] sm:$0xff]  ;;  %v215_v57 = vld [vmem:[#allocation2 + $0x100] sm:$0xff]  ;;  %v216_v59 = vld [vmem:[#allocation2 + $0x108] sm:$0xff] }
  0x3b   : > { %v270_v60 = vld [vmem:[#allocation2 + $0x109] sm:$0xff]  ;;  %v272_v0 = vld [vmem:[#allocation2 + $0x119] sm:$0xff]  ;;  %v273_v3 = vld [vmem:[#allocation2 + $0x121] sm:$0xff] }
  0x3c   : > { %7376 = vmatmul.mubr.msk.f32.gmra.mxu0 %vm125_vm2, %v246_v62  ;;  %v217_v61 = vld [vmem:[#allocation2 + $0x110] sm:$0xff]  ;;  %v219_v2 = vld [vmem:[#allocation2 + $0x120] sm:$0xff]  ;;  %v220_v4 = vld [vmem:[#allocation2 + $0x128] sm:$0xff] }
  0x3d   : > { %7540 = vmatmul.mubr.msk.f32.gmra.mxu1 %vm125_vm2, %v193_v63  ;;  %7378 = vmatprep.mubr.msk.f32.mxu0 %vm8542_vm1, %v10950_v1  ;;  %v271_v62 = vld [vmem:[#allocation2 + $0x111] sm:$0xff]  ;;  %v223_v10 = vld [vmem:[#allocation2 + $0x140] sm:$0xff]  ;;  %v278_v13 = vld [vmem:[#allocation2 + $0x149] sm:$0xff] }
  0x3e   : > { %7542 = vmatprep.mubr.msk.f32.mxu1 %vm8542_vm1, %v10950_v1  ;;  %v218_v63 = vld [vmem:[#allocation2 + $0x118] sm:$0xff]  ;;  %v281_v19 = vld [vmem:[#allocation2 + $0x161] sm:$0xff]  ;;  %v229_v22 = vld [vmem:[#allocation2 + $0x170] sm:$0xff] }
  0x3f   : > { %v275_v7 = vld [vmem:[#allocation2 + $0x131] sm:$0xff]  ;;  %v231_v26 = vld [vmem:[#allocation2 + $0x180] sm:$0xff] }
  0x40   : > { %7379 = vmatmul.mubr.msk.f32.gmra.mxu0 %vm125_vm2, %v247_v5  ;;  %v274_v5 = vld [vmem:[#allocation2 + $0x129] sm:$0xff]  ;;  %v226_v16 = vld [vmem:[#allocation2 + $0x158] sm:$0xff] }
  0x41   : > { %7543 = vmatmul.mubr.msk.f32.gmra.mxu1 %vm125_vm2, %v194_v6  ;;  %7381 = vmatprep.mubr.msk.f32.mxu0 %vm8542_vm1, %v10950_v1  ;;  %v221_v6 = vld [vmem:[#allocation2 + $0x130] sm:$0xff] }
  0x42   : > { %7545 = vmatprep.mubr.msk.f32.mxu1 %vm8542_vm1, %v10950_v1  ;;  %v283_v23 = vld [vmem:[#allocation2 + $0x171] sm:$0xff] }
  0x44   : > { %7382 = vmatmul.mubr.msk.f32.gmra.mxu0 %vm125_vm2, %v248_v8  ;;  %v222_v8 = vld [vmem:[#allocation2 + $0x138] sm:$0xff] }
  0x45   : > { %7546 = vmatmul.mubr.msk.f32.gmra.mxu1 %vm125_vm2, %v195_v9  ;;  %7384 = vmatprep.mubr.msk.f32.mxu0 %vm8542_vm1, %v10950_v1  ;;  %v276_v9 = vld [vmem:[#allocation2 + $0x139] sm:$0xff] }
  0x46   : > { %7548 = vmatprep.mubr.msk.f32.mxu1 %vm8542_vm1, %v10950_v1 }
  0x48   : > { %7385 = vmatmul.mubr.msk.f32.gmra.mxu0 %vm125_vm2, %v249_v11  ;;  %v277_v11 = vld [vmem:[#allocation2 + $0x141] sm:$0xff] }
  0x49   : > { %7549 = vmatmul.mubr.msk.f32.gmra.mxu1 %vm125_vm2, %v196_v12  ;;  %7387 = vmatprep.mubr.msk.f32.mxu0 %vm8542_vm1, %v10950_v1  ;;  %v224_v12 = vld [vmem:[#allocation2 + $0x148] sm:$0xff] }
  0x4a   : > { %7551 = vmatprep.mubr.msk.f32.mxu1 %vm8542_vm1, %v10950_v1 }
  0x4c   : > { %7388 = vmatmul.mubr.msk.f32.gmra.mxu0 %vm125_vm2, %v250_v14  ;;  %v225_v14 = vld [vmem:[#allocation2 + $0x150] sm:$0xff] }
  0x4d   : > { %7552 = vmatmul.mubr.msk.f32.gmra.mxu1 %vm125_vm2, %v197_v15  ;;  %7390 = vmatprep.mubr.msk.f32.mxu0 %vm8542_vm1, %v10950_v1  ;;  %v279_v15 = vld [vmem:[#allocation2 + $0x151] sm:$0xff] }
  0x4e   : > { %7554 = vmatprep.mubr.msk.f32.mxu1 %vm8542_vm1, %v10950_v1 }
  0x50   : > { %7391 = vmatmul.mubr.msk.f32.gmra.mxu0 %vm125_vm2, %v251_v17  ;;  %v280_v17 = vld [vmem:[#allocation2 + $0x159] sm:$0xff] }
  0x51   : > { %7555 = vmatmul.mubr.msk.f32.gmra.mxu1 %vm125_vm2, %v198_v18  ;;  %7393 = vmatprep.mubr.msk.f32.mxu0 %vm8542_vm1, %v10950_v1  ;;  %v227_v18 = vld [vmem:[#allocation2 + $0x160] sm:$0xff] }
  0x52   : > { %7557 = vmatprep.mubr.msk.f32.mxu1 %vm8542_vm1, %v10950_v1 }
  0x54   : > { %7394 = vmatmul.mubr.msk.f32.gmra.mxu0 %vm125_vm2, %v252_v20  ;;  %v228_v20 = vld [vmem:[#allocation2 + $0x168] sm:$0xff] }
  0x55   : > { %7558 = vmatmul.mubr.msk.f32.gmra.mxu1 %vm125_vm2, %v199_v21  ;;  %7396 = vmatprep.mubr.msk.f32.mxu0 %vm8542_vm1, %v10950_v1  ;;  %v282_v21 = vld [vmem:[#allocation2 + $0x169] sm:$0xff] }
  0x56   : > { %7560 = vmatprep.mubr.msk.f32.mxu1 %vm8542_vm1, %v10950_v1 }
  0x58   : > { %7397 = vmatmul.mubr.msk.f32.gmra.mxu0 %vm125_vm2, %v253_v24  ;;  %v230_v24 = vld [vmem:[#allocation2 + $0x178] sm:$0xff] }
  0x59   : > { %7561 = vmatmul.mubr.msk.f32.gmra.mxu1 %vm125_vm2, %v200_v25  ;;  %7399 = vmatprep.mubr.msk.f32.mxu0 %vm8542_vm1, %v10950_v1  ;;  %v284_v25 = vld [vmem:[#allocation2 + $0x179] sm:$0xff] }
  0x5a   : > { %7563 = vmatprep.mubr.msk.f32.mxu1 %vm8542_vm1, %v10950_v1 }
  0x5c   : > { %7400 = vmatmul.mubr.msk.f32.gmra.mxu0 %vm125_vm2, %v254_v27  ;;  %v285_v27 = vld [vmem:[#allocation2 + $0x181] sm:$0xff] }
  0x5d   : > { %7564 = vmatmul.mubr.msk.f32.gmra.mxu1 %vm125_vm2, %v201_v28  ;;  %7402 = vmatprep.mubr.msk.f32.mxu0 %vm8542_vm1, %v10950_v1  ;;  %v232_v28 = vld [vmem:[#allocation2 + $0x188] sm:$0xff] }
  0x5e   : > { %7566 = vmatprep.mubr.msk.f32.mxu1 %vm8542_vm1, %v10950_v1 }
  0x60   : > { %7403 = vmatmul.mubr.msk.f32.gmra.mxu0 %vm125_vm2, %v255_v30 }
  0x61   : > { %7567 = vmatmul.mubr.msk.f32.gmra.mxu1 %vm125_vm2, %v202_v31  ;;  %7405 = vmatprep.mubr.msk.f32.mxu0 %vm8542_vm1, %v10950_v1  ;;  %v286_v31 = vld [vmem:[#allocation2 + $0x189] sm:$0xff] }
  0x62   : > { %7569 = vmatprep.mubr.msk.f32.mxu1 %vm8542_vm1, %v10950_v1 }
  0x64   : > { %7406 = vmatmul.mubr.msk.f32.gmra.mxu0 %vm125_vm2, %v256_v32  ;;  %v233_v32 = vld [vmem:[#allocation2 + $0x190] sm:$0xff] }
  0x65   : > { %7570 = vmatmul.mubr.msk.f32.gmra.mxu1 %vm125_vm2, %v203_v33  ;;  %7408 = vmatprep.mubr.msk.f32.mxu0 %vm8542_vm1, %v10950_v1 }
  0x66   : > { %7572 = vmatprep.mubr.msk.f32.mxu1 %vm8542_vm1, %v10950_v1 }
  0x68   : > { %7409 = vmatmul.mubr.msk.f32.gmra.mxu0 %vm125_vm2, %v257_v34 }
  0x69   : > { %7573 = vmatmul.mubr.msk.f32.gmra.mxu1 %vm125_vm2, %v204_v35  ;;  %7411 = vmatprep.mubr.msk.f32.mxu0 %vm8542_vm1, %v10950_v1 }
  0x6a   : > { %7575 = vmatprep.mubr.msk.f32.mxu1 %vm8542_vm1, %v10950_v1 }
  0x6c   : > { %7412 = vmatmul.mubr.msk.f32.gmra.mxu0 %vm125_vm2, %v258_v36 }
  0x6d   : > { %7576 = vmatmul.mubr.msk.f32.gmra.mxu1 %vm125_vm2, %v205_v37  ;;  %7414 = vmatprep.mubr.msk.f32.mxu0 %vm8542_vm1, %v10950_v1 }
  0x6e   : > { %7578 = vmatprep.mubr.msk.f32.mxu1 %vm8542_vm1, %v10950_v1 }
  0x70   : > { %7415 = vmatmul.mubr.msk.f32.gmra.mxu0 %vm125_vm2, %v259_v38  ;;  %v287_v38 = vld [vmem:[#allocation2 + $0x191] sm:$0xff] }
  0x71   : > { %7579 = vmatmul.mubr.msk.f32.gmra.mxu1 %vm125_vm2, %v206_v39  ;;  %7417 = vmatprep.mubr.msk.f32.mxu0 %vm8542_vm1, %v10950_v1  ;;  %v234_v39 = vld [vmem:[#allocation2 + $0x198] sm:$0xff] }
  0x72   : > { %7581 = vmatprep.mubr.msk.f32.mxu1 %vm8542_vm1, %v10950_v1 }
  0x74   : > { %7418 = vmatmul.mubr.msk.f32.gmra.mxu0 %vm125_vm2, %v260_v40 }
  0x75   : > { %7582 = vmatmul.mubr.msk.f32.gmra.mxu1 %vm125_vm2, %v207_v41  ;;  %7420 = vmatprep.mubr.msk.f32.mxu0 %vm8542_vm1, %v10950_v1 }
  0x76   : > { %7584 = vmatprep.mubr.msk.f32.mxu1 %vm8542_vm1, %v10950_v1 }
  0x78   : > { %7421 = vmatmul.mubr.msk.f32.gmra.mxu0 %vm125_vm2, %v261_v42 }
  0x79   : > { %7585 = vmatmul.mubr.msk.f32.gmra.mxu1 %vm125_vm2, %v208_v43  ;;  %7423 = vmatprep.mubr.msk.f32.mxu0 %vm8542_vm1, %v10950_v1 }
  0x7a   : > { %7587 = vmatprep.mubr.msk.f32.mxu1 %vm8542_vm1, %v10950_v1 }
  0x7c   : > { %7424 = vmatmul.mubr.msk.f32.gmra.mxu0 %vm125_vm2, %v262_v44 }
  0x7d   : > { %7588 = vmatmul.mubr.msk.f32.gmra.mxu1 %vm125_vm2, %v209_v45  ;;  %7426 = vmatprep.mubr.msk.f32.mxu0 %vm8542_vm1, %v10950_v1  ;;  %v288_v45 = vld [vmem:[#allocation2 + $0x199] sm:$0xff] }
  0x7e   : > { %7590 = vmatprep.mubr.msk.f32.mxu1 %vm8542_vm1, %v10950_v1 }
  0x80   : > { %7427 = vmatmul.mubr.msk.f32.gmra.mxu0 %vm125_vm2, %v263_v46  ;;  %v235_v46 = vld [vmem:[#allocation2 + $0x1a0] sm:$0x7] }
  0x81   : > { %7591 = vmatmul.mubr.msk.f32.gmra.mxu1 %vm125_vm2, %v210_v47  ;;  %7429 = vmatprep.mubr.msk.f32.mxu0 %vm8542_vm1, %v10950_v1 }
  0x82   : > { %7593 = vmatprep.mubr.msk.f32.mxu1 %vm8542_vm1, %v10950_v1 }
  0x84   : > { %7430 = vmatmul.mubr.msk.f32.gmra.mxu0 %vm125_vm2, %v264_v48 }
  0x85   : > { %7594 = vmatmul.mubr.msk.f32.gmra.mxu1 %vm125_vm2, %v211_v49  ;;  %7432 = vmatprep.mubr.msk.f32.mxu0 %vm8542_vm1, %v10950_v1 }
  0x86   : > { %7596 = vmatprep.mubr.msk.f32.mxu1 %vm8542_vm1, %v10950_v1 }
  0x88   : > { %7433 = vmatmul.mubr.msk.f32.gmra.mxu0 %vm125_vm2, %v265_v50 }
  0x89   : > { %7597 = vmatmul.mubr.msk.f32.gmra.mxu1 %vm125_vm2, %v212_v51  ;;  %7435 = vmatprep.mubr.msk.f32.mxu0 %vm8542_vm1, %v10950_v1 }
  0x8a   : > { %7599 = vmatprep.mubr.msk.f32.mxu1 %vm8542_vm1, %v10950_v1 }
  0x8c   : > { %7436 = vmatmul.mubr.msk.f32.gmra.mxu0 %vm125_vm2, %v266_v52  ;;  %v289_v52 = vld [vmem:[#allocation2 + $0x1a1] sm:$0x7] }
  0x8d   : > { %7600 = vmatmul.mubr.msk.f32.gmra.mxu1 %vm125_vm2, %v213_v53  ;;  %7438 = vmatprep.mubr.msk.f32.mxu0 %vm8542_vm1, %v10950_v1  ;;  %v1877_v53 = vld [vmem:[#allocation2 + $0x16] sm:$0xff] }
  0x8e   : > { %7602 = vmatprep.mubr.msk.f32.mxu1 %vm8542_vm1, %v10950_v1 }
  0x90   : > { %7439 = vmatmul.mubr.msk.f32.gmra.mxu0 %vm125_vm2, %v267_v54 }
  0x91   : > { %7603 = vmatmul.mubr.msk.f32.gmra.mxu1 %vm125_vm2, %v214_v55  ;;  %7441 = vmatprep.mubr.msk.f32.mxu0 %vm8542_vm1, %v10950_v1 }
  0x92   : > { %7605 = vmatprep.mubr.msk.f32.mxu1 %vm8542_vm1, %v10950_v1 }
  0x94   : > { %7442 = vmatmul.mubr.msk.f32.gmra.mxu0 %vm125_vm2, %v268_v56 }
  0x95   : > { %7606 = vmatmul.mubr.msk.f32.gmra.mxu1 %vm125_vm2, %v215_v57  ;;  %7444 = vmatprep.mubr.msk.f32.mxu0 %vm8542_vm1, %v10950_v1 }
  0x96   : > { %7608 = vmatprep.mubr.msk.f32.mxu1 %vm8542_vm1, %v10950_v1 }
  0x98   : > { %7445 = vmatmul.mubr.msk.f32.gmra.mxu0 %vm125_vm2, %v269_v58 }
  0x99   : > { %7609 = vmatmul.mubr.msk.f32.gmra.mxu1 %vm125_vm2, %v216_v59  ;;  %7447 = vmatprep.mubr.msk.f32.mxu0 %vm8542_vm1, %v10950_v1  ;;  %v183_v59 = vld [vmem:[#allocation2] sm:$0xff] }
  0x9a   : > { %7611 = vmatprep.mubr.msk.f32.mxu1 %vm8542_vm1, %v10950_v1 }
  0x9c   : > { %7448 = vmatmul.mubr.msk.f32.gmra.mxu0 %vm125_vm2, %v270_v60  ;;  %v1878_v60 = vld [vmem:[#allocation2 + $0x1e] sm:$0xff] }
  0x9d   : > { %7612 = vmatmul.mubr.msk.f32.gmra.mxu1 %vm125_vm2, %v217_v61  ;;  %7450 = vmatprep.mubr.msk.f32.mxu0 %vm8542_vm1, %v10950_v1 }
  0x9e   : > { %7614 = vmatprep.mubr.msk.f32.mxu1 %vm8542_vm1, %v10950_v1 }
  0xa0   : > { %7451 = vmatmul.mubr.msk.f32.gmra.mxu0 %vm125_vm2, %v271_v62 }
  0xa1   : > { %7615 = vmatmul.mubr.msk.f32.gmra.mxu1 %vm125_vm2, %v218_v63  ;;  %7453 = vmatprep.mubr.msk.f32.mxu0 %vm8542_vm1, %v10950_v1  ;;  %v6424_v63 = vld [vmem:[%s10955_s29 + $0x8] sm:$0xf] }
  0xa2   : > { %7617 = vmatprep.mubr.msk.f32.mxu1 %vm8542_vm1, %v10950_v1 }
  0xa4   : > { %7454 = vmatmul.mubr.msk.f32.gmra.mxu0 %vm125_vm2, %v272_v0 }
  0xa5   : > { %7618 = vmatmul.mubr.msk.f32.gmra.mxu1 %vm125_vm2, %v219_v2  ;;  %7456 = vmatprep.mubr.msk.f32.mxu0 %vm8542_vm1, %v10950_v1 }
  0xa6   : > { %7620 = vmatprep.mubr.msk.f32.mxu1 %vm8542_vm1, %v10950_v1 }
  0xa8   : > { %7457 = vmatmul.mubr.msk.f32.gmra.mxu0 %vm125_vm2, %v273_v3 }
  0xa9   : > { %7621 = vmatmul.mubr.msk.f32.gmra.mxu1 %vm125_vm2, %v220_v4  ;;  %7459 = vmatprep.mubr.msk.f32.mxu0 %vm8542_vm1, %v10950_v1  ;;  %v1277_v4 = vld [vmem:[#allocation2 + $0x15] sm:$0xff] }
  0xaa   : > { %7623 = vmatprep.mubr.msk.f32.mxu1 %vm8542_vm1, %v10950_v1 }
  0xac   : > { %7460 = vmatmul.mubr.msk.f32.gmra.mxu0 %vm125_vm2, %v274_v5  ;;  %v1879_v5 = vld [vmem:[#allocation2 + $0x26] sm:$0xff] }
  0xad   : > { %7624 = vmatmul.mubr.msk.f32.gmra.mxu1 %vm125_vm2, %v221_v6  ;;  %7462 = vmatprep.mubr.msk.f32.mxu0 %vm8542_vm1, %v10950_v1 }
  0xae   : > { %7626 = vmatprep.mubr.msk.f32.mxu1 %vm8542_vm1, %v10950_v1 }
  0xb0   : > { %7463 = vmatmul.mubr.msk.f32.gmra.mxu0 %vm125_vm2, %v275_v7 }
  0xb1   : > { %7627 = vmatmul.mubr.msk.f32.gmra.mxu1 %vm125_vm2, %v222_v8  ;;  %7465 = vmatprep.mubr.msk.f32.mxu0 %vm8542_vm1, %v10950_v1 }
  0xb2   : > { %7629 = vmatprep.mubr.msk.f32.mxu1 %vm8542_vm1, %v10950_v1 }
  0xb4   : > { %7466 = vmatmul.mubr.msk.f32.gmra.mxu0 %vm125_vm2, %v276_v9 }
  0xb5   : > { %7630 = vmatmul.mubr.msk.f32.gmra.mxu1 %vm125_vm2, %v223_v10  ;;  %7468 = vmatprep.mubr.msk.f32.mxu0 %vm8542_vm1, %v10950_v1 }
  0xb6   : > { %7632 = vmatprep.mubr.msk.f32.mxu1 %vm8542_vm1, %v10950_v1 }
  0xb8   : > { %7469 = vmatmul.mubr.msk.f32.gmra.mxu0 %vm125_vm2, %v277_v11  ;;  %v1278_v11 = vld [vmem:[#allocation2 + $0x1d] sm:$0xff] }
  0xb9   : > { %7633 = vmatmul.mubr.msk.f32.gmra.mxu1 %vm125_vm2, %v224_v12  ;;  %7471 = vmatprep.mubr.msk.f32.mxu0 %vm8542_vm1, %v10950_v1  ;;  %v1880_v12 = vld [vmem:[#allocation2 + $0x2e] sm:$0xff] }
  0xba   : > { %7635 = vmatprep.mubr.msk.f32.mxu1 %vm8542_vm1, %v10950_v1 }
  0xbc   : > { %7472 = vmatmul.mubr.msk.f32.gmra.mxu0 %vm125_vm2, %v278_v13 }
  0xbd   : > { %7636 = vmatmul.mubr.msk.f32.gmra.mxu1 %vm125_vm2, %v225_v14  ;;  %7474 = vmatprep.mubr.msk.f32.mxu0 %vm8542_vm1, %v10950_v1 }
  0xbe   : > { %7638 = vmatprep.mubr.msk.f32.mxu1 %vm8542_vm1, %v10950_v1 }
  0xc0   : > { %7475 = vmatmul.mubr.msk.f32.gmra.mxu0 %vm125_vm2, %v279_v15 }
  0xc1   : > { %7639 = vmatmul.mubr.msk.f32.gmra.mxu1 %vm125_vm2, %v226_v16  ;;  %7477 = vmatprep.mubr.msk.f32.mxu0 %vm8542_vm1, %v10950_v1 }
  0xc2   : > { %7641 = vmatprep.mubr.msk.f32.mxu1 %vm8542_vm1, %v10950_v1 }
  0xc4   : > { %7478 = vmatmul.mubr.msk.f32.gmra.mxu0 %vm125_vm2, %v280_v17 }
  0xc5   : > { %7642 = vmatmul.mubr.msk.f32.gmra.mxu1 %vm125_vm2, %v227_v18  ;;  %7480 = vmatprep.mubr.msk.f32.mxu0 %vm8542_vm1, %v10950_v1  ;;  %v1279_v18 = vld [vmem:[#allocation2 + $0x25] sm:$0xff] }
  0xc6   : > { %7644 = vmatprep.mubr.msk.f32.mxu1 %vm8542_vm1, %v10950_v1 }
  0xc8   : > { %7481 = vmatmul.mubr.msk.f32.gmra.mxu0 %vm125_vm2, %v281_v19  ;;  %v1881_v19 = vld [vmem:[#allocation2 + $0x36] sm:$0xff] }
  0xc9   : > { %7645 = vmatmul.mubr.msk.f32.gmra.mxu1 %vm125_vm2, %v228_v20  ;;  %7483 = vmatprep.mubr.msk.f32.mxu0 %vm8542_vm1, %v10950_v1 }
  0xca   : > { %7647 = vmatprep.mubr.msk.f32.mxu1 %vm8542_vm1, %v10950_v1 }
  0xcc   : > { %7484 = vmatmul.mubr.msk.f32.gmra.mxu0 %vm125_vm2, %v282_v21 }
  0xcd   : > { %7648 = vmatmul.mubr.msk.f32.gmra.mxu1 %vm125_vm2, %v229_v22  ;;  %7486 = vmatprep.mubr.msk.f32.mxu0 %vm8542_vm1, %v10950_v1 }
  0xce   : > { %7650 = vmatprep.mubr.msk.f32.mxu1 %vm8542_vm1, %v10950_v1 }
  0xd0   : > { %7487 = vmatmul.mubr.msk.f32.gmra.mxu0 %vm125_vm2, %v283_v23 }
  0xd1   : > { %7651 = vmatmul.mubr.msk.f32.gmra.mxu1 %vm125_vm2, %v230_v24  ;;  %7489 = vmatprep.mubr.msk.f32.mxu0 %vm8542_vm1, %v10950_v1 }
  0xd2   : > { %7653 = vmatprep.mubr.msk.f32.mxu1 %vm8542_vm1, %v10950_v1 }
  0xd4   : > { %7490 = vmatmul.mubr.msk.f32.gmra.mxu0 %vm125_vm2, %v284_v25  ;;  %v1280_v25 = vld [vmem:[#allocation2 + $0x2d] sm:$0xff] }
  0xd5   : > { %7654 = vmatmul.mubr.msk.f32.gmra.mxu1 %vm125_vm2, %v231_v26  ;;  %7492 = vmatprep.mubr.msk.f32.mxu0 %vm8542_vm1, %v10950_v1  ;;  %v1882_v26 = vld [vmem:[#allocation2 + $0x3e] sm:$0xff] }
  0xd6   : > { %7656 = vmatprep.mubr.msk.f32.mxu1 %vm8542_vm1, %v10950_v1 }
  0xd8   : > { %v9072_v29 = vpop.f32.mrf.mxu0  ;;  %7493 = vmatmul.mubr.msk.f32.gmra.mxu0 %vm125_vm2, %v285_v27 }
  0xd9   : > { %v1018_v30 = vpop.f32.mrf.mxu1  ;;  %7657 = vmatmul.mubr.msk.f32.gmra.mxu1 %vm125_vm2, %v232_v28  ;;  %7495 = vmatprep.mubr.msk.f32.mxu0 %vm8542_vm1, %v10950_v1 }
  0xda   : > { %7659 = vmatprep.mubr.msk.f32.mxu1 %vm8542_vm1, %v10950_v1  ;;  %v7350_v33 = vpop.f32.mrf.mxu0 }
  0xdb   : > { %v7514_v34 = vpop.f32.mrf.mxu1  ;;  %v1281_v33 = vld [vmem:[#allocation2 + $0x35] sm:$0xff] }
  0xdc   : > { %v526_v35 = vpop.f32.mrf.mxu0  ;;  %7496 = vmatmul.mubr.msk.f32.gmra.mxu0 %vm125_vm2, %v286_v31  ;;  %v1883_v34 = vld [vmem:[#allocation2 + $0x46] sm:$0xff] }
  0xdd   : > { %v1023_v36 = vpop.f32.mrf.mxu1  ;;  %7660 = vmatmul.mubr.msk.f32.gmra.mxu1 %vm125_vm2, %v233_v32  ;;  %v9082_v37 = vadd.f32 %v1018_v30, %v526_v35  ;;  %7498 = vmatprep.mubr.msk.f32.mxu0 %vm8542_vm1, %v10950_v1 }
  0xde   : > { %7662 = vmatprep.mubr.msk.f32.mxu1 %vm8542_vm1, %v10950_v1  ;;  %v7353_v40 = vpop.f32.mrf.mxu0 }
  0xdf   : > { %v7517_v41 = vpop.f32.mrf.mxu1 }
  0xe0   : > { %v531_v42 = vpop.f32.mrf.mxu0  ;;  %7499 = vmatmul.mubr.msk.f32.gmra.mxu0 %vm125_vm2, %v287_v38  ;;  %v1282_v41 = vld [vmem:[#allocation2 + $0x3d] sm:$0xff] }
  0xe1   : > { %v1028_v43 = vpop.f32.mrf.mxu1  ;;  %7663 = vmatmul.mubr.msk.f32.gmra.mxu1 %vm125_vm2, %v234_v39  ;;  %v9090_v44 = vadd.f32 %v1023_v36, %v531_v42  ;;  %7501 = vmatprep.mubr.msk.f32.mxu0 %vm8542_vm1, %v10950_v1  ;;  %v1884_v42 = vld [vmem:[#allocation2 + $0x4e] sm:$0xff] }
  0xe2   : > { %7665 = vmatprep.mubr.msk.f32.mxu1 %vm8542_vm1, %v10950_v1  ;;  %v7356_v47 = vpop.f32.mrf.mxu0 }
  0xe3   : > { %v7520_v48 = vpop.f32.mrf.mxu1 }
  0xe4   : > { %v536_v49 = vpop.f32.mrf.mxu0  ;;  %7502 = vmatmul.mubr.msk.f32.gmra.mxu0 %vm125_vm2, %v288_v45 }
  0xe5   : > { %v1033_v50 = vpop.f32.mrf.mxu1  ;;  %7666 = vmatmul.mubr.msk.f32.gmra.mxu1 %vm125_vm2, %v235_v46  ;;  %v9098_v51 = vadd.f32 %v1028_v43, %v536_v49  ;;  %7504 = vmatprep.mubr.msk.f32.mxu0 %vm8542_vm1, %v10950_v1  ;;  %v1283_v49 = vld [vmem:[#allocation2 + $0x45] sm:$0xff] }
  0xe6   : > { %7831 = vmatprep.mubr.msk.f32.mxu1 %vm8542_vm1, %v10950_v1  ;;  %v7359_v54 = vpop.f32.mrf.mxu0 }
  0xe7   : > { %v7523_v55 = vpop.f32.mrf.mxu1 }
  0xe8   : > { %v541_v56 = vpop.f32.mrf.mxu0  ;;  %7505 = vmatmul.mubr.msk.f32.gmra.mxu0 %vm125_vm2, %v289_v52 }
  0xe9   : > { %v1038_v57 = vpop.f32.mrf.mxu1  ;;  %7832 = vmatmul.mubr.msk.f32.vlgmr.msra.gmra.mxu1 %vm125_vm2, %v1877_v53  ;;  %v9106_v58 = vadd.f32 %v1033_v50, %v541_v56  ;;  %7509 = vmatprep.mubr.msk.f32.mxu0 %vm8542_vm1, %v10950_v1  ;;  %v1885_v50 = vld [vmem:[#allocation2 + $0x56] sm:$0xff] }
  0xea   : > { %7834 = vmatprep.mubr.msk.f32.mxu1 %vm8542_vm1, %v10950_v1  ;;  %v7362_v61 = vpop.f32.mrf.mxu0 }
  0xeb   : > { %v7526_v62 = vpop.f32.mrf.mxu1 }
  0xec   : > { %v546_v0 = vpop.f32.mrf.mxu0  ;;  %7510 = vmatmul.mubr.msk.f32.vlgmr.msra.gmra.mxu0 %vm125_vm2, %v183_v59  ;;  %v1886_v59 = vld [vmem:[#allocation2 + $0x5e] sm:$0xff] }
  0xed   : > { %v1043_v2 = vpop.f32.mrf.mxu1  ;;  %7835 = vmatmul.mubr.msk.f32.gmra.mxu1 %vm125_vm2, %v1878_v60  ;;  %v9117_v3 = vadd.f32 %v1038_v57, %v546_v0  ;;  %7669 = vmatpush3.msk.msra.mxu0 %vm451_vm0, %v6424_v63  ;;  %v1284_v57 = vld [vmem:[#allocation2 + $0x4d] sm:$0xff]  ;;  %vm5749_vm0 = vcmask (%p63_p0), 261120  }
  0xee   : > { %7670 = vmatprep.mubr.msk.f32.mxu0 %vm8542_vm1, %v10950_v1  ;;  %v7365_v6 = vpop.f32.mrf.mxu0  ;;  %7837 = vmatprep.mubr.msk.f32.mxu1 %vm8542_vm1, %v10950_v1 }
  0xef   : > { %v7529_v7 = vpop.f32.mrf.mxu1 }
  0xf0   : > { %v551_v8 = vpop.f32.mrf.mxu0  ;;  %7671 = vmatmul.mubr.msk.f32.vlgmr.msra.gmra.mxu0 %vm125_vm2, %v1277_v4  ;;  %v1887_v4 = vld [vmem:[#allocation2 + $0x66] sm:$0xff] }
  0xf1   : > { %v1048_v9 = vpop.f32.mrf.mxu1  ;;  %7838 = vmatmul.mubr.msk.f32.gmra.mxu1 %vm125_vm2, %v1879_v5  ;;  %v9126_v10 = vadd.f32 %v1043_v2, %v551_v8  ;;  %7673 = vmatprep.mubr.msk.f32.mxu0 %vm8542_vm1, %v10950_v1  ;;  %v1285_v2 = vld [vmem:[#allocation2 + $0x55] sm:$0xff] }
  0xf2   : > { %7840 = vmatprep.mubr.msk.f32.mxu1 %vm8542_vm1, %v10950_v1  ;;  %v7368_v13 = vpop.f32.mrf.mxu0 }
  0xf3   : > { %v7532_v14 = vpop.f32.mrf.mxu1 }
  0xf4   : > { %v556_v15 = vpop.f32.mrf.mxu0  ;;  %7674 = vmatmul.mubr.msk.f32.gmra.mxu0 %vm125_vm2, %v1278_v11  ;;  %v1286_v11 = vld [vmem:[#allocation2 + $0x5d] sm:$0xff] }
  0xf5   : > { %v1053_v16 = vpop.f32.mrf.mxu1  ;;  %7841 = vmatmul.mubr.msk.f32.gmra.mxu1 %vm125_vm2, %v1880_v12  ;;  %v9134_v17 = vadd.f32 %v1048_v9, %v556_v15  ;;  %7676 = vmatprep.mubr.msk.f32.mxu0 %vm8542_vm1, %v10950_v1  ;;  %v1888_v12 = vld [vmem:[#allocation2 + $0x6e] sm:$0xff] }
  0xf6   : > { %7843 = vmatprep.mubr.msk.f32.mxu1 %vm8542_vm1, %v10950_v1  ;;  %v7371_v20 = vpop.f32.mrf.mxu0 }
  0xf7   : > { %v7535_v21 = vpop.f32.mrf.mxu1  ;;  %v1889_v20 = vld [vmem:[#allocation2 + $0x76] sm:$0xff] }
  0xf8   : > { %v561_v22 = vpop.f32.mrf.mxu0  ;;  %7677 = vmatmul.mubr.msk.f32.gmra.mxu0 %vm125_vm2, %v1279_v18 }
  0xf9   : > { %v1058_v23 = vpop.f32.mrf.mxu1  ;;  %7844 = vmatmul.mubr.msk.f32.gmra.mxu1 %vm125_vm2, %v1881_v19  ;;  %v9142_v24 = vadd.f32 %v1053_v16, %v561_v22  ;;  %7679 = vmatprep.mubr.msk.f32.mxu0 %vm8542_vm1, %v10950_v1  ;;  %v1287_v19 = vld [vmem:[#allocation2 + $0x65] sm:$0xff] }
  0xfa   : > { %7846 = vmatprep.mubr.msk.f32.mxu1 %vm8542_vm1, %v10950_v1  ;;  %v7374_v27 = vpop.f32.mrf.mxu0 }
  0xfb   : > { %v7538_v28 = vpop.f32.mrf.mxu1  ;;  %v1288_v27 = vld [vmem:[#allocation2 + $0x6d] sm:$0xff] }
  0xfc   : > { %v566_v30 = vpop.f32.mrf.mxu0  ;;  %7680 = vmatmul.mubr.msk.f32.gmra.mxu0 %vm125_vm2, %v1280_v25  ;;  %v1890_v28 = vld [vmem:[#allocation2 + $0x7e] sm:$0xff] }
  0xfd   : > { %v1063_v31 = vpop.f32.mrf.mxu1  ;;  %7847 = vmatmul.mubr.msk.f32.gmra.mxu1 %vm125_vm2, %v1882_v26  ;;  %v9150_v32 = vadd.f32 %v1058_v23, %v566_v30  ;;  %7682 = vmatprep.mubr.msk.f32.mxu0 %vm8542_vm1, %v10950_v1 }
  0xfe   : > { %7849 = vmatprep.mubr.msk.f32.mxu1 %vm8542_vm1, %v10950_v1  ;;  %v7377_v35 = vpop.f32.mrf.mxu0 }
  0xff   : > { %v7541_v36 = vpop.f32.mrf.mxu1 }
 0x100   : > { %v571_v38 = vpop.f32.mrf.mxu0  ;;  %7683 = vmatmul.mubr.msk.f32.gmra.mxu0 %vm125_vm2, %v1281_v33  ;;  %v1289_v36 = vld [vmem:[#allocation2 + $0x75] sm:$0xff] }
 0x101   : > { %v1068_v39 = vpop.f32.mrf.mxu1  ;;  %7850 = vmatmul.mubr.msk.f32.gmra.mxu1 %vm125_vm2, %v1883_v34  ;;  %v9158_v40 = vadd.f32 %v1063_v31, %v571_v38  ;;  %7685 = vmatprep.mubr.msk.f32.mxu0 %vm8542_vm1, %v10950_v1  ;;  %v1891_v38 = vld [vmem:[#allocation2 + $0x86] sm:$0xff] }
 0x102   : > { %7852 = vmatprep.mubr.msk.f32.mxu1 %vm8542_vm1, %v10950_v1  ;;  %v7380_v43 = vpop.f32.mrf.mxu0 }
 0x103   : > { %v7544_v45 = vpop.f32.mrf.mxu1 }
 0x104   : > { %v576_v46 = vpop.f32.mrf.mxu0  ;;  %7686 = vmatmul.mubr.msk.f32.gmra.mxu0 %vm125_vm2, %v1282_v41 }
 0x105   : > { %v1073_v47 = vpop.f32.mrf.mxu1  ;;  %7853 = vmatmul.mubr.msk.f32.gmra.mxu1 %vm125_vm2, %v1884_v42  ;;  %v9166_v48 = vadd.f32 %v1068_v39, %v576_v46  ;;  %7688 = vmatprep.mubr.msk.f32.mxu0 %vm8542_vm1, %v10950_v1  ;;  %v1290_v46 = vld [vmem:[#allocation2 + $0x7d] sm:$0xff] }
 0x106   : > { %7855 = vmatprep.mubr.msk.f32.mxu1 %vm8542_vm1, %v10950_v1  ;;  %v7383_v52 = vpop.f32.mrf.mxu0 }
 0x107   : > { %v7547_v53 = vpop.f32.mrf.mxu1 }
 0x108   : > { %v581_v54 = vpop.f32.mrf.mxu0  ;;  %7689 = vmatmul.mubr.msk.f32.gmra.mxu0 %vm125_vm2, %v1283_v49 }
 0x109   : > { %v1078_v55 = vpop.f32.mrf.mxu1  ;;  %7856 = vmatmul.mubr.msk.f32.gmra.mxu1 %vm125_vm2, %v1885_v50  ;;  %v9174_v56 = vadd.f32 %v1073_v47, %v581_v54  ;;  %7691 = vmatprep.mubr.msk.f32.mxu0 %vm8542_vm1, %v10950_v1  ;;  %v1892_v47 = vld [vmem:[#allocation2 + $0x8e] sm:$0xff] }
 0x10a   : > { %7858 = vmatprep.mubr.msk.f32.mxu1 %vm8542_vm1, %v10950_v1  ;;  %v7386_v60 = vpop.f32.mrf.mxu0 }
 0x10b   : > { %v7550_v61 = vpop.f32.mrf.mxu1 }
 0x10c   : > { %v586_v62 = vpop.f32.mrf.mxu0  ;;  %7692 = vmatmul.mubr.msk.f32.gmra.mxu0 %vm125_vm2, %v1284_v57  ;;  %v1893_v57 = vld [vmem:[#allocation2 + $0x96] sm:$0xff] }
 0x10d   : > { %v1083_v63 = vpop.f32.mrf.mxu1  ;;  %7859 = vmatmul.mubr.msk.f32.gmra.mxu1 %vm125_vm2, %v1886_v59  ;;  %v9182_v0 = vadd.f32 %v1078_v55, %v586_v62  ;;  %7694 = vmatprep.mubr.msk.f32.mxu0 %vm8542_vm1, %v10950_v1  ;;  %v1291_v55 = vld [vmem:[#allocation2 + $0x85] sm:$0xff] }
 0x10e   : > { %7861 = vmatprep.mubr.msk.f32.mxu1 %vm8542_vm1, %v10950_v1  ;;  %v7389_v5 = vpop.f32.mrf.mxu0 }
 0x10f   : > { %v7553_v6 = vpop.f32.mrf.mxu1 }
 0x110   : > { %v591_v7 = vpop.f32.mrf.mxu0  ;;  %7695 = vmatmul.mubr.msk.f32.gmra.mxu0 %vm125_vm2, %v1285_v2  ;;  %v1292_v2 = vld [vmem:[#allocation2 + $0x8d] sm:$0xff] }
 0x111   : > { %v1088_v8 = vpop.f32.mrf.mxu1  ;;  %7862 = vmatmul.mubr.msk.f32.gmra.mxu1 %vm125_vm2, %v1887_v4  ;;  %v9190_v9 = vadd.f32 %v1083_v63, %v591_v7  ;;  %7697 = vmatprep.mubr.msk.f32.mxu0 %vm8542_vm1, %v10950_v1  ;;  %v1894_v4 = vld [vmem:[#allocation2 + $0x9e] sm:$0xff] }
 0x112   : > { %7864 = vmatprep.mubr.msk.f32.mxu1 %vm8542_vm1, %v10950_v1  ;;  %v7392_v13 = vpop.f32.mrf.mxu0 }
 0x113   : > { %v7556_v14 = vpop.f32.mrf.mxu1  ;;  %v1895_v13 = vld [vmem:[#allocation2 + $0xa6] sm:$0xff] }
 0x114   : > { %v596_v15 = vpop.f32.mrf.mxu0  ;;  %7698 = vmatmul.mubr.msk.f32.gmra.mxu0 %vm125_vm2, %v1286_v11 }
 0x115   : > { %v1093_v16 = vpop.f32.mrf.mxu1  ;;  %7865 = vmatmul.mubr.msk.f32.gmra.mxu1 %vm125_vm2, %v1888_v12  ;;  %v9198_v18 = vadd.f32 %v1088_v8, %v596_v15  ;;  %7700 = vmatprep.mubr.msk.f32.mxu0 %vm8542_vm1, %v10950_v1  ;;  %v1293_v12 = vld [vmem:[#allocation2 + $0x95] sm:$0xff] }
 0x116   : > { %7867 = vmatprep.mubr.msk.f32.mxu1 %vm8542_vm1, %v10950_v1  ;;  %v7395_v21 = vpop.f32.mrf.mxu0 }
 0x117   : > { %v7559_v22 = vpop.f32.mrf.mxu1 }
 0x118   : > { %v601_v23 = vpop.f32.mrf.mxu0  ;;  %7701 = vmatmul.mubr.msk.f32.gmra.mxu0 %vm125_vm2, %v1287_v19  ;;  %v1294_v22 = vld [vmem:[#allocation2 + $0x9d] sm:$0xff] }
 0x119   : > { %v1098_v25 = vpop.f32.mrf.mxu1  ;;  %7868 = vmatmul.mubr.msk.f32.gmra.mxu1 %vm125_vm2, %v1889_v20  ;;  %v9206_v26 = vadd.f32 %v1093_v16, %v601_v23  ;;  %7703 = vmatprep.mubr.msk.f32.mxu0 %vm8542_vm1, %v10950_v1  ;;  %v122_v16 = vld [vmem:[%s8666_s22 + $0x1a8] sm:$0xff] }
 0x11a   : > { %7870 = vmatprep.mubr.msk.f32.mxu1 %vm8542_vm1, %v10950_v1  ;;  %v7398_v30 = vpop.f32.mrf.mxu0  ;;  %179 = vst.msk [vmem:[#allocation2 + $0x1a8] sm:$0xff] %vm125_vm2, %v122_v16  ;;  %v1896_v23 = vld [vmem:[#allocation2 + $0xae] sm:$0xff]  ;;  %v1299_v16 = vld [vmem:[#allocation2 + $0xc5] sm:$0xff] }
 0x11b   : > { %v7562_v31 = vpop.f32.mrf.mxu1 }
 0x11c   : > { %v606_v33 = vpop.f32.mrf.mxu0  ;;  %7704 = vmatmul.mubr.msk.f32.gmra.mxu0 %vm125_vm2, %v1288_v27 }
 0x11d   : > { %v1103_v34 = vpop.f32.mrf.mxu1  ;;  %7871 = vmatmul.mubr.msk.f32.gmra.mxu1 %vm125_vm2, %v1890_v28  ;;  %v9214_v35 = vadd.f32 %v1098_v25, %v606_v33  ;;  %7706 = vmatprep.mubr.msk.f32.mxu0 %vm8542_vm1, %v10950_v1  ;;  %v123_v28 = vld [vmem:[%s8666_s22 + $0x1b0] sm:$0xff] }
 0x11e   : > { %7873 = vmatprep.mubr.msk.f32.mxu1 %vm8542_vm1, %v10950_v1  ;;  %v7401_v39 = vpop.f32.mrf.mxu0  ;;  %180 = vst.msk [vmem:[#allocation2 + $0x1b0] sm:$0xff] %vm125_vm2, %v123_v28  ;;  %v1300_v28 = vld [vmem:[#allocation2 + $0xcd] sm:$0xff] }
 0x11f   : > { %v7565_v41 = vpop.f32.mrf.mxu1 }
 0x120   : > { %v611_v42 = vpop.f32.mrf.mxu0  ;;  %7707 = vmatmul.mubr.msk.f32.gmra.mxu0 %vm125_vm2, %v1289_v36  ;;  %v1897_v36 = vld [vmem:[#allocation2 + $0xb6] sm:$0xff] }
 0x121   : > { %v1108_v43 = vpop.f32.mrf.mxu1  ;;  %7874 = vmatmul.mubr.msk.f32.gmra.mxu1 %vm125_vm2, %v1891_v38  ;;  %v9222_v45 = vadd.f32 %v1103_v34, %v611_v42  ;;  %7709 = vmatprep.mubr.msk.f32.mxu0 %vm8542_vm1, %v10950_v1  ;;  %v1295_v34 = vld [vmem:[#allocation2 + $0xa5] sm:$0xff] }
 0x122   : > { %7876 = vmatprep.mubr.msk.f32.mxu1 %vm8542_vm1, %v10950_v1  ;;  %v7404_v49 = vpop.f32.mrf.mxu0 }
 0x123   : > { %v7568_v50 = vpop.f32.mrf.mxu1  ;;  %v124_v49 = vld [vmem:[%s8666_s22 + $0x1b8] sm:$0x1] }
 0x124   : > { %v616_v52 = vpop.f32.mrf.mxu0  ;;  %7710 = vmatmul.mubr.msk.f32.gmra.mxu0 %vm125_vm2, %v1290_v46  ;;  %v1296_v46 = vld [vmem:[#allocation2 + $0xad] sm:$0xff]  ;;  %182 = vst.msk [vmem:[#allocation2 + $0x1b8] sm:$0x1] %vm181_vm3, %v124_v49 }
 0x125   : > { %v1113_v53 = vpop.f32.mrf.mxu1  ;;  %7877 = vmatmul.mubr.msk.f32.gmra.mxu1 %vm125_vm2, %v1892_v47  ;;  %v9230_v54 = vadd.f32 %v1108_v43, %v616_v52  ;;  %7712 = vmatprep.mubr.msk.f32.mxu0 %vm8542_vm1, %v10950_v1  ;;  %v1898_v47 = vld [vmem:[#allocation2 + $0xbe] sm:$0xff] }
 0x126   : > { %7879 = vmatprep.mubr.msk.f32.mxu1 %vm8542_vm1, %v10950_v1  ;;  %v7407_v59 = vpop.f32.mrf.mxu0 }
 0x127   : > { %v7571_v60 = vpop.f32.mrf.mxu1  ;;  %v1297_v59 = vld [vmem:[#allocation2 + $0xb5] sm:$0xff] }
 0x128   : > { %v621_v61 = vpop.f32.mrf.mxu0  ;;  %7713 = vmatmul.mubr.msk.f32.gmra.mxu0 %vm125_vm2, %v1291_v55  ;;  %v1899_v60 = vld [vmem:[#allocation2 + $0xc6] sm:$0xff] }
 0x129   : > { %v1118_v62 = vpop.f32.mrf.mxu1  ;;  %7880 = vmatmul.mubr.msk.f32.gmra.mxu1 %vm125_vm2, %v1893_v57  ;;  %v9238_v63 = vadd.f32 %v1113_v53, %v621_v61  ;;  %7715 = vmatprep.mubr.msk.f32.mxu0 %vm8542_vm1, %v10950_v1 }
 0x12a   : > { %7882 = vmatprep.mubr.msk.f32.mxu1 %vm8542_vm1, %v10950_v1  ;;  %v7410_v5 = vpop.f32.mrf.mxu0 }
 0x12b   : > { %v7574_v6 = vpop.f32.mrf.mxu1 }
 0x12c   : > { %v626_v7 = vpop.f32.mrf.mxu0  ;;  %7716 = vmatmul.mubr.msk.f32.gmra.mxu0 %vm125_vm2, %v1292_v2  ;;  %v1298_v6 = vld [vmem:[#allocation2 + $0xbd] sm:$0xff] }
 0x12d   : > { %v1123_v8 = vpop.f32.mrf.mxu1  ;;  %7883 = vmatmul.mubr.msk.f32.gmra.mxu1 %vm125_vm2, %v1894_v4  ;;  %v9246_v11 = vadd.f32 %v1118_v62, %v626_v7  ;;  %7718 = vmatprep.mubr.msk.f32.mxu0 %vm8542_vm1, %v10950_v1  ;;  %v1900_v7 = vld [vmem:[#allocation2 + $0xce] sm:$0xff] }
 0x12e   : > { %7885 = vmatprep.mubr.msk.f32.mxu1 %vm8542_vm1, %v10950_v1  ;;  %v7413_v14 = vpop.f32.mrf.mxu0 }
 0x12f   : > { %v7577_v15 = vpop.f32.mrf.mxu1 }
 0x130   : > { %v631_v19 = vpop.f32.mrf.mxu0  ;;  %7719 = vmatmul.mubr.msk.f32.gmra.mxu0 %vm125_vm2, %v1293_v12 }
 0x131   : > { %v1128_v20 = vpop.f32.mrf.mxu1  ;;  %7886 = vmatmul.mubr.msk.f32.gmra.mxu1 %vm125_vm2, %v1895_v13  ;;  %v9256_v21 = vadd.f32 %v1123_v8, %v631_v19  ;;  %7721 = vmatprep.mubr.msk.f32.mxu0 %vm8542_vm1, %v10950_v1  ;;  %v1901_v19 = vld [vmem:[#allocation2 + $0xd6] sm:$0xff] }
 0x132   : > { %7888 = vmatprep.mubr.msk.f32.mxu1 %vm8542_vm1, %v10950_v1  ;;  %v7416_v25 = vpop.f32.mrf.mxu0 }
 0x133   : > { %v7580_v27 = vpop.f32.mrf.mxu1 }
 0x134   : > { %v636_v30 = vpop.f32.mrf.mxu0  ;;  %7722 = vmatmul.mubr.msk.f32.gmra.mxu0 %vm125_vm2, %v1294_v22 }
 0x135   : > { %v1133_v31 = vpop.f32.mrf.mxu1  ;;  %7889 = vmatmul.mubr.msk.f32.gmra.mxu1 %vm125_vm2, %v1896_v23  ;;  %v9266_v33 = vadd.f32 %v1128_v20, %v636_v30  ;;  %7724 = vmatprep.mubr.msk.f32.mxu0 %vm8542_vm1, %v10950_v1  ;;  %v1902_v30 = vld [vmem:[#allocation2 + $0xde] sm:$0xff] }
 0x136   : > { %7891 = vmatprep.mubr.msk.f32.mxu1 %vm8542_vm1, %v10950_v1  ;;  %v7419_v38 = vpop.f32.mrf.mxu0 }
 0x137   : > { %v7583_v39 = vpop.f32.mrf.mxu1 }
 0x138   : > { %v641_v41 = vpop.f32.mrf.mxu0  ;;  %7725 = vmatmul.mubr.msk.f32.gmra.mxu0 %vm125_vm2, %v1295_v34 }
 0x139   : > { %v1138_v42 = vpop.f32.mrf.mxu1  ;;  %7892 = vmatmul.mubr.msk.f32.gmra.mxu1 %vm125_vm2, %v1897_v36  ;;  %v9274_v43 = vadd.f32 %v1133_v31, %v641_v41  ;;  %7727 = vmatprep.mubr.msk.f32.mxu0 %vm8542_vm1, %v10950_v1  ;;  %v1301_v41 = vld [vmem:[#allocation2 + $0xd5] sm:$0xff] }
 0x13a   : > { %7894 = vmatprep.mubr.msk.f32.mxu1 %vm8542_vm1, %v10950_v1  ;;  %v7422_v50 = vpop.f32.mrf.mxu0 }
 0x13b   : > { %v7586_v52 = vpop.f32.mrf.mxu1 }
 0x13c   : > { %v646_v53 = vpop.f32.mrf.mxu0  ;;  %7728 = vmatmul.mubr.msk.f32.gmra.mxu0 %vm125_vm2, %v1296_v46 }
 0x13d   : > { %v1143_v55 = vpop.f32.mrf.mxu1  ;;  %7895 = vmatmul.mubr.msk.f32.gmra.mxu1 %vm125_vm2, %v1898_v47  ;;  %v9283_v57 = vadd.f32 %v1138_v42, %v646_v53  ;;  %7730 = vmatprep.mubr.msk.f32.mxu0 %vm8542_vm1, %v10950_v1  ;;  %v1903_v42 = vld [vmem:[#allocation2 + $0xe6] sm:$0xff]  ;;  %v1302_v53 = vld [vmem:[#allocation2 + $0xdd] sm:$0xff] }
 0x13e   : > { %7897 = vmatprep.mubr.msk.f32.mxu1 %vm8542_vm1, %v10950_v1  ;;  %v7425_v61 = vpop.f32.mrf.mxu0 }
 0x13f   : > { %v7589_v62 = vpop.f32.mrf.mxu1 }
 0x140   : > { %v651_v2 = vpop.f32.mrf.mxu0  ;;  %7731 = vmatmul.mubr.msk.f32.gmra.mxu0 %vm125_vm2, %v1297_v59 }
 0x141   : > { %v1148_v4 = vpop.f32.mrf.mxu1  ;;  %7898 = vmatmul.mubr.msk.f32.gmra.mxu1 %vm125_vm2, %v1899_v60  ;;  %v9291_v5 = vadd.f32 %v1143_v55, %v651_v2  ;;  %7733 = vmatprep.mubr.msk.f32.mxu0 %vm8542_vm1, %v10950_v1  ;;  %v1904_v55 = vld [vmem:[#allocation2 + $0xee] sm:$0xff] }
 0x142   : > { %7900 = vmatprep.mubr.msk.f32.mxu1 %vm8542_vm1, %v10950_v1  ;;  %v7428_v8 = vpop.f32.mrf.mxu0 }
 0x143   : > { %v7592_v12 = vpop.f32.mrf.mxu1 }
 0x144   : > { %v656_v13 = vpop.f32.mrf.mxu0  ;;  %7734 = vmatmul.mubr.msk.f32.gmra.mxu0 %vm125_vm2, %v1298_v6  ;;  %v1905_v6 = vld [vmem:[#allocation2 + $0xf6] sm:$0xff] }
 0x145   : > { %v1153_v14 = vpop.f32.mrf.mxu1  ;;  %7901 = vmatmul.mubr.msk.f32.gmra.mxu1 %vm125_vm2, %v1900_v7  ;;  %v9299_v15 = vadd.f32 %v1148_v4, %v656_v13  ;;  %7736 = vmatprep.mubr.msk.f32.mxu0 %vm8542_vm1, %v10950_v1  ;;  %v1303_v4 = vld [vmem:[#allocation2 + $0xe5] sm:$0xff] }
 0x146   : > { %7903 = vmatprep.mubr.msk.f32.mxu1 %vm8542_vm1, %v10950_v1  ;;  %v7431_v20 = vpop.f32.mrf.mxu0 }
 0x147   : > { %v7595_v22 = vpop.f32.mrf.mxu1 }
 0x148   : > { %v661_v23 = vpop.f32.mrf.mxu0  ;;  %7737 = vmatmul.mubr.msk.f32.gmra.mxu0 %vm125_vm2, %v1299_v16  ;;  %v1304_v16 = vld [vmem:[#allocation2 + $0xed] sm:$0xff] }
 0x149   : > { %v1158_v25 = vpop.f32.mrf.mxu1  ;;  %7904 = vmatmul.mubr.msk.f32.gmra.mxu1 %vm125_vm2, %v1901_v19  ;;  %v9307_v27 = vadd.f32 %v1153_v14, %v661_v23  ;;  %7739 = vmatprep.mubr.msk.f32.mxu0 %vm8542_vm1, %v10950_v1  ;;  %v1906_v19 = vld [vmem:[#allocation2 + $0xfe] sm:$0xff] }
 0x14a   : > { %7906 = vmatprep.mubr.msk.f32.mxu1 %vm8542_vm1, %v10950_v1  ;;  %v7434_v31 = vpop.f32.mrf.mxu0 }
 0x14b   : > { %v7598_v34 = vpop.f32.mrf.mxu1  ;;  %v1907_v31 = vld [vmem:[#allocation2 + $0x106] sm:$0xff] }
 0x14c   : > { %v666_v36 = vpop.f32.mrf.mxu0  ;;  %7740 = vmatmul.mubr.msk.f32.gmra.mxu0 %vm125_vm2, %v1300_v28 }
 0x14d   : > { %v1163_v38 = vpop.f32.mrf.mxu1  ;;  %7907 = vmatmul.mubr.msk.f32.gmra.mxu1 %vm125_vm2, %v1902_v30  ;;  %v9315_v39 = vadd.f32 %v1158_v25, %v666_v36  ;;  %7742 = vmatprep.mubr.msk.f32.mxu0 %vm8542_vm1, %v10950_v1  ;;  %v1305_v30 = vld [vmem:[#allocation2 + $0xf5] sm:$0xff] }
 0x14e   : > { %7909 = vmatprep.mubr.msk.f32.mxu1 %vm8542_vm1, %v10950_v1  ;;  %v7437_v46 = vpop.f32.mrf.mxu0 }
 0x14f   : > { %v7601_v47 = vpop.f32.mrf.mxu1  ;;  %v1306_v46 = vld [vmem:[#allocation2 + $0xfd] sm:$0xff] }
 0x150   : > { %v671_v49 = vpop.f32.mrf.mxu0  ;;  %7743 = vmatmul.mubr.msk.f32.gmra.mxu0 %vm125_vm2, %v1301_v41  ;;  %v1908_v47 = vld [vmem:[#allocation2 + $0x10e] sm:$0xff] }
 0x151   : > { %v1168_v50 = vpop.f32.mrf.mxu1  ;;  %7910 = vmatmul.mubr.msk.f32.gmra.mxu1 %vm125_vm2, %v1903_v42  ;;  %v9323_v52 = vadd.f32 %v1163_v38, %v671_v49  ;;  %7745 = vmatprep.mubr.msk.f32.mxu0 %vm8542_vm1, %v10950_v1 }
 0x152   : > { %7912 = vmatprep.mubr.msk.f32.mxu1 %vm8542_vm1, %v10950_v1  ;;  %v7440_v59 = vpop.f32.mrf.mxu0 }
 0x153   : > { %v7604_v60 = vpop.f32.mrf.mxu1 }
 0x154   : > { %v676_v61 = vpop.f32.mrf.mxu0  ;;  %7746 = vmatmul.mubr.msk.f32.gmra.mxu0 %vm125_vm2, %v1302_v53  ;;  %v1307_v60 = vld [vmem:[#allocation2 + $0x105] sm:$0xff] }
 0x155   : > { %v1173_v62 = vpop.f32.mrf.mxu1  ;;  %7913 = vmatmul.mubr.msk.f32.gmra.mxu1 %vm125_vm2, %v1904_v55  ;;  %v9331_v2 = vadd.f32 %v1168_v50, %v676_v61  ;;  %7748 = vmatprep.mubr.msk.f32.mxu0 %vm8542_vm1, %v10950_v1  ;;  %v1909_v61 = vld [vmem:[#allocation2 + $0x116] sm:$0xff] }
 0x156   : > { %7915 = vmatprep.mubr.msk.f32.mxu1 %vm8542_vm1, %v10950_v1  ;;  %v7443_v7 = vpop.f32.mrf.mxu0 }
 0x157   : > { %v7607_v8 = vpop.f32.mrf.mxu1 }
 0x158   : > { %v681_v12 = vpop.f32.mrf.mxu0  ;;  %7749 = vmatmul.mubr.msk.f32.gmra.mxu0 %vm125_vm2, %v1303_v4 }
 0x159   : > { %v1178_v13 = vpop.f32.mrf.mxu1  ;;  %7916 = vmatmul.mubr.msk.f32.gmra.mxu1 %vm125_vm2, %v1905_v6  ;;  %v9339_v14 = vadd.f32 %v1173_v62, %v681_v12  ;;  %7751 = vmatprep.mubr.msk.f32.mxu0 %vm8542_vm1, %v10950_v1  ;;  %v1308_v12 = vld [vmem:[#allocation2 + $0x10d] sm:$0xff] }
 0x15a   : > { %7918 = vmatprep.mubr.msk.f32.mxu1 %vm8542_vm1, %v10950_v1  ;;  %v7446_v20 = vpop.f32.mrf.mxu0 }
 0x15b   : > { %v7610_v22 = vpop.f32.mrf.mxu1 }
 0x15c   : > { %v686_v23 = vpop.f32.mrf.mxu0  ;;  %7752 = vmatmul.mubr.msk.f32.gmra.mxu0 %vm125_vm2, %v1304_v16 }
 0x15d   : > { %v1183_v25 = vpop.f32.mrf.mxu1  ;;  %7919 = vmatmul.mubr.msk.f32.gmra.mxu1 %vm125_vm2, %v1906_v19  ;;  %v9347_v28 = vadd.f32 %v1178_v13, %v686_v23  ;;  %7754 = vmatprep.mubr.msk.f32.mxu0 %vm8542_vm1, %v10950_v1  ;;  %v1910_v13 = vld [vmem:[#allocation2 + $0x11e] sm:$0xff] }
 0x15e   : > { %7921 = vmatprep.mubr.msk.f32.mxu1 %vm8542_vm1, %v10950_v1  ;;  %v7449_v34 = vpop.f32.mrf.mxu0 }
 0x15f   : > { %v7613_v36 = vpop.f32.mrf.mxu1 }
 0x160   : > { %v691_v38 = vpop.f32.mrf.mxu0  ;;  %7755 = vmatmul.mubr.msk.f32.gmra.mxu0 %vm125_vm2, %v1305_v30  ;;  %v1911_v30 = vld [vmem:[#allocation2 + $0x126] sm:$0xff] }
 0x161   : > { %v1188_v41 = vpop.f32.mrf.mxu1  ;;  %7922 = vmatmul.mubr.msk.f32.gmra.mxu1 %vm125_vm2, %v1907_v31  ;;  %v9355_v42 = vadd.f32 %v1183_v25, %v691_v38  ;;  %7757 = vmatprep.mubr.msk.f32.mxu0 %vm8542_vm1, %v10950_v1  ;;  %v1309_v25 = vld [vmem:[#allocation2 + $0x115] sm:$0xff] }
 0x162   : > { %7924 = vmatprep.mubr.msk.f32.mxu1 %vm8542_vm1, %v10950_v1  ;;  %v7452_v49 = vpop.f32.mrf.mxu0 }
 0x163   : > { %v7616_v50 = vpop.f32.mrf.mxu1 }
 0x164   : > { %v696_v53 = vpop.f32.mrf.mxu0  ;;  %7758 = vmatmul.mubr.msk.f32.gmra.mxu0 %vm125_vm2, %v1306_v46  ;;  %v1310_v46 = vld [vmem:[#allocation2 + $0x11d] sm:$0xff] }
 0x165   : > { %v1193_v55 = vpop.f32.mrf.mxu1  ;;  %7925 = vmatmul.mubr.msk.f32.gmra.mxu1 %vm125_vm2, %v1908_v47  ;;  %v9363_v59 = vadd.f32 %v1188_v41, %v696_v53  ;;  %7760 = vmatprep.mubr.msk.f32.mxu0 %vm8542_vm1, %v10950_v1  ;;  %v1912_v47 = vld [vmem:[#allocation2 + $0x12e] sm:$0xff] }
 0x166   : > { %7927 = vmatprep.mubr.msk.f32.mxu1 %vm8542_vm1, %v10950_v1  ;;  %v7455_v62 = vpop.f32.mrf.mxu0 }
 0x167   : > { %v7619_v4 = vpop.f32.mrf.mxu1  ;;  %v1913_v62 = vld [vmem:[#allocation2 + $0x136] sm:$0xff] }
 0x168   : > { %v701_v6 = vpop.f32.mrf.mxu0  ;;  %7761 = vmatmul.mubr.msk.f32.gmra.mxu0 %vm125_vm2, %v1307_v60 }
 0x169   : > { %v1198_v7 = vpop.f32.mrf.mxu1  ;;  %7928 = vmatmul.mubr.msk.f32.gmra.mxu1 %vm125_vm2, %v1909_v61  ;;  %v9371_v8 = vadd.f32 %v1193_v55, %v701_v6  ;;  %7763 = vmatprep.mubr.msk.f32.mxu0 %vm8542_vm1, %v10950_v1  ;;  %v1311_v61 = vld [vmem:[#allocation2 + $0x125] sm:$0xff] }
 0x16a   : > { %7930 = vmatprep.mubr.msk.f32.mxu1 %vm8542_vm1, %v10950_v1  ;;  %v7458_v16 = vpop.f32.mrf.mxu0 }
 0x16b   : > { %v7622_v19 = vpop.f32.mrf.mxu1  ;;  %v1312_v16 = vld [vmem:[#allocation2 + $0x12d] sm:$0xff] }
 0x16c   : > { %v706_v20 = vpop.f32.mrf.mxu0  ;;  %7764 = vmatmul.mubr.msk.f32.gmra.mxu0 %vm125_vm2, %v1308_v12  ;;  %v1914_v19 = vld [vmem:[#allocation2 + $0x13e] sm:$0xff] }
 0x16d   : > { %v1203_v22 = vpop.f32.mrf.mxu1  ;;  %7931 = vmatmul.mubr.msk.f32.gmra.mxu1 %vm125_vm2, %v1910_v13  ;;  %v9379_v23 = vadd.f32 %v1198_v7, %v706_v20  ;;  %7766 = vmatprep.mubr.msk.f32.mxu0 %vm8542_vm1, %v10950_v1 }
 0x16e   : > { %7933 = vmatprep.mubr.msk.f32.mxu1 %vm8542_vm1, %v10950_v1  ;;  %v7461_v31 = vpop.f32.mrf.mxu0 }
 0x16f   : > { %v7625_v34 = vpop.f32.mrf.mxu1 }
 0x170   : > { %v711_v36 = vpop.f32.mrf.mxu0  ;;  %7767 = vmatmul.mubr.msk.f32.gmra.mxu0 %vm125_vm2, %v1309_v25  ;;  %v1313_v34 = vld [vmem:[#allocation2 + $0x135] sm:$0xff] }
 0x171   : > { %v1208_v38 = vpop.f32.mrf.mxu1  ;;  %7934 = vmatmul.mubr.msk.f32.gmra.mxu1 %vm125_vm2, %v1911_v30  ;;  %v9387_v41 = vadd.f32 %v1203_v22, %v711_v36  ;;  %7769 = vmatprep.mubr.msk.f32.mxu0 %vm8542_vm1, %v10950_v1  ;;  %v1915_v36 = vld [vmem:[#allocation2 + $0x146] sm:$0xff] }
 0x172   : > { %7936 = vmatprep.mubr.msk.f32.mxu1 %vm8542_vm1, %v10950_v1  ;;  %v7464_v49 = vpop.f32.mrf.mxu0 }
 0x173   : > { %v7628_v50 = vpop.f32.mrf.mxu1 }
 0x174   : > { %v716_v53 = vpop.f32.mrf.mxu0  ;;  %7770 = vmatmul.mubr.msk.f32.gmra.mxu0 %vm125_vm2, %v1310_v46 }
 0x175   : > { %v1213_v55 = vpop.f32.mrf.mxu1  ;;  %7937 = vmatmul.mubr.msk.f32.gmra.mxu1 %vm125_vm2, %v1912_v47  ;;  %v9395_v60 = vadd.f32 %v1208_v38, %v716_v53  ;;  %7772 = vmatprep.mubr.msk.f32.mxu0 %vm8542_vm1, %v10950_v1  ;;  %v1314_v53 = vld [vmem:[#allocation2 + $0x13d] sm:$0xff] }
 0x176   : > { %7939 = vmatprep.mubr.msk.f32.mxu1 %vm8542_vm1, %v10950_v1  ;;  %v7467_v4 = vpop.f32.mrf.mxu0 }
 0x177   : > { %v7631_v6 = vpop.f32.mrf.mxu1 }
 0x178   : > { %v721_v7 = vpop.f32.mrf.mxu0  ;;  %7773 = vmatmul.mubr.msk.f32.gmra.mxu0 %vm125_vm2, %v1311_v61 }
 0x179   : > { %v1218_v12 = vpop.f32.mrf.mxu1  ;;  %7940 = vmatmul.mubr.msk.f32.gmra.mxu1 %vm125_vm2, %v1913_v62  ;;  %v9403_v13 = vadd.f32 %v1213_v55, %v721_v7  ;;  %7775 = vmatprep.mubr.msk.f32.mxu0 %vm8542_vm1, %v10950_v1  ;;  %v1916_v55 = vld [vmem:[#allocation2 + $0x14e] sm:$0xff] }
 0x17a   : > { %7942 = vmatprep.mubr.msk.f32.mxu1 %vm8542_vm1, %v10950_v1  ;;  %v7470_v20 = vpop.f32.mrf.mxu0 }
 0x17b   : > { %v7634_v22 = vpop.f32.mrf.mxu1 }
 0x17c   : > { %v726_v25 = vpop.f32.mrf.mxu0  ;;  %7776 = vmatmul.mubr.msk.f32.gmra.mxu0 %vm125_vm2, %v1312_v16  ;;  %v1917_v16 = vld [vmem:[#allocation2 + $0x156] sm:$0xff] }
 0x17d   : > { %v1223_v30 = vpop.f32.mrf.mxu1  ;;  %7943 = vmatmul.mubr.msk.f32.gmra.mxu1 %vm125_vm2, %v1914_v19  ;;  %v9411_v31 = vadd.f32 %v1218_v12, %v726_v25  ;;  %7778 = vmatprep.mubr.msk.f32.mxu0 %vm8542_vm1, %v10950_v1  ;;  %v1315_v12 = vld [vmem:[#allocation2 + $0x145] sm:$0xff] }
 0x17e   : > { %7945 = vmatprep.mubr.msk.f32.mxu1 %vm8542_vm1, %v10950_v1  ;;  %v7473_v38 = vpop.f32.mrf.mxu0 }
 0x17f   : > { %v7637_v46 = vpop.f32.mrf.mxu1 }
 0x180   : > { %v731_v47 = vpop.f32.mrf.mxu0  ;;  %7779 = vmatmul.mubr.msk.f32.gmra.mxu0 %vm125_vm2, %v1313_v34  ;;  %v1316_v34 = vld [vmem:[#allocation2 + $0x14d] sm:$0xff] }
 0x181   : > { %v1228_v49 = vpop.f32.mrf.mxu1  ;;  %7946 = vmatmul.mubr.msk.f32.gmra.mxu1 %vm125_vm2, %v1915_v36  ;;  %v9419_v50 = vadd.f32 %v1223_v30, %v731_v47  ;;  %7781 = vmatprep.mubr.msk.f32.mxu0 %vm8542_vm1, %v10950_v1  ;;  %v1918_v36 = vld [vmem:[#allocation2 + $0x15e] sm:$0xff] }
 0x182   : > { %7948 = vmatprep.mubr.msk.f32.mxu1 %vm8542_vm1, %v10950_v1  ;;  %v7476_v61 = vpop.f32.mrf.mxu0 }
 0x183   : > { %v7640_v62 = vpop.f32.mrf.mxu1  ;;  %v1919_v61 = vld [vmem:[#allocation2 + $0x166] sm:$0xff] }
 0x184   : > { %v736_v4 = vpop.f32.mrf.mxu0  ;;  %7782 = vmatmul.mubr.msk.f32.gmra.mxu0 %vm125_vm2, %v1314_v53 }
 0x185   : > { %v1233_v6 = vpop.f32.mrf.mxu1  ;;  %7949 = vmatmul.mubr.msk.f32.gmra.mxu1 %vm125_vm2, %v1916_v55  ;;  %v9427_v7 = vadd.f32 %v1228_v49, %v736_v4  ;;  %7784 = vmatprep.mubr.msk.f32.mxu0 %vm8542_vm1, %v10950_v1  ;;  %v1317_v55 = vld [vmem:[#allocation2 + $0x155] sm:$0xff] }
 0x186   : > { %7951 = vmatprep.mubr.msk.f32.mxu1 %vm8542_vm1, %v10950_v1  ;;  %v7479_v19 = vpop.f32.mrf.mxu0 }
 0x187   : > { %v7643_v20 = vpop.f32.mrf.mxu1  ;;  %v1318_v19 = vld [vmem:[#allocation2 + $0x15d] sm:$0xff] }
 0x188   : > { %v741_v22 = vpop.f32.mrf.mxu0  ;;  %7785 = vmatmul.mubr.msk.f32.gmra.mxu0 %vm125_vm2, %v1315_v12  ;;  %v1920_v20 = vld [vmem:[#allocation2 + $0x16e] sm:$0xff] }
 0x189   : > { %v1238_v25 = vpop.f32.mrf.mxu1  ;;  %7952 = vmatmul.mubr.msk.f32.gmra.mxu1 %vm125_vm2, %v1917_v16  ;;  %v9435_v30 = vadd.f32 %v1233_v6, %v741_v22  ;;  %7787 = vmatprep.mubr.msk.f32.mxu0 %vm8542_vm1, %v10950_v1 }
 0x18a   : > { %7954 = vmatprep.mubr.msk.f32.mxu1 %vm8542_vm1, %v10950_v1  ;;  %v7482_v38 = vpop.f32.mrf.mxu0 }
 0x18b   : > { %v7646_v46 = vpop.f32.mrf.mxu1 }
 0x18c   : > { %v746_v47 = vpop.f32.mrf.mxu0  ;;  %7788 = vmatmul.mubr.msk.f32.gmra.mxu0 %vm125_vm2, %v1316_v34  ;;  %v1319_v46 = vld [vmem:[#allocation2 + $0x165] sm:$0xff] }
 0x18d   : > { %v1243_v49 = vpop.f32.mrf.mxu1  ;;  %7955 = vmatmul.mubr.msk.f32.gmra.mxu1 %vm125_vm2, %v1918_v36  ;;  %v9443_v53 = vadd.f32 %v1238_v25, %v746_v47  ;;  %7790 = vmatprep.mubr.msk.f32.mxu0 %vm8542_vm1, %v10950_v1  ;;  %v1921_v47 = vld [vmem:[#allocation2 + $0x176] sm:$0xff] }
 0x18e   : > { %7957 = vmatprep.mubr.msk.f32.mxu1 %vm8542_vm1, %v10950_v1  ;;  %v7485_v62 = vpop.f32.mrf.mxu0 }
 0x18f   : > { %v7649_v4 = vpop.f32.mrf.mxu1 }
 0x190   : > { %v751_v6 = vpop.f32.mrf.mxu0  ;;  %7791 = vmatmul.mubr.msk.f32.gmra.mxu0 %vm125_vm2, %v1317_v55 }
 0x191   : > { %v1248_v12 = vpop.f32.mrf.mxu1  ;;  %7958 = vmatmul.mubr.msk.f32.gmra.mxu1 %vm125_vm2, %v1919_v61  ;;  %v9451_v16 = vadd.f32 %v1243_v49, %v751_v6  ;;  %7793 = vmatprep.mubr.msk.f32.mxu0 %vm8542_vm1, %v10950_v1  ;;  %v1320_v6 = vld [vmem:[#allocation2 + $0x16d] sm:$0xff] }
 0x192   : > { %7960 = vmatprep.mubr.msk.f32.mxu1 %vm8542_vm1, %v10950_v1  ;;  %v7488_v22 = vpop.f32.mrf.mxu0 }
 0x193   : > { %v7652_v25 = vpop.f32.mrf.mxu1 }
 0x194   : > { %v756_v34 = vpop.f32.mrf.mxu0  ;;  %7794 = vmatmul.mubr.msk.f32.gmra.mxu0 %vm125_vm2, %v1318_v19 }
 0x195   : > { %v1253_v36 = vpop.f32.mrf.mxu1  ;;  %7961 = vmatmul.mubr.msk.f32.gmra.mxu1 %vm125_vm2, %v1920_v20  ;;  %v9459_v38 = vadd.f32 %v1248_v12, %v756_v34  ;;  %7796 = vmatprep.mubr.msk.f32.mxu0 %vm8542_vm1, %v10950_v1  ;;  %v1922_v12 = vld [vmem:[#allocation2 + $0x17e] sm:$0xff] }
 0x196   : > { %7963 = vmatprep.mubr.msk.f32.mxu1 %vm8542_vm1, %v10950_v1  ;;  %v7491_v49 = vpop.f32.mrf.mxu0 }
 0x197   : > { %v7655_v55 = vpop.f32.mrf.mxu1 }
 0x198   : > { %v761_v61 = vpop.f32.mrf.mxu0  ;;  %7797 = vmatmul.mubr.msk.f32.gmra.mxu0 %vm125_vm2, %v1319_v46  ;;  %v1923_v46 = vld [vmem:[#allocation2 + $0x186] sm:$0xff] }
 0x199   : > { %v1258_v62 = vpop.f32.mrf.mxu1  ;;  %7964 = vmatmul.mubr.msk.f32.gmra.mxu1 %vm125_vm2, %v1921_v47  ;;  %v9467_v4 = vadd.f32 %v1253_v36, %v761_v61  ;;  %7799 = vmatprep.mubr.msk.f32.mxu0 %vm8542_vm1, %v10950_v1  ;;  %v1321_v36 = vld [vmem:[#allocation2 + $0x175] sm:$0xff] }
 0x19a   : > { %7966 = vmatprep.mubr.msk.f32.mxu1 %vm8542_vm1, %v10950_v1  ;;  %v7494_v19 = vpop.f32.mrf.mxu0 }
 0x19b   : > { %v7658_v20 = vpop.f32.mrf.mxu1 }
 0x19c   : > { %v766_v22 = vpop.f32.mrf.mxu0  ;;  %7800 = vmatmul.mubr.msk.f32.gmra.mxu0 %vm125_vm2, %v1320_v6 }
 0x19d   : > { %v1263_v25 = vpop.f32.mrf.mxu1  ;;  %7967 = vmatmul.mubr.msk.f32.gmra.mxu1 %vm125_vm2, %v1922_v12  ;;  %v9475_v34 = vadd.f32 %v1258_v62, %v766_v22  ;;  %7802 = vmatprep.mubr.msk.f32.mxu0 %vm8542_vm1, %v10950_v1  ;;  %v1322_v62 = vld [vmem:[#allocation2 + $0x17d] sm:$0xff]  ;;  %v1924_v12 = vld [vmem:[#allocation2 + $0x18e] sm:$0xff] }
 0x19e   : > { %7969 = vmatprep.mubr.msk.f32.mxu1 %vm8542_vm1, %v10950_v1  ;;  %v7497_v47 = vpop.f32.mrf.mxu0 }
 0x19f   : > { %10957 = vst [vmem:[#allocation8_spill] sm:$0xff] %v9475_v34  ;;  %v7661_v49 = vpop.f32.mrf.mxu1 }
 0x1a0   : > { %v771_v55 = vpop.f32.mrf.mxu0  ;;  %7803 = vmatmul.mubr.msk.f32.gmra.mxu0 %vm125_vm2, %v1321_v36 }
 0x1a1   : > { %v1268_v61 = vpop.f32.mrf.mxu1  ;;  %7970 = vmatmul.mubr.msk.f32.gmra.mxu1 %vm125_vm2, %v1923_v46  ;;  %v9483_v6 = vadd.f32 %v1263_v25, %v771_v55  ;;  %7805 = vmatprep.mubr.msk.f32.mxu0 %vm8542_vm1, %v10950_v1  ;;  %v1323_v25 = vld [vmem:[#allocation2 + $0x185] sm:$0xff]  ;;  %v1925_v46 = vld [vmem:[#allocation2 + $0x196] sm:$0xff] }
 0x1a2   : > { %7972 = vmatprep.mubr.msk.f32.mxu1 %vm8542_vm1, %v10950_v1  ;;  %v7500_v19 = vpop.f32.mrf.mxu0 }
 0x1a3   : > { %10958 = vst [vmem:[#allocation9_spill] sm:$0xff] %v9483_v6  ;;  %v7664_v20 = vpop.f32.mrf.mxu1  ;;  %v1928_v6 = vld [vmem:[#allocation2 + $0x1ae] sm:$0xff] }
 0x1a4   : > { %v776_v22 = vpop.f32.mrf.mxu0  ;;  %7806 = vmatmul.mubr.msk.f32.gmra.mxu0 %vm125_vm2, %v1322_v62 }
 0x1a5   : > { %v1273_v47 = vpop.f32.mrf.mxu1  ;;  %7973 = vmatmul.mubr.msk.f32.gmra.mxu1 %vm125_vm2, %v1924_v12  ;;  %v9491_v36 = vadd.f32 %v1268_v61, %v776_v22  ;;  %7808 = vmatprep.mubr.msk.f32.mxu0 %vm8542_vm1, %v10950_v1  ;;  %v1324_v61 = vld [vmem:[#allocation2 + $0x18d] sm:$0xff]  ;;  %v1926_v12 = vld [vmem:[#allocation2 + $0x19e] sm:$0xff] }
 0x1a6   : > { %7975 = vmatprep.mubr.msk.f32.mxu1 %vm8542_vm1, %v10950_v1  ;;  %v7503_v49 = vpop.f32.mrf.mxu0 }
 0x1a7   : > { %10959 = vst [vmem:[#allocation10_spill] sm:$0xff] %v9491_v36  ;;  %v7667_v55 = vpop.f32.mrf.mxu1 }
 0x1a8   : > { %v781_v19 = vpop.f32.mrf.mxu0  ;;  %7809 = vmatmul.mubr.msk.f32.gmra.mxu0 %vm125_vm2, %v1323_v25  ;;  %v1927_v25 = vld [vmem:[#allocation2 + $0x1a6] sm:$0xff] }
 0x1a9   : > { %v2160_v20 = vpop.f32.mrf.mxu1  ;;  %7976 = vmatmul.mubr.msk.f32.gmra.mxu1 %vm125_vm2, %v1925_v46  ;;  %v9499_v62 = vadd.f32 %v1273_v47, %v781_v19  ;;  %7811 = vmatprep.mubr.msk.f32.mxu0 %vm8542_vm1, %v10950_v1  ;;  %v1325_v47 = vld [vmem:[#allocation2 + $0x195] sm:$0xff] }
 0x1aa   : > { %7978 = vmatprep.mubr.msk.f32.mxu1 %vm8542_vm1, %v10950_v1  ;;  %v7506_v22 = vpop.f32.mrf.mxu0 }
 0x1ab   : > { %10960 = vst [vmem:[#allocation11_spill] sm:$0xff] %v9499_v62  ;;  %v7833_v36 = vpop.f32.mrf.mxu1 }
 0x1ac   : > { %v1013_v49 = vpop.f32.mrf.mxu0  ;;  %7812 = vmatmul.mubr.msk.f32.gmra.mxu0 %vm125_vm2, %v1324_v61 }
 0x1ad   : > { %v2165_v55 = vpop.f32.mrf.mxu1  ;;  %7979 = vmatmul.mubr.msk.f32.gmra.mxu1 %vm125_vm2, %v1926_v12  ;;  %7814 = vmatprep.mubr.msk.f32.mxu0 %vm8542_vm1, %v10950_v1  ;;  %v1014_v62 = vadd.f32 %v1013_v49, %v9072_v29  ;;  %v1326_v12 = vld [vmem:[#allocation2 + $0x19d] sm:$0xff] }
 0x1ae   : > { %7981 = vmatprep.mubr.msk.f32.mxu1 %vm8542_vm1, %v10950_v1  ;;  %v7511_v46 = vpop.f32.mrf.mxu0 }
 0x1af   : > { %v7836_v19 = vpop.f32.mrf.mxu1 }
 0x1b0   : > { %v1560_v22 = vpop.f32.mrf.mxu0  ;;  %7815 = vmatmul.mubr.msk.f32.gmra.mxu0 %vm125_vm2, %v1325_v47  ;;  %v1327_v47 = vld [vmem:[#allocation2 + $0x1a5] sm:$0xff] }
 0x1b1   : > { %v2170_v36 = vpop.f32.mrf.mxu1  ;;  %7982 = vmatmul.mubr.msk.f32.gmra.mxu1 %vm125_vm2, %v1927_v25  ;;  %v1824_v61 = vadd.f32 %v1560_v22, %v1014_v62  ;;  %7817 = vmatprep.mubr.msk.f32.mxu0 %vm8542_vm1, %v10950_v1  ;;  %v1929_v25 = vld [vmem:[#allocation2 + $0x1b6] sm:$0x7] }
 0x1b2   : > { %7984 = vmatprep.mubr.msk.f32.mxu1 %vm8542_vm1, %v10950_v1  ;;  %v7672_v46 = vpop.f32.mrf.mxu0 }
 0x1b3   : > { %v7839_v19 = vpop.f32.mrf.mxu1  ;;  %v2424_v34 = vadd.f32 %v2160_v20, %v1824_v61 }
 0x1b4   : > { %v1565_v29 = vpop.f32.mrf.mxu0  ;;  %7818 = vmatmul.mubr.msk.f32.gmra.mxu0 %vm125_vm2, %v1326_v12 }
 0x1b5   : > { %v2175_v49 = vpop.f32.mrf.mxu1  ;;  %7985 = vmatmul.mubr.msk.f32.gmra.mxu1 %vm125_vm2, %v1928_v6  ;;  %2478 = vst.msk [vmem:[#allocation3] sm:$0xff] %vm2477_vm4, %v2424_v34  ;;  %v1825_v62 = vadd.f32 %v1565_v29, %v9082_v37  ;;  %7820 = vmatprep.mubr.msk.f32.mxu0 %vm8542_vm1, %v10950_v1  ;;  %v1328_v34 = vld [vmem:[#allocation2 + $0x1ad] sm:$0xff] }
 0x1b6   : > { %7987 = vmatprep.mubr.msk.f32.mxu1 %vm8542_vm1, %v10950_v1  ;;  %v7675_v22 = vpop.f32.mrf.mxu0 }
 0x1b7   : > { %v7842_v20 = vpop.f32.mrf.mxu1  ;;  %v2425_v61 = vadd.f32 %v2165_v55, %v1825_v62 }
 0x1b8   : > { %v1570_v46 = vpop.f32.mrf.mxu0  ;;  %7821 = vmatmul.mubr.msk.f32.gmra.mxu0 %vm125_vm2, %v1327_v47  ;;  %v1329_v47 = vld [vmem:[#allocation2 + $0x1b5] sm:$0x7] }
 0x1b9   : > { %v2180_v12 = vpop.f32.mrf.mxu1  ;;  %7988 = vmatmul.mubr.msk.f32.gmra.mxu1 %vm125_vm2, %v1929_v25  ;;  %2479 = vst.msk [vmem:[#allocation3 + $0x8] sm:$0xff] %vm2477_vm4, %v2425_v61  ;;  %v1826_v37 = vadd.f32 %v1570_v46, %v9090_v44  ;;  %7823 = vmatprep.mubr.msk.f32.mxu0 %vm8542_vm1, %v10950_v1 }
 0x1ba   : > { %v7678_v6 = vpop.f32.mrf.mxu0 }
 0x1bb   : > { %v7845_v19 = vpop.f32.mrf.mxu1  ;;  %v2426_v29 = vadd.f32 %v2170_v36, %v1826_v37 }
 0x1bc   : > { %v1575_v22 = vpop.f32.mrf.mxu0  ;;  %7824 = vmatmul.mubr.msk.f32.gmra.mxu0 %vm125_vm2, %v1328_v34 }
 0x1bd   : > { %v2185_v55 = vpop.f32.mrf.mxu1  ;;  %2480 = vst.msk [vmem:[#allocation3 + $0x10] sm:$0xff] %vm2477_vm4, %v2426_v29  ;;  %v1827_v62 = vadd.f32 %v1575_v22, %v9098_v51  ;;  %7826 = vmatprep.mubr.msk.f32.mxu0 %vm8542_vm1, %v10950_v1 }
 0x1be   : > { %v7681_v44 = vpop.f32.mrf.mxu0 }
 0x1bf   : > { %v7848_v25 = vpop.f32.mrf.mxu1  ;;  %v2427_v20 = vadd.f32 %v2175_v49, %v1827_v62 }
 0x1c0   : > { %v1580_v61 = vpop.f32.mrf.mxu0  ;;  %7827 = vmatmul.mubr.msk.f32.gmra.mxu0 %vm125_vm2, %v1329_v47 }
 0x1c1   : > { %v2190_v46 = vpop.f32.mrf.mxu1  ;;  %2481 = vst.msk [vmem:[#allocation3 + $0x18] sm:$0xff] %vm2477_vm4, %v2427_v20  ;;  %v1828_v36 = vadd.f32 %v1580_v61, %v9106_v58 }
 0x1c2   : > { %v7684_v37 = vpop.f32.mrf.mxu0 }
 0x1c3   : > { %v7851_v34 = vpop.f32.mrf.mxu1  ;;  %v2428_v6 = vadd.f32 %v2180_v12, %v1828_v36 }
 0x1c4   : > { %v1585_v19 = vpop.f32.mrf.mxu0 }
 0x1c5   : > { %v2195_v51 = vpop.f32.mrf.mxu1  ;;  %2482 = vst.msk [vmem:[#allocation3 + $0x20] sm:$0xff] %vm2477_vm4, %v2428_v6  ;;  %v1829_v29 = vadd.f32 %v1585_v19, %v9117_v3 }
 0x1c6   : > { %v7687_v22 = vpop.f32.mrf.mxu0 }
 0x1c7   : > { %v7854_v44 = vpop.f32.mrf.mxu1  ;;  %v2429_v49 = vadd.f32 %v2185_v55, %v1829_v29 }
 0x1c8   : > { %v1590_v62 = vpop.f32.mrf.mxu0 }
 0x1c9   : > { %v2200_v25 = vpop.f32.mrf.mxu1  ;;  %2483 = vst.msk [vmem:[#allocation3 + $0x28] sm:$0xff] %vm2477_vm4, %v2429_v49  ;;  %v1830_v47 = vadd.f32 %v1590_v62, %v9126_v10 }
 0x1ca   : > { %v7690_v20 = vpop.f32.mrf.mxu0 }
 0x1cb   : > { %v7857_v58 = vpop.f32.mrf.mxu1  ;;  %v2430_v61 = vadd.f32 %v2190_v46, %v1830_v47 }
 0x1cc   : > { %v1595_v37 = vpop.f32.mrf.mxu0 }
 0x1cd   : > { %v2205_v12 = vpop.f32.mrf.mxu1  ;;  %2484 = vst.msk [vmem:[#allocation3 + $0x30] sm:$0xff] %vm2477_vm4, %v2430_v61  ;;  %v1831_v36 = vadd.f32 %v1595_v37, %v9134_v17 }
 0x1ce   : > { %v7693_v34 = vpop.f32.mrf.mxu0 }
 0x1cf   : > { %v7860_v3 = vpop.f32.mrf.mxu1  ;;  %v2431_v6 = vadd.f32 %v2195_v51, %v1831_v36 }
 0x1d0   : > { %v1600_v19 = vpop.f32.mrf.mxu0 }
 0x1d1   : > { %v2210_v55 = vpop.f32.mrf.mxu1  ;;  %2485 = vst.msk [vmem:[#allocation3 + $0x38] sm:$0xff] %vm2477_vm4, %v2431_v6  ;;  %v1832_v29 = vadd.f32 %v1600_v19, %v9142_v24 }
 0x1d2   : > { %v7696_v22 = vpop.f32.mrf.mxu0 }
 0x1d3   : > { %v7863_v10 = vpop.f32.mrf.mxu1  ;;  %v2432_v44 = vadd.f32 %v2200_v25, %v1832_v29 }
 0x1d4   : > { %v1605_v49 = vpop.f32.mrf.mxu0 }
 0x1d5   : > { %v2215_v46 = vpop.f32.mrf.mxu1  ;;  %2486 = vst.msk [vmem:[#allocation3 + $0x40] sm:$0xff] %vm2477_vm4, %v2432_v44  ;;  %v1833_v62 = vadd.f32 %v1605_v49, %v9150_v32 }
 0x1d6   : > { %v7699_v47 = vpop.f32.mrf.mxu0 }
 0x1d7   : > { %v7866_v17 = vpop.f32.mrf.mxu1  ;;  %v2433_v20 = vadd.f32 %v2205_v12, %v1833_v62 }
 0x1d8   : > { %v1610_v58 = vpop.f32.mrf.mxu0 }
 0x1d9   : > { %v2220_v51 = vpop.f32.mrf.mxu1  ;;  %2487 = vst.msk [vmem:[#allocation3 + $0x48] sm:$0xff] %vm2477_vm4, %v2433_v20  ;;  %v1834_v61 = vadd.f32 %v1610_v58, %v9158_v40 }
 0x1da   : > { %v7702_v37 = vpop.f32.mrf.mxu0 }
 0x1db   : > { %v7869_v24 = vpop.f32.mrf.mxu1  ;;  %v2434_v36 = vadd.f32 %v2210_v55, %v1834_v61 }
 0x1dc   : > { %v1615_v34 = vpop.f32.mrf.mxu0 }
 0x1dd   : > { %v2225_v25 = vpop.f32.mrf.mxu1  ;;  %2488 = vst.msk [vmem:[#allocation3 + $0x50] sm:$0xff] %vm2477_vm4, %v2434_v36  ;;  %v1835_v3 = vadd.f32 %v1615_v34, %v9166_v48 }
 0x1de   : > { %v7705_v6 = vpop.f32.mrf.mxu0 }
 0x1df   : > { %v7872_v32 = vpop.f32.mrf.mxu1  ;;  %v2435_v19 = vadd.f32 %v2215_v46, %v1835_v3 }
 0x1e0   : > { %v1620_v29 = vpop.f32.mrf.mxu0 }
 0x1e1   : > { %v2230_v12 = vpop.f32.mrf.mxu1  ;;  %2489 = vst.msk [vmem:[#allocation3 + $0x58] sm:$0xff] %vm2477_vm4, %v2435_v19  ;;  %v1836_v22 = vadd.f32 %v1620_v29, %v9174_v56 }
 0x1e2   : > { %v7708_v10 = vpop.f32.mrf.mxu0 }
 0x1e3   : > { %v7875_v40 = vpop.f32.mrf.mxu1  ;;  %v2436_v44 = vadd.f32 %v2220_v51, %v1836_v22 }
 0x1e4   : > { %v1625_v49 = vpop.f32.mrf.mxu0 }
 0x1e5   : > { %v2235_v55 = vpop.f32.mrf.mxu1  ;;  %2490 = vst.msk [vmem:[#allocation3 + $0x60] sm:$0xff] %vm2477_vm4, %v2436_v44  ;;  %v1837_v62 = vadd.f32 %v1625_v49, %v9182_v0 }
 0x1e6   : > { %v7711_v47 = vpop.f32.mrf.mxu0 }
 0x1e7   : > { %v7878_v48 = vpop.f32.mrf.mxu1  ;;  %v2437_v17 = vadd.f32 %v2225_v25, %v1837_v62 }
 0x1e8   : > { %v1630_v20 = vpop.f32.mrf.mxu0 }
 0x1e9   : > { %v2240_v46 = vpop.f32.mrf.mxu1  ;;  %2491 = vst.msk [vmem:[#allocation3 + $0x68] sm:$0xff] %vm2477_vm4, %v2437_v17  ;;  %v1838_v58 = vadd.f32 %v1630_v20, %v9190_v9 }
 0x1ea   : > { %v7714_v61 = vpop.f32.mrf.mxu0 }
 0x1eb   : > { %v7881_v56 = vpop.f32.mrf.mxu1  ;;  %v2438_v37 = vadd.f32 %v2230_v12, %v1838_v58 }
 0x1ec   : > { %v1635_v24 = vpop.f32.mrf.mxu0 }
 0x1ed   : > { %v2245_v51 = vpop.f32.mrf.mxu1  ;;  %2492 = vst.msk [vmem:[#allocation3 + $0x70] sm:$0xff] %vm2477_vm4, %v2438_v37  ;;  %v1839_v36 = vadd.f32 %v1635_v24, %v9198_v18 }
 0x1ee   : > { %v7717_v34 = vpop.f32.mrf.mxu0 }
 0x1ef   : > { %v7884_v0 = vpop.f32.mrf.mxu1  ;;  %v2439_v3 = vadd.f32 %v2235_v55, %v1839_v36 }
 0x1f0   : > { %v1640_v6 = vpop.f32.mrf.mxu0 }
 0x1f1   : > { %v2250_v25 = vpop.f32.mrf.mxu1  ;;  %2493 = vst.msk [vmem:[#allocation3 + $0x78] sm:$0xff] %vm2477_vm4, %v2439_v3  ;;  %v1840_v32 = vadd.f32 %v1640_v6, %v9206_v26 }
 0x1f2   : > { %v7720_v19 = vpop.f32.mrf.mxu0 }
 0x1f3   : > { %v7887_v9 = vpop.f32.mrf.mxu1  ;;  %v2440_v29 = vadd.f32 %v2240_v46, %v1840_v32 }
 0x1f4   : > { %v1645_v22 = vpop.f32.mrf.mxu0 }
 0x1f5   : > { %v2255_v12 = vpop.f32.mrf.mxu1  ;;  %2494 = vst.msk [vmem:[#allocation3 + $0x80] sm:$0xff] %vm2477_vm4, %v2440_v29  ;;  %v1841_v10 = vadd.f32 %v1645_v22, %v9214_v35 }
 0x1f6   : > { %v7723_v40 = vpop.f32.mrf.mxu0 }
 0x1f7   : > { %v7890_v18 = vpop.f32.mrf.mxu1  ;;  %v2441_v44 = vadd.f32 %v2245_v51, %v1841_v10 }
 0x1f8   : > { %v1650_v49 = vpop.f32.mrf.mxu0 }
 0x1f9   : > { %v2260_v55 = vpop.f32.mrf.mxu1  ;;  %2495 = vst.msk [vmem:[#allocation3 + $0x88] sm:$0xff] %vm2477_vm4, %v2441_v44  ;;  %v1842_v62 = vadd.f32 %v1650_v49, %v9222_v45 }
 0x1fa   : > { %v7726_v47 = vpop.f32.mrf.mxu0 }
 0x1fb   : > { %v7893_v26 = vpop.f32.mrf.mxu1  ;;  %v2442_v48 = vadd.f32 %v2250_v25, %v1842_v62 }
 0x1fc   : > { %v1655_v17 = vpop.f32.mrf.mxu0 }
 0x1fd   : > { %v2265_v20 = vpop.f32.mrf.mxu1  ;;  %2496 = vst.msk [vmem:[#allocation3 + $0x90] sm:$0xff] %vm2477_vm4, %v2442_v48  ;;  %v1843_v46 = vadd.f32 %v1655_v17, %v9230_v54 }
 0x1fe   : > { %v7729_v58 = vpop.f32.mrf.mxu0 }
 0x1ff   : > { %v7896_v35 = vpop.f32.mrf.mxu1  ;;  %v2443_v61 = vadd.f32 %v2255_v12, %v1843_v46 }
 0x200   : > { %v1660_v56 = vpop.f32.mrf.mxu0 }
 0x201   : > { %v2270_v37 = vpop.f32.mrf.mxu1  ;;  %2497 = vst.msk [vmem:[#allocation3 + $0x98] sm:$0xff] %vm2477_vm4, %v2443_v61  ;;  %v1844_v24 = vadd.f32 %v1660_v56, %v9238_v63 }
 0x202   : > { %v7732_v51 = vpop.f32.mrf.mxu0 }
 0x203   : > { %v7899_v45 = vpop.f32.mrf.mxu1  ;;  %v2444_v36 = vadd.f32 %v2260_v55, %v1844_v24 }
 0x204   : > { %v1665_v34 = vpop.f32.mrf.mxu0 }
 0x205   : > { %v2275_v0 = vpop.f32.mrf.mxu1  ;;  %2498 = vst.msk [vmem:[#allocation3 + $0xa0] sm:$0xff] %vm2477_vm4, %v2444_v36  ;;  %v1845_v3 = vadd.f32 %v1665_v34, %v9246_v11 }
 0x206   : > { %v7735_v6 = vpop.f32.mrf.mxu0 }
 0x207   : > { %v7902_v54 = vpop.f32.mrf.mxu1  ;;  %v2445_v25 = vadd.f32 %v2265_v20, %v1845_v3 }
 0x208   : > { %v1670_v32 = vpop.f32.mrf.mxu0 }
 0x209   : > { %v2280_v19 = vpop.f32.mrf.mxu1  ;;  %2499 = vst.msk [vmem:[#allocation3 + $0xa8] sm:$0xff] %vm2477_vm4, %v2445_v25  ;;  %v1846_v9 = vadd.f32 %v1670_v32, %v9256_v21 }
 0x20a   : > { %v7738_v29 = vpop.f32.mrf.mxu0 }
 0x20b   : > { %v7905_v63 = vpop.f32.mrf.mxu1  ;;  %v2446_v22 = vadd.f32 %v2270_v37, %v1846_v9 }
 0x20c   : > { %v1675_v12 = vpop.f32.mrf.mxu0 }
 0x20d   : > { %v2285_v10 = vpop.f32.mrf.mxu1  ;;  %2500 = vst.msk [vmem:[#allocation3 + $0xb0] sm:$0xff] %vm2477_vm4, %v2446_v22  ;;  %v1847_v40 = vadd.f32 %v1675_v12, %v9266_v33 }
 0x20e   : > { %v7741_v18 = vpop.f32.mrf.mxu0 }
 0x20f   : > { %v7908_v11 = vpop.f32.mrf.mxu1  ;;  %v2447_v44 = vadd.f32 %v2275_v0, %v1847_v40 }
 0x210   : > { %v1680_v49 = vpop.f32.mrf.mxu0 }
 0x211   : > { %v2290_v55 = vpop.f32.mrf.mxu1  ;;  %2501 = vst.msk [vmem:[#allocation3 + $0xb8] sm:$0xff] %vm2477_vm4, %v2447_v44  ;;  %v1848_v62 = vadd.f32 %v1680_v49, %v9274_v43  ;;  %v2885_v49 = vld [vmem:[%s10934_s4 + $0x18] sm:$0xff] }
 0x212   : > { %v7744_v47 = vpop.f32.mrf.mxu0  ;;  %6536 = vmatprep.mubr.msk.f32.mxu1 %vm2941_vm5, %v2885_v49 }
 0x213   : > { %v7911_v21 = vpop.f32.mrf.mxu1  ;;  %v2448_v26 = vadd.f32 %v2280_v19, %v1848_v62  ;;  %v2883_v19 = vld [vmem:[%s10934_s4 + $0x8] sm:$0xff] }
 0x214   : > { %v1685_v48 = vpop.f32.mrf.mxu0  ;;  %3049 = vmatprep.mubr.f32.mxu0 %v2883_v19  ;;  %v2747_v19 = vld [vmem:[#allocation3 + $0x8e] sm:$0xff] }
 0x215   : > { %v2295_v17 = vpop.f32.mrf.mxu1  ;;  %2502 = vst.msk [vmem:[#allocation3 + $0xc0] sm:$0xff] %vm2477_vm4, %v2448_v26  ;;  %v1849_v20 = vadd.f32 %v1685_v48, %v9283_v57 }
 0x216   : > { %v7747_v46 = vpop.f32.mrf.mxu0 }
 0x217   : > { %v7914_v33 = vpop.f32.mrf.mxu1  ;;  %v2449_v58 = vadd.f32 %v2285_v10, %v1849_v20 }
 0x218   : > { %v1690_v35 = vpop.f32.mrf.mxu0 }
 0x219   : > { %v2300_v61 = vpop.f32.mrf.mxu1  ;;  %2503 = vst.msk [vmem:[#allocation3 + $0xc8] sm:$0xff] %vm2477_vm4, %v2449_v58  ;;  %v1850_v56 = vadd.f32 %v1690_v35, %v9291_v5 }
 0x21a   : > { %v7750_v37 = vpop.f32.mrf.mxu0 }
 0x21b   : > { %v7917_v43 = vpop.f32.mrf.mxu1  ;;  %v2450_v24 = vadd.f32 %v2290_v55, %v1850_v56 }
 0x21c   : > { %v1695_v51 = vpop.f32.mrf.mxu0 }
 0x21d   : > { %v2305_v45 = vpop.f32.mrf.mxu1  ;;  %2504 = vst.msk [vmem:[#allocation3 + $0xd0] sm:$0xff] %vm2477_vm4, %v2450_v24  ;;  %v1851_v36 = vadd.f32 %v1695_v51, %v9299_v15 }
 0x21e   : > { %v7753_v34 = vpop.f32.mrf.mxu0 }
 0x21f   : > { %v7920_v57 = vpop.f32.mrf.mxu1  ;;  %v2451_v0 = vadd.f32 %v2295_v17, %v1851_v36 }
 0x220   : > { %v1700_v3 = vpop.f32.mrf.mxu0 }
 0x221   : > { %v2310_v6 = vpop.f32.mrf.mxu1  ;;  %2505 = vst.msk [vmem:[#allocation3 + $0xd8] sm:$0xff] %vm2477_vm4, %v2451_v0  ;;  %v1852_v54 = vadd.f32 %v1700_v3, %v9307_v27 }
 0x222   : > { %v7756_v25 = vpop.f32.mrf.mxu0 }
 0x223   : > { %v7923_v5 = vpop.f32.mrf.mxu1  ;;  %v2452_v32 = vadd.f32 %v2300_v61, %v1852_v54 }
 0x224   : > { %v1705_v9 = vpop.f32.mrf.mxu0 }
 0x225   : > { %v2315_v29 = vpop.f32.mrf.mxu1  ;;  %2506 = vst.msk [vmem:[#allocation3 + $0xe0] sm:$0xff] %vm2477_vm4, %v2452_v32  ;;  %v1853_v15 = vadd.f32 %v1705_v9, %v9315_v39  ;;  %v2697_v32 = vld [vmem:[#allocation3 + $0x8d] sm:$0xff]  ;;  %v9613_v9 = vld [vmem:[#allocation3 + $0x85] sm:$0xff] }
 0x226   : > { %v7759_v63 = vpop.f32.mrf.mxu0 }
 0x227   : > { %v7926_v22 = vpop.f32.mrf.mxu1  ;;  %v2453_v12 = vadd.f32 %v2305_v45, %v1853_v15 }
 0x228   : > { %v1710_v10 = vpop.f32.mrf.mxu0 }
 0x229   : > { %v2320_v40 = vpop.f32.mrf.mxu1  ;;  %2507 = vst.msk [vmem:[#allocation3 + $0xe8] sm:$0xff] %vm2477_vm4, %v2453_v12  ;;  %v1854_v27 = vadd.f32 %v1710_v10, %v9323_v52 }
 0x22a   : > { %v7762_v18 = vpop.f32.mrf.mxu0 }
 0x22b   : > { %v7929_v11 = vpop.f32.mrf.mxu1  ;;  %v2454_v44 = vadd.f32 %v2310_v6, %v1854_v27  ;;  %v2547_v27 = vld [vmem:[#allocation3 + $0x78] sm:$0xff] }
 0x22c   : > { %v1715_v55 = vpop.f32.mrf.mxu0  ;;  %v2596_v11 = vld [vmem:[#allocation3 + $0x71] sm:$0xff] }
 0x22d   : > { %v2325_v62 = vpop.f32.mrf.mxu1  ;;  %2508 = vst.msk [vmem:[#allocation3 + $0xf0] sm:$0xff] %vm2477_vm4, %v2454_v44  ;;  %v1855_v39 = vadd.f32 %v1715_v55, %v9331_v2 }
 0x22e   : > { %v7765_v47 = vpop.f32.mrf.mxu0 }
 0x22f   : > { %v7932_v21 = vpop.f32.mrf.mxu1  ;;  %v2455_v26 = vadd.f32 %v2315_v29, %v1855_v39  ;;  %v9615_v29 = vld [vmem:[#allocation3 + $0x86] sm:$0xff] }
 0x230   : > { %v1720_v52 = vpop.f32.mrf.mxu0 }
 0x231   : > { %v2330_v48 = vpop.f32.mrf.mxu1  ;;  %2509 = vst.msk [vmem:[#allocation3 + $0xf8] sm:$0xff] %vm2477_vm4, %v2455_v26  ;;  %v1856_v17 = vadd.f32 %v1720_v52, %v9339_v14 }
 0x232   : > { %v7768_v20 = vpop.f32.mrf.mxu0 }
 0x233   : > { %v7935_v46 = vpop.f32.mrf.mxu1  ;;  %v2456_v33 = vadd.f32 %v2320_v40, %v1856_v17  ;;  %v2546_v20 = vld [vmem:[#allocation3 + $0x70] sm:$0xff] }
 0x234   : > { %v1725_v58 = vpop.f32.mrf.mxu0  ;;  %v2595_v46 = vld [vmem:[#allocation3 + $0x69] sm:$0xff] }
 0x235   : > { %v2335_v35 = vpop.f32.mrf.mxu1  ;;  %2510 = vst.msk [vmem:[#allocation3 + $0x100] sm:$0xff] %vm2477_vm4, %v2456_v33  ;;  %v1857_v61 = vadd.f32 %v1725_v58, %v9347_v28  ;;  %v2695_v33 = vld [vmem:[#allocation3 + $0x7d] sm:$0xff] }
 0x236   : > { %v7771_v56 = vpop.f32.mrf.mxu0  ;;  %v2745_v58 = vld [vmem:[#allocation3 + $0x7e] sm:$0xff] }
 0x237   : > { %v7938_v2 = vpop.f32.mrf.mxu1  ;;  %v2457_v37 = vadd.f32 %v2325_v62, %v1857_v61  ;;  %v2797_v62 = vmax.f32 %v2697_v32, %v2747_v19  ;;  %v2796_v56 = vmax.f32 %v9613_v9, %v9615_v29  ;;  %v2610_v32 = vld [vmem:[#allocation3 + $0xe1] sm:$0xff]  ;;  %v9632_v9 = vld [vmem:[#allocation3 + $0xed] sm:$0xff] }
 0x238   : > { %v1730_v43 = vpop.f32.mrf.mxu0  ;;  %v2563_v40 = vld [vmem:[#allocation3 + $0xf8] sm:$0xff]  ;;  %v2611_v2 = vld [vmem:[#allocation3 + $0xe9] sm:$0xff] }
 0x239   : > { %v2340_v24 = vpop.f32.mrf.mxu1  ;;  %2511 = vst.msk [vmem:[#allocation3 + $0x108] sm:$0xff] %vm2477_vm4, %v2457_v37  ;;  %v1858_v51 = vadd.f32 %v1730_v43, %v9355_v42  ;;  %v2597_v42 = vld [vmem:[#allocation3 + $0x79] sm:$0xff]  ;;  %v2612_v18 = vld [vmem:[#allocation3 + $0xf1] sm:$0xff] }
 0x23a   : > { %v7774_v45 = vpop.f32.mrf.mxu0  ;;  %v2647_v61 = vmax.f32 %v2547_v27, %v2597_v42  ;;  %v2710_v43 = vld [vmem:[#allocation3 + $0xf5] sm:$0xff]  ;;  %v2795_v42 = vmax.f32 %v2695_v33, %v2745_v58  ;;  %v9654_v33 = vld [vmem:[#allocation3 + $0x66] sm:$0xff] }
 0x23b   : > { %v7941_v14 = vpop.f32.mrf.mxu1  ;;  %v2458_v36 = vadd.f32 %v2330_v48, %v1858_v51  ;;  %v2562_v48 = vld [vmem:[#allocation3 + $0xf0] sm:$0xff] }
 0x23c   : > { %v1735_v34 = vpop.f32.mrf.mxu0  ;;  %v2613_v63 = vld [vmem:[#allocation3 + $0xf9] sm:$0xff]  ;;  %v2561_v14 = vld [vmem:[#allocation3 + $0xe8] sm:$0xff] }
 0x23d   : > { %v2345_v57 = vpop.f32.mrf.mxu1  ;;  %2512 = vst.msk [vmem:[#allocation3 + $0x110] sm:$0xff] %vm2477_vm4, %v2458_v36  ;;  %v1859_v0 = vadd.f32 %v1735_v34, %v9363_v59  ;;  %v9617_v44 = vld [vmem:[#allocation3 + $0xfd] sm:$0xff]  ;;  %v2663_v26 = vmax.f32 %v2563_v40, %v2613_v63  ;;  %v2545_v34 = vld [vmem:[#allocation3 + $0x68] sm:$0xff]  ;;  %v2661_v63 = vmax.f32 %v2561_v14, %v2611_v2 }
 0x23e   : > { %v7777_v3 = vpop.f32.mrf.mxu0  ;;  %v2761_v47 = vld [vmem:[#allocation3 + $0xfe] sm:$0xff]  ;;  %v9640_v40 = vld [vmem:[#allocation3 + $0x6d] sm:$0xff] }
 0x23f   : > { %v7944_v28 = vpop.f32.mrf.mxu1  ;;  %v2459_v6 = vadd.f32 %v2335_v35, %v1859_v0  ;;  %v2811_v36 = vmax.f32 %v9617_v44, %v2761_v47  ;;  %v9626_v0 = vld [vmem:[#allocation3 + $0x61] sm:$0xff]  ;;  %v9628_v3 = vld [vmem:[#allocation3 + $0x75] sm:$0xff]  ;;  %v2645_v44 = vmax.f32 %v2545_v34, %v2595_v46  ;;  %v9668_v34 = vld [vmem:[#allocation3 + $0x49] sm:$0xff] }
 0x240   : > { %v1740_v54 = vpop.f32.mrf.mxu0  ;;  %v2712_v22 = vld [vmem:[#allocation3 + $0x105] sm:$0xff]  ;;  %v2744_v28 = vld [vmem:[#allocation3 + $0x76] sm:$0xff]  ;;  %v2743_v27 = vld [vmem:[#allocation3 + $0x6e] sm:$0xff] }
 0x241   : > { %v9609_v25 = vpop.f32.mrf.mxu1  ;;  %2513 = vst.msk [vmem:[#allocation3 + $0x118] sm:$0xff] %vm2477_vm4, %v2459_v6  ;;  %v1860_v5 = vadd.f32 %v1740_v54, %v9371_v8  ;;  %v2762_v12 = vld [vmem:[#allocation3 + $0x106] sm:$0xff]  ;;  %v2847_v54 = vmax.f32 %v2647_v61, %v2797_v62 }
 0x242   : > { %v7780_v15 = vpop.f32.mrf.mxu0  ;;  %v2812_v17 = vmax.f32 %v2712_v22, %v2762_v12  ;;  %v2544_v12 = vld [vmem:[#allocation3 + $0x60] sm:$0xff] }
 0x243   : > { %v7947_v59 = vpop.f32.mrf.mxu1  ;;  %v2460_v10 = vadd.f32 %v2340_v24, %v1860_v5  ;;  %v2760_v24 = vld [vmem:[#allocation3 + $0xf6] sm:$0xff]  ;;  %v2646_v5 = vmax.f32 %v2546_v20, %v2596_v11  ;;  %v9645_v62 = vld [vmem:[#allocation3 + $0xe6] sm:$0xff]  ;;  %v2644_v61 = vmax.f32 %v2544_v12, %v9626_v0 }
 0x244   : > { %v1745_v8 = vpop.f32.mrf.mxu0  ;;  %v2713_v49 = vld [vmem:[#allocation3 + $0x10d] sm:$0xff]  ;;  %v2560_v59 = vld [vmem:[#allocation3 + $0xe0] sm:$0xff]  ;;  %v2810_v22 = vmax.f32 %v2710_v43, %v2760_v24 }
 0x245   : > { %v2763_v55 = vld [vmem:[#allocation3 + $0x10e] sm:$0xff]  ;;  %v9619_v39 = vpop.f32.mrf.mxu1  ;;  %2514 = vst.msk [vmem:[#allocation3 + $0x120] sm:$0xff] %vm2477_vm4, %v2460_v10  ;;  %v1861_v21 = vadd.f32 %v1745_v8, %v9379_v23  ;;  %v2662_v23 = vmax.f32 %v2562_v48, %v2612_v18  ;;  %v9638_v10 = vld [vmem:[#allocation3 + $0x59] sm:$0xff]  ;;  %v2846_v11 = vmax.f32 %v2646_v5, %v2796_v56  ;;  %v2794_v8 = vmax.f32 %v9628_v3, %v2744_v28  ;;  %v9652_v46 = vld [vmem:[#allocation3 + $0x65] sm:$0xff] }
 0x246   : > { %v2813_v52 = vmax.f32 %v2713_v49, %v2763_v55  ;;  %v7783_v35 = vpop.f32.mrf.mxu0  ;;  %v2609_v49 = vld [vmem:[#allocation3 + $0xd9] sm:$0xff]  ;;  %v9650_v20 = vld [vmem:[#allocation3 + $0x51] sm:$0xff]  ;;  %v2607_v5 = vld [vmem:[#allocation3 + $0xc9] sm:$0xff] }
 0x247   : > { %v7950_v37 = vpop.f32.mrf.mxu1  ;;  %v2461_v51 = vadd.f32 %v2345_v57, %v1861_v21  ;;  %v9634_v57 = vld [vmem:[#allocation3 + $0xee] sm:$0xff]  ;;  %v2862_v15 = vmax.f32 %v2662_v23, %v2812_v17  ;;  %v2861_v21 = vmax.f32 %v2661_v63, %v2811_v36  ;;  %v2543_v17 = vld [vmem:[#allocation3 + $0x58] sm:$0xff]  ;;  %v2845_v35 = vmax.f32 %v2645_v44, %v2795_v42  ;;  %v9682_v12 = vld [vmem:[#allocation3 + $0x41] sm:$0xff] }
 0x248   : > { %v2863_v45 = vmax.f32 %v2663_v26, %v2813_v52  ;;  %v1750_v6 = vpop.f32.mrf.mxu0  ;;  %v2660_v26 = vmax.f32 %v2560_v59, %v2610_v32  ;;  %v2559_v52 = vld [vmem:[#allocation3 + $0xd8] sm:$0xff]  ;;  %v2809_v48 = vmax.f32 %v9632_v9, %v9634_v57  ;;  %v2558_v23 = vld [vmem:[#allocation3 + $0xd0] sm:$0xff]  ;;  %v2557_v63 = vld [vmem:[#allocation3 + $0xc8] sm:$0xff] }
 0x249   : > { %v9630_v19 = vpop.f32.mrf.mxu1  ;;  %2515 = vst.msk [vmem:[#allocation3 + $0x128] sm:$0xff] %vm2477_vm4, %v2461_v51  ;;  %v1862_v29 = vadd.f32 %v1750_v6, %v9387_v41  ;;  %v9643_v41 = vld [vmem:[#allocation3 + $0xe5] sm:$0xff]  ;;  %v2608_v56 = vld [vmem:[#allocation3 + $0xd1] sm:$0xff]  ;;  %v9660_v37 = vld [vmem:[#allocation3 + $0xdd] sm:$0xff]  ;;  %v2844_v6 = vmax.f32 %v2644_v61, %v2794_v8 }
 0x24a   : > { %7004 = vmatprep.subr.mxu0 %v2863_v45  ;;  %v7786_v18 = vpop.f32.mrf.mxu0  ;;  %v9662_v43 = vld [vmem:[#allocation3 + $0xde] sm:$0xff]  ;;  %v2860_v51 = vmax.f32 %v2660_v26, %v2810_v22  ;;  %v2659_v45 = vmax.f32 %v2559_v52, %v2609_v49  ;;  %v2808_v14 = vmax.f32 %v9643_v41, %v9645_v62  ;;  %v2542_v36 = vld [vmem:[#allocation3 + $0x50] sm:$0xff]  ;;  %v2541_v22 = vld [vmem:[#allocation3 + $0x48] sm:$0xff] }
 0x24b   : > { %7005 = vmatpush3.msra.mxu0 %v2847_v54  ;;  %v7953_v55 = vpop.f32.mrf.mxu1  ;;  %v2462_v47 = vadd.f32 %v9609_v25, %v1862_v29  ;;  %v2793_v25 = vmax.f32 %v9640_v40, %v2743_v27  ;;  %v9670_v0 = vld [vmem:[#allocation3 + $0x5d] sm:$0xff]  ;;  %v2643_v54 = vmax.f32 %v2543_v17, %v9638_v10  ;;  %v9675_v32 = vld [vmem:[#allocation3 + $0xd5] sm:$0xff]  ;;  %v2807_v59 = vmax.f32 %v9660_v37, %v9662_v43  ;;  %v9692_v49 = vld [vmem:[#allocation3 + $0xcd] sm:$0xff] }
 0x24c   : > { %7006 = vmatprep.subr.mxu0 %v2862_v15  ;;  %v1755_v58 = vpop.f32.mrf.mxu0  ;;  %v2741_v3 = vld [vmem:[#allocation3 + $0x5e] sm:$0xff]  ;;  %v9677_v9 = vld [vmem:[#allocation3 + $0xd6] sm:$0xff]  ;;  %v2859_v29 = vmax.f32 %v2659_v45, %v2809_v48  ;;  %v2658_v15 = vmax.f32 %v2558_v23, %v2608_v56  ;;  %v9694_v55 = vld [vmem:[#allocation3 + $0xce] sm:$0xff] }
 0x24d   : > { %7007 = vmatpush3.msra.mxu0 %v2846_v11  ;;  %v9658_v2 = vpop.f32.mrf.mxu1  ;;  %2516 = vst.msk [vmem:[#allocation3 + $0x130] sm:$0xff] %vm2477_vm4, %v2462_v47  ;;  %v1863_v24 = vadd.f32 %v1755_v58, %v9395_v60  ;;  %v2792_v60 = vmax.f32 %v9652_v46, %v9654_v33  ;;  %v9684_v10 = vld [vmem:[#allocation3 + $0x55] sm:$0xff]  ;;  %v2843_v18 = vmax.f32 %v2643_v54, %v2793_v25  ;;  %v2606_v44 = vld [vmem:[#allocation3 + $0xc1] sm:$0xff]  ;;  %v9702_v17 = vld [vmem:[#allocation3 + $0x4d] sm:$0xff] }
 0x24e   : > { %7008 = vmatprep.subr.mxu0 %v2861_v21  ;;  %v7789_v28 = vpop.f32.mrf.mxu0  ;;  %v9686_v40 = vld [vmem:[#allocation3 + $0x56] sm:$0xff]  ;;  %v2642_v11 = vmax.f32 %v2542_v36, %v9650_v20  ;;  %v2858_v62 = vmax.f32 %v2658_v15, %v2808_v14  ;;  %v2657_v47 = vmax.f32 %v2557_v63, %v2607_v5  ;;  %v2556_v21 = vld [vmem:[#allocation3 + $0xc0] sm:$0xff]  ;;  %v2806_v26 = vmax.f32 %v9675_v32, %v9677_v9  ;;  %v2739_v20 = vld [vmem:[#allocation3 + $0x4e] sm:$0xff] }
 0x24f   : > { %7009 = vmatpush3.msra.mxu0 %v2845_v35  ;;  %v7956_v42 = vpop.f32.mrf.mxu1  ;;  %v2463_v57 = vadd.f32 %v9619_v39, %v1863_v24  ;;  %v2791_v39 = vmax.f32 %v9670_v0, %v2741_v3  ;;  %v2540_v52 = vld [vmem:[#allocation3 + $0x40] sm:$0xff]  ;;  %v2641_v58 = vmax.f32 %v2541_v22, %v9668_v34  ;;  %v2656_v24 = vmax.f32 %v2556_v21, %v2606_v44  ;;  %v2539_v23 = vld [vmem:[#allocation3 + $0x38] sm:$0xff]  ;;  %v2538_v15 = vld [vmem:[#allocation3 + $0x30] sm:$0xff] }
 0x250   : > { %7010 = vmatprep.subr.mxu0 %v2860_v51  ;;  %v1760_v27 = vpop.f32.mrf.mxu0  ;;  %v9700_v48 = vld [vmem:[#allocation3 + $0x39] sm:$0xff]  ;;  %v2842_v33 = vmax.f32 %v2642_v11, %v2792_v60  ;;  %v9707_v25 = vld [vmem:[#allocation3 + $0xc5] sm:$0xff]  ;;  %v2857_v43 = vmax.f32 %v2657_v47, %v2807_v59  ;;  %v2805_v45 = vmax.f32 %v9692_v49, %v9694_v55  ;;  %v9714_v14 = vld [vmem:[#allocation3 + $0x31] sm:$0xff]  ;;  %v2640_v28 = vmax.f32 %v2540_v52, %v9682_v12 }
 0x251   : > { %7011 = vmatpush3.msra.mxu0 %v2844_v6  ;;  %v9690_v8 = vpop.f32.mrf.mxu1  ;;  %2517 = vst.msk [vmem:[#allocation3 + $0x138] sm:$0xff] %vm2477_vm4, %v2463_v57  ;;  %v1864_v41 = vadd.f32 %v1760_v27, %v9403_v13  ;;  %v2790_v13 = vmax.f32 %v9684_v10, %v9686_v40  ;;  %v2605_v35 = vld [vmem:[#allocation3 + $0xb9] sm:$0xff]  ;;  %v9709_v56 = vld [vmem:[#allocation3 + $0xc6] sm:$0xff]  ;;  %v2841_v3 = vmax.f32 %v2641_v58, %v2791_v39  ;;  %v2604_v6 = vld [vmem:[#allocation3 + $0xb1] sm:$0xff] }
 0x252   : > { %7012 = vmatprep.subr.mxu0 %v2859_v29  ;;  %v7792_v46 = vpop.f32.mrf.mxu0  ;;  %v2555_v51 = vld [vmem:[#allocation3 + $0xb8] sm:$0xff]  ;;  %v9716_v36 = vld [vmem:[#allocation3 + $0x45] sm:$0xff]  ;;  %v2856_v32 = vmax.f32 %v2656_v24, %v2806_v26  ;;  %v2554_v57 = vld [vmem:[#allocation3 + $0xb0] sm:$0xff]  ;;  %v2804_v29 = vmax.f32 %v9707_v25, %v9709_v56  ;;  %v2639_v40 = vmax.f32 %v2539_v23, %v9700_v48 }
 0x253   : > { %7013 = vmatpush3.msra.mxu0 %v2843_v18  ;;  %v7959_v61 = vpop.f32.mrf.mxu1  ;;  %v2464_v37 = vadd.f32 %v9630_v19, %v1864_v41  ;;  %v9718_v34 = vld [vmem:[#allocation3 + $0x46] sm:$0xff]  ;;  %v2789_v19 = vmax.f32 %v9702_v17, %v2739_v20  ;;  %v9724_v60 = vld [vmem:[#allocation3 + $0xbd] sm:$0xff]  ;;  %v2655_v9 = vmax.f32 %v2555_v51, %v2605_v35  ;;  %v2840_v10 = vmax.f32 %v2640_v28, %v2790_v13  ;;  %v9739_v11 = vld [vmem:[#allocation3 + $0xb5] sm:$0xff] }
 0x254   : > { %7014 = vmatprep.subr.mxu0 %v2858_v62  ;;  %v1765_v0 = vpop.f32.mrf.mxu0  ;;  %v9726_v5 = vld [vmem:[#allocation3 + $0xbe] sm:$0xff]  ;;  %v9732_v63 = vld [vmem:[#allocation3 + $0x29] sm:$0xff]  ;;  %v9741_v39 = vld [vmem:[#allocation3 + $0xb6] sm:$0xff]  ;;  %v2654_v55 = vmax.f32 %v2554_v57, %v2604_v6  ;;  %v2638_v20 = vmax.f32 %v2538_v15, %v9714_v14 }
 0x255   : > { %7015 = vmatpush3.msra.mxu0 %v2842_v33  ;;  %v9722_v54 = vpop.f32.mrf.mxu1  ;;  %2518 = vst.msk [vmem:[#allocation3 + $0x140] sm:$0xff] %vm2477_vm4, %v2464_v37  ;;  %v1865_v42 = vadd.f32 %v1765_v0, %v9411_v31  ;;  %v9734_v59 = vld [vmem:[#allocation3 + $0x3d] sm:$0xff]  ;;  %v2788_v31 = vmax.f32 %v9716_v36, %v9718_v34  ;;  %v2603_v27 = vld [vmem:[#allocation3 + $0xa9] sm:$0xff]  ;;  %v2855_v49 = vmax.f32 %v2655_v9, %v2805_v45  ;;  %v9748_v26 = vld [vmem:[#allocation3 + $0x35] sm:$0xff] }
 0x256   : > { %7016 = vmatprep.subr.mxu0 %v2857_v43  ;;  %v2737_v22 = vld [vmem:[#allocation3 + $0x3e] sm:$0xff]  ;;  %v7795_v12 = vpop.f32.mrf.mxu0  ;;  %v2553_v41 = vld [vmem:[#allocation3 + $0xa8] sm:$0xff]  ;;  %v2803_v62 = vmax.f32 %v9724_v60, %v9726_v5  ;;  %v2736_v52 = vld [vmem:[#allocation3 + $0x36] sm:$0xff]  ;;  %v2839_v17 = vmax.f32 %v2639_v40, %v2789_v19  ;;  %v2854_v61 = vmax.f32 %v2654_v55, %v2804_v29  ;;  %v2802_v37 = vmax.f32 %v9739_v11, %v9741_v39 }
 0x257   : > { %7017 = vmatpush3.msra.mxu0 %v2841_v3  ;;  %v7962_v18 = vpop.f32.mrf.mxu1  ;;  %v2465_v44 = vadd.f32 %v9658_v2, %v1865_v42  ;;  %v2537_v47 = vld [vmem:[#allocation3 + $0x28] sm:$0xff]  ;;  %v2787_v2 = vmax.f32 %v9734_v59, %v2737_v22  ;;  %v2653_v25 = vmax.f32 %v2553_v41, %v2603_v27  ;;  %v2552_v56 = vld [vmem:[#allocation3 + $0xa0] sm:$0xff]  ;;  %v2838_v14 = vmax.f32 %v2638_v20, %v2788_v31  ;;  %v2551_v5 = vld [vmem:[#allocation3 + $0x98] sm:$0xff] }
 0x258   : > { %7018 = vmatprep.subr.mxu0 %v2856_v32  ;;  %v9746_v21 = vld [vmem:[#allocation3 + $0x21] sm:$0xff]  ;;  %v1770_v48 = vpop.f32.mrf.mxu0  ;;  %v9754_v58 = vld [vmem:[#allocation3 + $0xad] sm:$0xff]  ;;  %v2585_v24 = vld [vmem:[#allocation3 + $0x19] sm:$0xff]  ;;  %v2637_v36 = vmax.f32 %v2537_v47, %v9732_v63  ;;  %v2786_v34 = vmax.f32 %v9748_v26, %v2736_v52 }
 0x259   : > { %7019 = vmatpush3.msra.mxu0 %v2840_v10  ;;  %v2602_v46 = vld [vmem:[#allocation3 + $0xa1] sm:$0xff]  ;;  %v9752_v33 = vpop.f32.mrf.mxu1  ;;  %v2751_v13 = vld [vmem:[#allocation3 + $0xae] sm:$0xff]  ;;  %2519 = vst.msk [vmem:[#allocation3 + $0x148] sm:$0xff] %vm2477_vm4, %v2465_v44  ;;  %v1866_v35 = vadd.f32 %v1770_v48, %v9419_v50  ;;  %v2601_v0 = vld [vmem:[#allocation3 + $0x99] sm:$0xff]  ;;  %v2853_v6 = vmax.f32 %v2653_v25, %v2803_v62 }
 0x25a   : > { %7020 = vmatprep.subr.mxu0 %v2855_v49  ;;  %v2536_v43 = vld [vmem:[#allocation3 + $0x20] sm:$0xff]  ;;  %v2685_v51 = vld [vmem:[#allocation3 + $0x2d] sm:$0xff]  ;;  %v7798_v23 = vpop.f32.mrf.mxu0  ;;  %v2652_v60 = vmax.f32 %v2552_v56, %v2602_v46  ;;  %v2801_v42 = vmax.f32 %v9754_v58, %v2751_v13  ;;  %v2535_v32 = vld [vmem:[#allocation3 + $0x18] sm:$0xff]  ;;  %v2837_v63 = vmax.f32 %v2637_v36, %v2787_v2  ;;  %v2651_v18 = vmax.f32 %v2551_v5, %v2601_v0 }
 0x25b   : > { %v2735_v45 = vld [vmem:[#allocation3 + $0x2e] sm:$0xff]  ;;  %7021 = vmatpush3.msra.mxu0 %v2839_v17  ;;  %v7965_v50 = vpop.f32.mrf.mxu1  ;;  %v2700_v3 = vld [vmem:[#allocation3 + $0xa5] sm:$0xff]  ;;  %v2466_v19 = vadd.f32 %v9690_v8, %v1866_v35  ;;  %v2636_v59 = vmax.f32 %v2536_v43, %v9746_v21  ;;  %v2699_v8 = vld [vmem:[#allocation3 + $0x9d] sm:$0xff]  ;;  %v2635_v47 = vmax.f32 %v2535_v32, %v2585_v24 }
 0x25c   : > { %v2750_v28 = vld [vmem:[#allocation3 + $0xa6] sm:$0xff]  ;;  %7022 = vmatprep.subr.mxu0 %v2854_v61  ;;  %v2584_v9 = vld [vmem:[#allocation3 + $0x11] sm:$0xff]  ;;  %v1775_v15 = vpop.f32.mrf.mxu0  ;;  %v2785_v22 = vmax.f32 %v2685_v51, %v2735_v45  ;;  %v2749_v40 = vld [vmem:[#allocation3 + $0x9e] sm:$0xff]  ;;  %v2852_v27 = vmax.f32 %v2652_v60, %v2802_v37 }
 0x25d   : > { %v2684_v57 = vld [vmem:[#allocation3 + $0x25] sm:$0xff]  ;;  %7023 = vmatpush3.msra.mxu0 %v2838_v14  ;;  %v2600_v12 = vld [vmem:[#allocation3 + $0x91] sm:$0xff]  ;;  %v9765_v10 = vpop.f32.mrf.mxu1  ;;  %2520 = vst.msk [vmem:[#allocation3 + $0x150] sm:$0xff] %vm2477_vm4, %v2466_v19  ;;  %v1867_v31 = vadd.f32 %v1775_v15, %v9427_v7  ;;  %v2800_v39 = vmax.f32 %v2700_v3, %v2750_v28  ;;  %v2683_v49 = vld [vmem:[#allocation3 + $0x1d] sm:$0xff]  ;;  %v2836_v62 = vmax.f32 %v2636_v59, %v2786_v34 }
 0x25e   : > { %v2734_v29 = vld [vmem:[#allocation3 + $0x26] sm:$0xff]  ;;  %7024 = vmatprep.subr.mxu0 %v2853_v6  ;;  %v2550_v11 = vld [vmem:[#allocation3 + $0x90] sm:$0xff]  ;;  %v2733_v55 = vld [vmem:[#allocation3 + $0x1e] sm:$0xff]  ;;  %v7801_v41 = vpop.f32.mrf.mxu0  ;;  %v2851_v7 = vmax.f32 %v2651_v18, %v2801_v42  ;;  %v2799_v46 = vmax.f32 %v2699_v8, %v2749_v40  ;;  %v2835_v25 = vmax.f32 %v2635_v47, %v2785_v22 }
 0x25f   : > { %v2534_v44 = vld [vmem:[#allocation3 + $0x10] sm:$0xff]  ;;  %7025 = vmatpush3.msra.mxu0 %v2837_v63  ;;  %v2784_v21 = vmax.f32 %v2684_v57, %v2734_v29  ;;  %v7968_v52 = vpop.f32.mrf.mxu1  ;;  %v2467_v20 = vadd.f32 %v9722_v54, %v1867_v31  ;;  %v2650_v2 = vmax.f32 %v2550_v11, %v2600_v12  ;;  %v2549_v37 = vld [vmem:[#allocation3 + $0x88] sm:$0xff]  ;;  %v2783_v43 = vmax.f32 %v2683_v49, %v2733_v55  ;;  %v2548_v28 = vld [vmem:[#allocation3 + $0x80] sm:$0xff] }
 0x260   : > { %v2599_v26 = vld [vmem:[#allocation3 + $0x89] sm:$0xff]  ;;  %v2698_v48 = vld [vmem:[#allocation3 + $0x95] sm:$0xff]  ;;  %7026 = vmatprep.subr.mxu0 %v2852_v27  ;;  %v1780_v61 = vpop.f32.mrf.mxu0  ;;  %v2634_v56 = vmax.f32 %v2534_v44, %v2584_v9  ;;  %v2598_v24 = vld [vmem:[#allocation3 + $0x81] sm:$0xff] }
 0x261   : > { %v2748_v17 = vld [vmem:[#allocation3 + $0x96] sm:$0xff]  ;;  %v2583_v58 = vld [vmem:[#allocation3 + $0x9] sm:$0xff]  ;;  %7027 = vmatpush3.msra.mxu0 %v2836_v62  ;;  %v2390_v51 = vpop.f32.mrf.mxu1  ;;  %2521 = vst.msk [vmem:[#allocation3 + $0x158] sm:$0xff] %vm2477_vm4, %v2467_v20  ;;  %v1868_v45 = vadd.f32 %v1780_v61, %v9435_v30  ;;  %v2850_v54 = vmax.f32 %v2650_v2, %v2800_v39  ;;  %v2649_v23 = vmax.f32 %v2549_v37, %v2599_v26  ;;  %v2582_v34 = vld [vmem:[#allocation3 + $0x1] sm:$0xff] }
 0x262   : > { %v2682_v13 = vld [vmem:[#allocation3 + $0x15] sm:$0xff]  ;;  %7028 = vmatprep.subr.mxu0 %v2851_v7  ;;  %v2533_v14 = vld [vmem:[#allocation3 + $0x8] sm:$0xff]  ;;  %v2798_v36 = vmax.f32 %v2698_v48, %v2748_v17  ;;  %v7804_v0 = vpop.f32.mrf.mxu0  ;;  %v2834_v50 = vmax.f32 %v2634_v56, %v2784_v21  ;;  %v2648_v42 = vmax.f32 %v2548_v28, %v2598_v24  ;;  %v2532_v32 = vld [vmem:[#allocation3] sm:$0xff] }
 0x263   : > { %v2732_v35 = vld [vmem:[#allocation3 + $0x16] sm:$0xff]  ;;  %7029 = vmatpush3.msra.mxu0 %v2835_v25  ;;  %v2633_v3 = vmax.f32 %v2533_v14, %v2583_v58  ;;  %v7971_v6 = vpop.f32.mrf.mxu1  ;;  %v2468_v60 = vadd.f32 %v9752_v33, %v1868_v45  ;;  %v2849_v5 = vmax.f32 %v2649_v23, %v2799_v46  ;;  %v2632_v57 = vmax.f32 %v2532_v32, %v2582_v34  ;;  %v2882_v33 = vld [vmem:[%s10934_s4] sm:$0xff]  ;;  %v2887_v40 = vld [vmem:[%s10934_s4 + $0x28] sm:$0xff] }
 0x264   : > { %v2782_v19 = vmax.f32 %v2682_v13, %v2732_v35  ;;  %7030 = vmatprep.subr.mxu0 %v2850_v54  ;;  %v1785_v30 = vpop.f32.mrf.mxu0  ;;  %v2848_v63 = vmax.f32 %v2648_v42, %v2798_v36  ;;  %v2891_v44 = vld [vmem:[%s10934_s4 + $0x48] sm:$0xff]  ;;  %v2890_v47 = vld [vmem:[%s10934_s4 + $0x40] sm:$0xff]  ;;  %v10962_v45 = vld [vmem:[#allocation9_spill] sm:$0xff] }
 0x265   : > { %7031 = vmatpush3.msra.mxu0 %v2834_v50  ;;  %v2833_v9 = vmax.f32 %v2633_v3, %v2783_v43  ;;  %v2395_v29 = vpop.f32.mrf.mxu1  ;;  %2522 = vst.msk [vmem:[#allocation3 + $0x160] sm:$0xff] %vm2477_vm4, %v2468_v60  ;;  %v1869_v15 = vadd.f32 %v1785_v30, %v9443_v53  ;;  %v2895_v26 = vld [vmem:[%s10934_s4 + $0x68] sm:$0xff]  ;;  %v2894_v7 = vld [vmem:[%s10934_s4 + $0x60] sm:$0xff]  ;;  %v10963_v3 = vld [vmem:[#allocation10_spill] sm:$0xff] }
 0x266   : > { %7032 = vmatprep.subr.mxu0 %v2849_v5  ;;  %v7807_v59 = vpop.f32.mrf.mxu0  ;;  %v2832_v22 = vmax.f32 %v2632_v57, %v2782_v19  ;;  %v2899_v46 = vld [vmem:[%s10934_s4 + $0x88] sm:$0xff]  ;;  %v2898_v56 = vld [vmem:[%s10934_s4 + $0x80] sm:$0xff] }
 0x267   : > { %7033 = vmatpush3.msra.mxu0 %v2833_v9  ;;  %v7974_v12 = vpop.f32.mrf.mxu1  ;;  %v2469_v8 = vadd.f32 %v9765_v10, %v1869_v15  ;;  %v2886_v10 = vld [vmem:[%s10934_s4 + $0x20] sm:$0xff]  ;;  %v10961_v35 = vld [vmem:[#allocation8_spill] sm:$0xff] }
 0x268   : > { %7034 = vmatprep.subr.mxu0 %v2848_v63  ;;  %v1790_v31 = vpop.f32.mrf.mxu0  ;;  %v2903_v43 = vld [vmem:[%s10934_s4 + $0xa8] sm:$0xff]  ;;  %v2902_v14 = vld [vmem:[%s10934_s4 + $0xa0] sm:$0xff] }
 0x269   : > { %7035 = vmatpush3.msra.mxu0 %v2832_v22  ;;  %v2400_v53 = vpop.f32.mrf.mxu1  ;;  %2523 = vst.msk [vmem:[#allocation3 + $0x168] sm:$0xff] %vm2477_vm4, %v2469_v8  ;;  %v1870_v27 = vadd.f32 %v1790_v31, %v9451_v16  ;;  %v2907_v0 = vld [vmem:[%s10934_s4 + $0xc8] sm:$0xff]  ;;  %v2906_v6 = vld [vmem:[%s10934_s4 + $0xc0] sm:$0xff] }
 0x26a   : > { %3050 = vmatmul.mubr.f32.vlgmr.msra.gmra.mxu0 %v2882_v33  ;;  %v7810_v18 = vpop.f32.mrf.mxu0  ;;  %v2911_v5 = vld [vmem:[%s10934_s4 + $0xe8] sm:$0xff]  ;;  %v10964_v32 = vld [vmem:[#allocation11_spill] sm:$0xff] }
 0x26b   : > { %v7977_v11 = vpop.f32.mrf.mxu1  ;;  %3054 = vmatprep.mubr.f32.mxu0 %v2887_v40  ;;  %v2470_v39 = vadd.f32 %v2390_v51, %v1870_v27  ;;  %v2910_v9 = vld [vmem:[%s10934_s4 + $0xe0] sm:$0xff]  ;;  %v2915_v57 = vld [vmem:[%s10934_s4 + $0x108] sm:$0xff] }
 0x26c   : > { %v1795_v49 = vpop.f32.mrf.mxu0 }
 0x26d   : > { %v2405_v55 = vpop.f32.mrf.mxu1  ;;  %2524 = vst.msk [vmem:[#allocation3 + $0x170] sm:$0xff] %vm2477_vm4, %v2470_v39  ;;  %v1871_v41 = vadd.f32 %v1795_v49, %v9459_v38  ;;  %v2914_v39 = vld [vmem:[%s10934_s4 + $0x100] sm:$0xff] }
 0x26e   : > { %3055 = vmatmul.mubr.f32.gmra.mxu0 %v2886_v10  ;;  %v7813_v16 = vpop.f32.mrf.mxu0 }
 0x26f   : > { %v7980_v62 = vpop.f32.mrf.mxu1  ;;  %3059 = vmatprep.mubr.f32.mxu0 %v2891_v44  ;;  %v2471_v21 = vadd.f32 %v2395_v29, %v1871_v41 }
 0x270   : > { %v1800_v52 = vpop.f32.mrf.mxu0  ;;  %v2577_v62 = vld [vmem:[#allocation3 + $0x168] sm:$0xff] }
 0x271   : > { %v2410_v48 = vpop.f32.mrf.mxu1  ;;  %2525 = vst.msk [vmem:[#allocation3 + $0x178] sm:$0xff] %vm2477_vm4, %v2471_v21  ;;  %v1872_v17 = vadd.f32 %v1800_v52, %v9467_v4  ;;  %v2919_v21 = vld [vmem:[%s10934_s4 + $0x128] sm:$0xff] }
 0x272   : > { %3060 = vmatmul.mubr.f32.gmra.mxu0 %v2890_v47  ;;  %v7816_v38 = vpop.f32.mrf.mxu0 }
 0x273   : > { %v7983_v20 = vpop.f32.mrf.mxu1  ;;  %3064 = vmatprep.mubr.f32.mxu0 %v2895_v26  ;;  %v2472_v2 = vadd.f32 %v2400_v53, %v1872_v17  ;;  %v2626_v26 = vld [vmem:[#allocation3 + $0x161] sm:$0xff] }
 0x274   : > { %v1805_v58 = vpop.f32.mrf.mxu0  ;;  %v2578_v11 = vld [vmem:[#allocation3 + $0x170] sm:$0xff]  ;;  %v2576_v20 = vld [vmem:[#allocation3 + $0x160] sm:$0xff] }
 0x275   : > { %v2415_v13 = vpop.f32.mrf.mxu1  ;;  %2526 = vst.msk [vmem:[#allocation3 + $0x180] sm:$0xff] %vm2477_vm4, %v2472_v2  ;;  %v1873_v61 = vadd.f32 %v1805_v58, %v10961_v35  ;;  %v2627_v44 = vld [vmem:[#allocation3 + $0x169] sm:$0xff]  ;;  %v2918_v2 = vld [vmem:[%s10934_s4 + $0x120] sm:$0xff] }
 0x276   : > { %3065 = vmatmul.mubr.f32.gmra.mxu0 %v2894_v7  ;;  %v7819_v4 = vpop.f32.mrf.mxu0  ;;  %v2725_v52 = vld [vmem:[#allocation3 + $0x16d] sm:$0xff]  ;;  %v2677_v38 = vmax.f32 %v2577_v62, %v2627_v44  ;;  %v2724_v58 = vld [vmem:[#allocation3 + $0x165] sm:$0xff] }
 0x277   : > { %v7986_v25 = vpop.f32.mrf.mxu1  ;;  %3069 = vmatprep.mubr.f32.mxu0 %v2899_v46  ;;  %v2473_v37 = vadd.f32 %v2405_v55, %v1873_v61  ;;  %v2625_v46 = vld [vmem:[#allocation3 + $0x159] sm:$0xff]  ;;  %v2676_v61 = vmax.f32 %v2576_v20, %v2626_v26  ;;  %v2619_v44 = vld [vmem:[#allocation3 + $0x129] sm:$0xff]  ;;  %v2618_v26 = vld [vmem:[#allocation3 + $0x121] sm:$0xff] }
 0x278   : > { %v1810_v24 = vpop.f32.mrf.mxu0  ;;  %v2579_v12 = vld [vmem:[#allocation3 + $0x178] sm:$0xff]  ;;  %v2568_v20 = vld [vmem:[#allocation3 + $0x120] sm:$0xff] }
 0x279   : > { %v2420_v51 = vpop.f32.mrf.mxu1  ;;  %2527 = vst.msk [vmem:[#allocation3 + $0x188] sm:$0xff] %vm2477_vm4, %v2473_v37  ;;  %v1874_v54 = vadd.f32 %v1810_v24, %v10962_v45  ;;  %v2628_v33 = vld [vmem:[#allocation3 + $0x171] sm:$0xff]  ;;  %v2773_v24 = vld [vmem:[#allocation3 + $0x15e] sm:$0xff] }
 0x27a   : > { %3070 = vmatmul.mubr.f32.gmra.mxu0 %v2898_v56  ;;  %v7822_v23 = vpop.f32.mrf.mxu0  ;;  %v2726_v49 = vld [vmem:[#allocation3 + $0x175] sm:$0xff]  ;;  %v2678_v16 = vmax.f32 %v2578_v11, %v2628_v33  ;;  %v2923_v56 = vld [vmem:[%s10934_s4 + $0x148] sm:$0xff] }
 0x27b   : > { %3074 = vmatprep.mubr.f32.mxu0 %v2903_v43  ;;  %v7989_v36 = vpop.f32.mrf.mxu1  ;;  %v2474_v34 = vadd.f32 %v2410_v48, %v1874_v54  ;;  %v2776_v55 = vld [vmem:[#allocation3 + $0x176] sm:$0xff]  ;;  %v2775_v48 = vld [vmem:[#allocation3 + $0x16e] sm:$0xff] }
 0x27c   : > { %v1815_v50 = vpop.f32.mrf.mxu0  ;;  %v2629_v29 = vld [vmem:[#allocation3 + $0x179] sm:$0xff]  ;;  %v2826_v7 = vmax.f32 %v2726_v49, %v2776_v55  ;;  %v2825_v25 = vmax.f32 %v2725_v52, %v2775_v48  ;;  %v2624_v37 = vld [vmem:[#allocation3 + $0x151] sm:$0xff]  ;;  %v2623_v36 = vld [vmem:[#allocation3 + $0x149] sm:$0xff] }
 0x27d   : > { %2528 = vst.msk [vmem:[#allocation3 + $0x190] sm:$0xff] %vm2477_vm4, %v2474_v34  ;;  %v1875_v28 = vadd.f32 %v1815_v50, %v10963_v3  ;;  %v2727_v8 = vld [vmem:[#allocation3 + $0x17d] sm:$0xff]  ;;  %v2679_v27 = vmax.f32 %v2579_v12, %v2629_v29  ;;  %v2574_v54 = vld [vmem:[#allocation3 + $0x150] sm:$0xff] }
 0x27e   : > { %3075 = vmatmul.mubr.f32.gmra.mxu0 %v2902_v14  ;;  %v7825_v19 = vpop.f32.mrf.mxu0  ;;  %v2777_v53 = vld [vmem:[#allocation3 + $0x17e] sm:$0xff]  ;;  %v2722_v34 = vld [vmem:[#allocation3 + $0x155] sm:$0xff]  ;;  %v2674_v3 = vmax.f32 %v2574_v54, %v2624_v37  ;;  %v2717_v52 = vld [vmem:[#allocation3 + $0x12d] sm:$0xff] }
 0x27f   : > { %3079 = vmatprep.mubr.f32.mxu0 %v2907_v0  ;;  %v2475_v60 = vadd.f32 %v2415_v13, %v1875_v28  ;;  %v2827_v47 = vmax.f32 %v2727_v8, %v2777_v53  ;;  %v2774_v13 = vld [vmem:[#allocation3 + $0x166] sm:$0xff]  ;;  %v2575_v4 = vld [vmem:[#allocation3 + $0x158] sm:$0xff]  ;;  %v2767_v48 = vld [vmem:[#allocation3 + $0x12e] sm:$0xff] }
 0x280   : > { %v1820_v42 = vpop.f32.mrf.mxu0  ;;  %v2728_v15 = vld [vmem:[#allocation3 + $0x185] sm:$0xff]  ;;  %v2723_v43 = vld [vmem:[#allocation3 + $0x15d] sm:$0xff]  ;;  %v2675_v45 = vmax.f32 %v2575_v4, %v2625_v46  ;;  %v2824_v23 = vmax.f32 %v2724_v58, %v2774_v13  ;;  %v2718_v49 = vld [vmem:[#allocation3 + $0x135] sm:$0xff]  ;;  %v2817_v4 = vmax.f32 %v2717_v52, %v2767_v48 }
 0x281   : > { %2529 = vst.msk [vmem:[#allocation3 + $0x198] sm:$0xff] %vm2477_vm4, %v2475_v60  ;;  %v1876_v30 = vadd.f32 %v1820_v42, %v10964_v32  ;;  %v2778_v63 = vld [vmem:[#allocation3 + $0x186] sm:$0xff]  ;;  %v2877_v35 = vmax.f32 %v2677_v38, %v2827_v47  ;;  %v2772_v0 = vld [vmem:[#allocation3 + $0x156] sm:$0xff]  ;;  %v2823_v19 = vmax.f32 %v2723_v43, %v2773_v24  ;;  %v2771_v42 = vld [vmem:[#allocation3 + $0x14e] sm:$0xff] }
 0x282   : > { %3080 = vmatmul.mubr.f32.gmra.mxu0 %v2906_v6  ;;  %v7828_v59 = vpop.f32.mrf.mxu0  ;;  %v2828_v10 = vmax.f32 %v2728_v15, %v2778_v63  ;;  %v2922_v14 = vld [vmem:[%s10934_s4 + $0x140] sm:$0xff]  ;;  %v2875_v50 = vmax.f32 %v2675_v45, %v2825_v25  ;;  %v2573_v28 = vld [vmem:[#allocation3 + $0x148] sm:$0xff]  ;;  %v2874_v32 = vmax.f32 %v2674_v3, %v2824_v23  ;;  %v2571_v33 = vld [vmem:[#allocation3 + $0x138] sm:$0xff] }
 0x283   : > { %3084 = vmatprep.mubr.f32.mxu0 %v2911_v5  ;;  %v2476_v22 = vadd.f32 %v2420_v51, %v1876_v30  ;;  %v2876_v51 = vmax.f32 %v2676_v61, %v2826_v7  ;;  %v2927_v6 = vld [vmem:[%s10934_s4 + $0x168] sm:$0xff]  ;;  %v2673_v30 = vmax.f32 %v2573_v28, %v2623_v36  ;;  %v2926_v29 = vld [vmem:[%s10934_s4 + $0x160] sm:$0xff]  ;;  %v2768_v55 = vld [vmem:[#allocation3 + $0x136] sm:$0xff] }
 0x284   : > { %v2729_v40 = vld [vmem:[#allocation3 + $0x18d] sm:$0xff]  ;;  %v2878_v17 = vmax.f32 %v2678_v16, %v2828_v10  ;;  %v2622_v60 = vld [vmem:[#allocation3 + $0x141] sm:$0xff]  ;;  %v2621_v15 = vld [vmem:[#allocation3 + $0x139] sm:$0xff]  ;;  %v2818_v7 = vmax.f32 %v2718_v49, %v2768_v55 }
 0x285   : > { %v2779_v31 = vld [vmem:[#allocation3 + $0x18e] sm:$0xff]  ;;  %2531 = vst.msk [vmem:[#allocation3 + $0x1a0] sm:$0x7] %vm2530_vm6, %v2476_v22  ;;  %v2720_v63 = vld [vmem:[#allocation3 + $0x145] sm:$0xff]  ;;  %v2873_v22 = vmax.f32 %v2673_v30, %v2823_v19  ;;  %v2719_v53 = vld [vmem:[#allocation3 + $0x13d] sm:$0xff]  ;;  %v2671_v11 = vmax.f32 %v2571_v33, %v2621_v15 }
 0x286   : > { %v2829_v18 = vmax.f32 %v2729_v40, %v2779_v31  ;;  %3085 = vmatmul.mubr.f32.gmra.mxu0 %v2910_v9  ;;  %v2721_v5 = vld [vmem:[#allocation3 + $0x14d] sm:$0xff]  ;;  %v2572_v9 = vld [vmem:[#allocation3 + $0x140] sm:$0xff]  ;;  %v2931_v40 = vld [vmem:[%s10934_s4 + $0x188] sm:$0xf] }
 0x287   : > { %3089 = vmatprep.mubr.f32.mxu0 %v2915_v57  ;;  %v2822_v57 = vmax.f32 %v2722_v34, %v2772_v0  ;;  %v2770_v59 = vld [vmem:[#allocation3 + $0x146] sm:$0xff]  ;;  %v2672_v12 = vmax.f32 %v2572_v9, %v2622_v60  ;;  %v2821_v8 = vmax.f32 %v2721_v5, %v2771_v42  ;;  %v2620_v31 = vld [vmem:[#allocation3 + $0x131] sm:$0xff]  ;;  %v2765_v37 = vld [vmem:[#allocation3 + $0x11e] sm:$0xff] }
 0x288   : > { %v2879_v41 = vmax.f32 %v2679_v27, %v2829_v18  ;;  %v2769_v27 = vld [vmem:[#allocation3 + $0x13e] sm:$0xff]  ;;  %v2570_v10 = vld [vmem:[#allocation3 + $0x130] sm:$0xff]  ;;  %v2569_v47 = vld [vmem:[#allocation3 + $0x128] sm:$0xff] }
 0x289   : > { %v2872_v18 = vmax.f32 %v2672_v12, %v2822_v57  ;;  %v2871_v16 = vmax.f32 %v2671_v11, %v2821_v8  ;;  %v2670_v62 = vmax.f32 %v2570_v10, %v2620_v31  ;;  %v2669_v38 = vmax.f32 %v2569_v47, %v2619_v44  ;;  %v2716_v46 = vld [vmem:[#allocation3 + $0x125] sm:$0xff]  ;;  %v2567_v61 = vld [vmem:[#allocation3 + $0x118] sm:$0xff]  ;;  %v2888_v11 = vld [vmem:[%s10934_s4 + $0x30] sm:$0xff] }
 0x28a   : > { %3116 = vmatpush1.msra.mxu1 %v2879_v41  ;;  %3090 = vmatmul.mubr.f32.gmra.mxu0 %v2914_v39  ;;  %v2820_v39 = vmax.f32 %v2720_v63, %v2770_v59  ;;  %v2930_v41 = vld [vmem:[%s10934_s4 + $0x180] sm:$0xf]  ;;  %v2766_v58 = vld [vmem:[#allocation3 + $0x126] sm:$0xff]  ;;  %v2616_v25 = vld [vmem:[#allocation3 + $0x111] sm:$0xff] }
 0x28b   : > { %3117 = vmatprep.subr.mxu1 %v10950_v1  ;;  %3094 = vmatprep.mubr.f32.mxu0 %v2919_v21  ;;  %v2819_v21 = vmax.f32 %v2719_v53, %v2769_v27  ;;  %v2816_v45 = vmax.f32 %v2716_v46, %v2766_v58  ;;  %v2615_v54 = vld [vmem:[#allocation3 + $0x109] sm:$0xff]  ;;  %v2714_v23 = vld [vmem:[#allocation3 + $0x115] sm:$0xff]  ;;  %v2614_v3 = vld [vmem:[#allocation3 + $0x101] sm:$0xff] }
 0x28c   : > { %3118 = vmatpush1.msra.mxu1 %v2878_v17  ;;  %v2870_v17 = vmax.f32 %v2670_v62, %v2820_v39  ;;  %v2565_v0 = vld [vmem:[#allocation3 + $0x108] sm:$0xff]  ;;  %v2731_v28 = vld [vmem:[#allocation3 + $0x19d] sm:$0x1f]  ;;  %v2730_v9 = vld [vmem:[#allocation3 + $0x195] sm:$0xff] }
 0x28d   : > { %3119 = vmatprep.subr.mxu1 %v10950_v1  ;;  %v2869_v13 = vmax.f32 %v2669_v38, %v2819_v21  ;;  %v2781_v19 = vld [vmem:[#allocation3 + $0x19e] sm:$0x1f]  ;;  %v2665_v60 = vmax.f32 %v2565_v0, %v2615_v54  ;;  %v2631_v30 = vld [vmem:[#allocation3 + $0x189] sm:$0x1f]  ;;  %v2780_v57 = vld [vmem:[#allocation3 + $0x196] sm:$0xff] }
 0x28e   : > { %3120 = vmatpush1.msra.mxu1 %v2877_v35  ;;  %3095 = vmatmul.mubr.f32.gmra.mxu0 %v2918_v2  ;;  %v2617_v2 = vld [vmem:[#allocation3 + $0x119] sm:$0xff]  ;;  %v2668_v35 = vmax.f32 %v2568_v20, %v2618_v26  ;;  %v2831_v63 = vmax.f32 %v2731_v28, %v2781_v19  ;;  %v2630_v59 = vld [vmem:[#allocation3 + $0x181] sm:$0xff]  ;;  %v2830_v33 = vmax.f32 %v2730_v9, %v2780_v57  ;;  %v2884_v27 = vld [vmem:[%s10934_s4 + $0x10] sm:$0xff] }
 0x28f   : > { %3121 = vmatprep.subr.mxu1 %v10950_v1  ;;  %3099 = vmatprep.mubr.f32.mxu0 %v2923_v56  ;;  %v2715_v56 = vld [vmem:[#allocation3 + $0x11d] sm:$0xff]  ;;  %v2667_v24 = vmax.f32 %v2567_v61, %v2617_v2  ;;  %v2892_v39 = vld [vmem:[%s10934_s4 + $0x50] sm:$0xff]  ;;  %v6550_v0 = vld [vmem:[%s10935_s5 + $0x48] sm:$0xff] }
 0x290   : > { %3122 = vmatpush1.msra.mxu1 %v2876_v51  ;;  %v2868_v43 = vmax.f32 %v2668_v35, %v2818_v7  ;;  %v2566_v51 = vld [vmem:[#allocation3 + $0x110] sm:$0xff]  ;;  %v2564_v5 = vld [vmem:[#allocation3 + $0x100] sm:$0xff]  ;;  %v2893_v10 = vld [vmem:[%s10934_s4 + $0x58] sm:$0xff] }
 0x291   : > { %3123 = vmatprep.subr.mxu1 %v10950_v1  ;;  %v2867_v36 = vmax.f32 %v2667_v24, %v2817_v4  ;;  %v2666_v34 = vmax.f32 %v2566_v51, %v2616_v25  ;;  %v2664_v15 = vmax.f32 %v2564_v5, %v2614_v3  ;;  %v2580_v8 = vld [vmem:[#allocation3 + $0x180] sm:$0xff]  ;;  %v2897_v44 = vld [vmem:[%s10934_s4 + $0x78] sm:$0xff]  ;;  %v2896_v49 = vld [vmem:[%s10934_s4 + $0x70] sm:$0xff] }
 0x292   : > { %3124 = vmatpush1.msra.mxu1 %v2875_v50  ;;  %3100 = vmatmul.mubr.f32.gmra.mxu0 %v2922_v14  ;;  %v2764_v14 = vld [vmem:[#allocation3 + $0x116] sm:$0xff]  ;;  %v2815_v50 = vmax.f32 %v2715_v56, %v2765_v37  ;;  %v2680_v31 = vmax.f32 %v2580_v8, %v2630_v59  ;;  %v2932_v35 = vld [vmem:[%s10934_s4 + $0x190] sm:$0xf]  ;;  %v3274_v56 = vld [vmem:[%s10935_s5 + $0x28] sm:$0xff] }
 0x293   : > { %3125 = vmatprep.subr.mxu1 %v10950_v1  ;;  %3104 = vmatprep.mubr.f32.mxu0 %v2927_v6  ;;  %v2866_v6 = vmax.f32 %v2666_v34, %v2816_v45  ;;  %v2814_v42 = vmax.f32 %v2714_v23, %v2764_v14  ;;  %v2901_v55 = vld [vmem:[%s10934_s4 + $0x98] sm:$0xff]  ;;  %v2904_v62 = vld [vmem:[%s10934_s4 + $0xb0] sm:$0xff]  ;;  %v6554_v24 = vld [vmem:[%s10935_s5 + $0x68] sm:$0xff] }
 0x294   : > { %3126 = vmatpush1.msra.mxu1 %v2874_v32  ;;  %v2581_v32 = vld [vmem:[#allocation3 + $0x188] sm:$0x1f]  ;;  %v2880_v53 = vmax.f32 %v2680_v31, %v2830_v33  ;;  %v2909_v47 = vld [vmem:[%s10934_s4 + $0xd8] sm:$0xff]  ;;  %v2908_v21 = vld [vmem:[%s10934_s4 + $0xd0] sm:$0xff] }
 0x295   : > { %3127 = vmatprep.subr.mxu1 %v10950_v1  ;;  %v2681_v12 = vmax.f32 %v2581_v32, %v2631_v30  ;;  %v2913_v26 = vld [vmem:[%s10934_s4 + $0xf8] sm:$0xff]  ;;  %v2912_v52 = vld [vmem:[%s10934_s4 + $0xf0] sm:$0xff]  ;;  %v6553_v45 = vld [vmem:[%s10935_s5 + $0x60] sm:$0xff] }
 0x296   : > { %3128 = vmatpush1.msra.mxu1 %v2873_v22  ;;  %3105 = vmatmul.mubr.f32.gmra.mxu0 %v2926_v29  ;;  %v2865_v29 = vmax.f32 %v2665_v60, %v2815_v50  ;;  %v2864_v22 = vmax.f32 %v2664_v15, %v2814_v42  ;;  %v2917_v48 = vld [vmem:[%s10934_s4 + $0x118] sm:$0xff]  ;;  %v2920_v20 = vld [vmem:[%s10934_s4 + $0x130] sm:$0xff]  ;;  %v3270_v14 = vld [vmem:[%s10935_s5 + $0x8] sm:$0xff] }
 0x297   : > { %3129 = vmatprep.subr.mxu1 %v10950_v1  ;;  %3109 = vmatprep.mubr.f32.mxu0 %v2931_v40  ;;  %v2881_v40 = vmax.f32 %v2681_v12, %v2831_v63  ;;  %v2921_v38 = vld [vmem:[%s10934_s4 + $0x138] sm:$0xff]  ;;  %v2924_v2 = vld [vmem:[%s10934_s4 + $0x150] sm:$0xff]  ;;  %v3269_v34 = vld [vmem:[%s10935_s5] sm:$0xff] }
 0x298   : > { %3130 = vmatpush1.msra.mxu1 %v2872_v18  ;;  %v2889_v18 = vld [vmem:[%s10934_s4 + $0x38] sm:$0xff]  ;;  %v2928_v58 = vld [vmem:[%s10934_s4 + $0x170] sm:$0xff]  ;;  %v6549_v50 = vld [vmem:[%s10935_s5 + $0x40] sm:$0xff] }
 0x299   : > { %3131 = vmatprep.subr.mxu1 %v10950_v1  ;;  %v2925_v7 = vld [vmem:[%s10934_s4 + $0x158] sm:$0xff]  ;;  %v3275_v4 = vld [vmem:[%s10935_s5 + $0x30] sm:$0xff]  ;;  %v10029_v33 = vld [vmem:[%s10933_s3] ss:$0 sm:$0xff] }
 0x29a   : > { %3132 = vmatpush1.msra.mxu1 %v2871_v16  ;;  %3110 = vmatmul.mubr.f32.gmra.mxu0 %v2930_v41  ;;  %v2900_v41 = vld [vmem:[%s10934_s4 + $0x90] sm:$0xff]  ;;  %v2905_v16 = vld [vmem:[%s10934_s4 + $0xb8] sm:$0xff] }
 0x29b   : > { %3133 = vmatprep.subr.mxu1 %v10950_v1  ;;  %v2929_v46 = vld [vmem:[%s10934_s4 + $0x178] sm:$0xff]  ;;  %v6555_v37 = vld [vmem:[%s10935_s5 + $0x70] sm:$0xff] }
 0x29c   : > { %3134 = vmatpush1.msra.mxu1 %v2870_v17  ;;  %v2916_v17 = vld [vmem:[%s10934_s4 + $0x110] sm:$0xff]  ;;  %v3276_v61 = vld [vmem:[%s10935_s5 + $0x38] sm:$0xff] }
 0x29d   : > { %3135 = vmatprep.subr.mxu1 %v10950_v1  ;;  %v6556_v25 = vld [vmem:[%s10935_s5 + $0x78] sm:$0xff]  ;;  %v3271_v54 = vld [vmem:[%s10935_s5 + $0x10] sm:$0xff] }
 0x29e   : > { %3136 = vmatpush1.msra.mxu1 %v2869_v13  ;;  %v2933_v13 = vld [vmem:[%s10934_s4 + $0x198] sm:$0xf]  ;;  %7990 = vmatprep.subr.mxu0 %v6556_v25 }
 0x29f   : > { %3137 = vmatprep.subr.mxu1 %v10950_v1  ;;  %7991 = vmatpush3.msra.mxu0 %v6556_v25  ;;  %v3272_v51 = vld [vmem:[%s10935_s5 + $0x18] sm:$0xff] }
 0x2a0   : > { %3138 = vmatpush1.msra.mxu1 %v2868_v43  ;;  %v3273_v43 = vld [vmem:[%s10935_s5 + $0x20] sm:$0xff]  ;;  %7992 = vmatprep.subr.mxu0 %v6555_v37  ;;  %v6552_v23 = vld [vmem:[%s10935_s5 + $0x58] sm:$0xff] }
 0x2a1   : > { %3139 = vmatprep.subr.mxu1 %v10950_v1  ;;  %7993 = vmatpush3.msra.mxu0 %v6555_v37  ;;  %v6602_v3 = vld [vmem:[%s10935_s5 + $0xf8] sm:$0xff]  ;;  %v6600_v37 = vld [vmem:[%s10935_s5 + $0xe8] sm:$0xff] }
 0x2a2   : > { %3140 = vmatpush1.msra.mxu1 %v2867_v36  ;;  %7994 = vmatprep.subr.mxu0 %v6554_v24  ;;  %v6551_v36 = vld [vmem:[%s10935_s5 + $0x50] sm:$0xff]  ;;  %v10023_v28 = vld [vmem:[%s10935_s5 + $0xb8] sm:$0xff] }
 0x2a3   : > { %3141 = vmatprep.subr.mxu1 %v10950_v1  ;;  %7995 = vmatpush3.msra.mxu0 %v6554_v24 }
 0x2a4   : > { %3142 = vmatpush1.msra.mxu1 %v2866_v6  ;;  %7996 = vmatprep.subr.mxu0 %v6553_v45 }
 0x2a5   : > { %3143 = vmatprep.subr.mxu1 %v10950_v1  ;;  %7997 = vmatpush3.msra.mxu0 %v6553_v45  ;;  %v6583_v45 = vld [vmem:[%s10935_s5 + $0xb0] sm:$0xff] }
 0x2a6   : > { %3144 = vmatpush1.msra.mxu1 %v2865_v29  ;;  %7998 = vmatprep.subr.mxu0 %v6552_v23 }
 0x2a7   : > { %3145 = vmatprep.subr.mxu1 %v10950_v1  ;;  %7999 = vmatpush3.msra.mxu0 %v6552_v23 }
 0x2a8   : > { %3146 = vmatpush1.msra.mxu1 %v2864_v22  ;;  %8000 = vmatprep.subr.mxu0 %v6551_v36 }
 0x2a9   : > { %3175 = vmatprep.subr.mxu1 %v10950_v1  ;;  %8001 = vmatpush3.msra.mxu0 %v6551_v36  ;;  %v6599_v36 = vld [vmem:[%s10935_s5 + $0xe0] sm:$0xff] }
 0x2aa   : > { %6535 = vmatpush2.msk.msra.mxu1 %vm2981_vm7, %v2881_v40  ;;  %8002 = vmatprep.subr.mxu0 %v6550_v0 }
 0x2ab   : > { %3177 = vmatprep.subr.mxu1 %v10950_v1  ;;  %8003 = vmatpush3.msra.mxu0 %v6550_v0  ;;  %v6582_v0 = vld [vmem:[%s10935_s5 + $0xa8] sm:$0xff] }
 0x2ac   : > { %3178 = vmatpush2.msra.mxu1 %v2880_v53  ;;  %8004 = vmatprep.subr.mxu0 %v6549_v50 }
 0x2ad   : > { %3180 = vmatmul.mubr.f32.vlgmr.msra.gmra.mxu1 %v2884_v27  ;;  %8021 = vmatprep.subr.mxu1 %v3276_v61 }
 0x2ae   : > { %6537 = vmatprep.mubr.msk.f32.mxu1 %vm2941_vm5, %v2889_v18  ;;  %8022 = vmatpush3.msra.mxu1 %v3276_v61 }
 0x2af   : > { %8023 = vmatprep.subr.mxu1 %v3275_v4  ;;  %8005 = vmatpush3.msra.mxu0 %v6549_v50 }
 0x2b0   : > { %8024 = vmatpush3.msra.mxu1 %v3275_v4  ;;  %8052 = vmatprep.subr.mxu0 %v10023_v28 }
 0x2b1   : > { %3185 = vmatmul.mubr.f32.gmra.mxu1 %v2888_v11  ;;  %8025 = vmatprep.subr.mxu1 %v3274_v56 }
 0x2b2   : > { %6538 = vmatprep.mubr.msk.f32.mxu1 %vm2941_vm5, %v2893_v10  ;;  %8026 = vmatpush3.msra.mxu1 %v3274_v56 }
 0x2b3   : > { %8027 = vmatprep.subr.mxu1 %v3273_v43 }
 0x2b4   : > { %8028 = vmatpush3.msra.mxu1 %v3273_v43 }
 0x2b5   : > { %3190 = vmatmul.mubr.f32.gmra.mxu1 %v2892_v39  ;;  %8029 = vmatprep.subr.mxu1 %v3272_v51 }
 0x2b6   : > { %6539 = vmatprep.mubr.msk.f32.mxu1 %vm2941_vm5, %v2897_v44  ;;  %8030 = vmatpush3.msra.mxu1 %v3272_v51 }
 0x2b7   : > { %8031 = vmatprep.subr.mxu1 %v3271_v54 }
 0x2b8   : > { %8032 = vmatpush3.msra.mxu1 %v3271_v54 }
 0x2b9   : > { %3195 = vmatmul.mubr.f32.gmra.mxu1 %v2896_v49  ;;  %8033 = vmatprep.subr.mxu1 %v3270_v14 }
 0x2ba   : > { %6540 = vmatprep.mubr.msk.f32.mxu1 %vm2941_vm5, %v2901_v55  ;;  %8034 = vmatpush3.msra.mxu1 %v3270_v14 }
 0x2bb   : > { %8035 = vmatprep.subr.mxu1 %v3269_v34 }
 0x2bc   : > { %8036 = vmatpush3.msra.mxu1 %v3269_v34 }
 0x2bd   : > { %3200 = vmatmul.mubr.f32.gmra.mxu1 %v2900_v41  ;;  %8083 = vmatprep.subr.mxu1 %v6602_v3 }
 0x2be   : > { %6541 = vmatprep.mubr.msk.f32.mxu1 %vm2941_vm5, %v2905_v16 }
 0x2c1   : > { %3205 = vmatmul.mubr.f32.gmra.mxu1 %v2904_v62 }
 0x2c2   : > { %6542 = vmatprep.mubr.msk.f32.mxu1 %vm2941_vm5, %v2909_v47 }
 0x2c5   : > { %3210 = vmatmul.mubr.f32.gmra.mxu1 %v2908_v21 }
 0x2c6   : > { %6543 = vmatprep.mubr.msk.f32.mxu1 %vm2941_vm5, %v2913_v26 }
 0x2c9   : > { %3215 = vmatmul.mubr.f32.gmra.mxu1 %v2912_v52 }
 0x2ca   : > { %6544 = vmatprep.mubr.msk.f32.mxu1 %vm2941_vm5, %v2917_v48 }
 0x2cd   : > { %3220 = vmatmul.mubr.f32.gmra.mxu1 %v2916_v17 }
 0x2ce   : > { %6545 = vmatprep.mubr.msk.f32.mxu1 %vm2941_vm5, %v2921_v38 }
 0x2d1   : > { %3225 = vmatmul.mubr.f32.gmra.mxu1 %v2920_v20 }
 0x2d2   : > { %6546 = vmatprep.mubr.msk.f32.mxu1 %vm2941_vm5, %v2925_v7 }
 0x2d5   : > { %3230 = vmatmul.mubr.f32.gmra.mxu1 %v2924_v2 }
 0x2d6   : > { %6547 = vmatprep.mubr.msk.f32.mxu1 %vm2941_vm5, %v2929_v46 }
 0x2d9   : > { %3235 = vmatmul.mubr.f32.gmra.mxu1 %v2928_v58 }
 0x2da   : > { %6548 = vmatprep.mubr.msk.f32.mxu1 %vm2941_vm5, %v2933_v13 }
 0x2dd   : > { %3240 = vmatmul.mubr.f32.gmra.mxu1 %v2932_v35  ;;  %v6601_v35 = vld [vmem:[%s10935_s5 + $0xf0] sm:$0xff] }
 0x32a   : > { %v7036_v19 = vpop.f32.mrf.mxu0 }
 0x32c   : > { %v7037_v6 = vpop.f32.mrf.mxu0 }
 0x32d   : > { %v7038_v12 = vadd.f32 %v7037_v6, %v7036_v19 }
 0x32e   : > { %v7039_v60 = vpop.f32.mrf.mxu0 }
 0x32f   : > { %v3052_v31 = vadd.f32 %v7038_v12, %v10029_v33 }
 0x330   : > { %v7040_v5 = vpop.f32.mrf.mxu0 }
 0x331   : > { %v7041_v40 = vadd.f32 %v7040_v5, %v7039_v60  ;;  %v6581_v60 = vld [vmem:[%s10935_s5 + $0xa0] sm:$0xff] }
 0x332   : > { %v7042_v42 = vpop.f32.mrf.mxu0 }
 0x333   : > { %v3057_v39 = vadd.f32 %v7041_v40, %v10029_v33 }
 0x334   : > { %v7043_v32 = vpop.f32.mrf.mxu0 }
 0x335   : > { %v7044_v10 = vadd.f32 %v7043_v32, %v7042_v42  ;;  %v6598_v32 = vld [vmem:[%s10935_s5 + $0xd8] sm:$0xff] }
 0x336   : > { %v7045_v30 = vpop.f32.mrf.mxu0 }
 0x337   : > { %v3062_v62 = vadd.f32 %v7044_v10, %v10029_v33 }
 0x338   : > { %v7046_v9 = vpop.f32.mrf.mxu0 }
 0x339   : > { %v7047_v16 = vadd.f32 %v7046_v9, %v7045_v30  ;;  %v6580_v9 = vld [vmem:[%s10935_s5 + $0x98] sm:$0xff] }
 0x33a   : > { %v7048_v57 = vpop.f32.mrf.mxu0 }
 0x33b   : > { %v3067_v38 = vadd.f32 %v7047_v16, %v10029_v33  ;;  %v6596_v16 = vld [vmem:[%s10935_s5 + $0xc8] sm:$0xff] }
 0x33c   : > { %v7049_v29 = vpop.f32.mrf.mxu0 }
 0x33d   : > { %v7050_v17 = vadd.f32 %v7049_v29, %v7048_v57 }
 0x33e   : > { %v7051_v15 = vpop.f32.mrf.mxu0 }
 0x33f   : > { %v3072_v4 = vadd.f32 %v7050_v17, %v10029_v33 }
 0x340   : > { %v7052_v63 = vpop.f32.mrf.mxu0 }
 0x341   : > { %v7053_v61 = vadd.f32 %v7052_v63, %v7051_v15 }
 0x342   : > { %v7054_v59 = vpop.f32.mrf.mxu0 }
 0x343   : > { %v3077_v14 = vadd.f32 %v7053_v61, %v10029_v33 }
 0x344   : > { %v7055_v22 = vpop.f32.mrf.mxu0 }
 0x345   : > { %v7056_v23 = vadd.f32 %v7055_v22, %v7054_v59  ;;  %v6579_v59 = vld [vmem:[%s10935_s5 + $0x90] sm:$0xff] }
 0x346   : > { %v10031_v8 = vpop.f32.mrf.mxu0 }
 0x347   : > { %v3082_v42 = vadd.f32 %v7056_v23, %v10029_v33 }
 0x348   : > { %v10034_v11 = vpop.f32.mrf.mxu0 }
 0x34a   : > { %v10038_v41 = vpop.f32.mrf.mxu0 }
 0x34c   : > { %v10042_v52 = vpop.f32.mrf.mxu0 }
 0x34e   : > { %v10047_v46 = vpop.f32.mrf.mxu0 }
 0x350   : > { %v10059_v24 = vpop.f32.mrf.mxu0 }
 0x352   : > { %v10075_v50 = vpop.f32.mrf.mxu0 }
 0x354   : > { %v7067_v57 = vpop.f32.mrf.mxu0 }
 0x356   : > { %v7069_v12 = vpop.f32.mrf.mxu0 }
 0x36d   : > { %v3181_v53 = vpop.f32.mrf.mxu1 }
 0x36e   : > { %v3182_v27 = vadd.f32 %v3181_v53, %v3052_v31  ;;  %v6597_v31 = vld [vmem:[%s10935_s5 + $0xd0] sm:$0xff] }
 0x36f   : > { %v3183_v18 = vpop.f32.mrf.mxu1 }
 0x370   : > { %3245 = vst.msk [vmem:[#allocation4] sm:$0xff] %vm2477_vm4, %v3182_v27  ;;  %v6578_v27 = vld [vmem:[%s10935_s5 + $0x88] sm:$0xff] }
 0x371   : > { %v3186_v44 = vpop.f32.mrf.mxu1 }
 0x372   : > { %v3187_v49 = vadd.f32 %v3186_v44, %v3057_v39  ;;  %v6577_v39 = vld [vmem:[%s10935_s5 + $0x80] sm:$0xff] }
 0x373   : > { %v3188_v55 = vpop.f32.mrf.mxu1 }
 0x374   : > { %3246 = vst.msk [vmem:[#allocation4 + $0x8] sm:$0xff] %vm2477_vm4, %v3187_v49  ;;  %v7070_v49 = vpop.f32.mrf.mxu0  ;;  %v7065_v55 = vadd.f32 %v10059_v24, %v10047_v46 }
 0x375   : > { %v3191_v47 = vpop.f32.mrf.mxu1 }
 0x376   : > { %v3192_v21 = vadd.f32 %v3191_v47, %v3062_v62  ;;  %v10121_v47 = vld [vmem:[%s10935_s5 + $0x138] sm:$0xff] }
 0x377   : > { %v3193_v26 = vpop.f32.mrf.mxu1  ;;  %v3259_v48 = vld [vmem:[#allocation4] sm:$0xff] }
 0x378   : > { %3247 = vst.msk [vmem:[#allocation4 + $0x10] sm:$0xff] %vm2477_vm4, %v3192_v21  ;;  %8037 = vmatprep.mubr.msk.f32.mxu1 %vm2477_vm4, %v3259_v48  ;;  %v7068_v26 = vadd.f32 %v7067_v57, %v10075_v50 }
 0x379   : > { %v3196_v20 = vpop.f32.mrf.mxu1 }
 0x37a   : > { %v3197_v7 = vadd.f32 %v3196_v20, %v3067_v38  ;;  %v6595_v38 = vld [vmem:[%s10935_s5 + $0xc0] sm:$0xff]  ;;  %v7072_v20 = vpop.f32.mrf.mxu0 }
 0x37b   : > { %v3198_v2 = vpop.f32.mrf.mxu1  ;;  %v3277_v58 = vld [vmem:[#allocation4 + $0x1] sm:$0xff] }
 0x37c   : > { %v3260_v13 = vld [vmem:[#allocation4 + $0x8] sm:$0xff]  ;;  %3248 = vst.msk [vmem:[#allocation4 + $0x18] sm:$0xff] %vm2477_vm4, %v3197_v7  ;;  %8006 = vmatprep.mubr.msk.f32.mxu0 %vm2477_vm4, %v3277_v58  ;;  %v3097_v7 = vadd.f32 %v7065_v55, %v10029_v33  ;;  %v7071_v58 = vadd.f32 %v7070_v49, %v7069_v12 }
 0x37d   : > { %8038 = vmatmul.mubr.msk.f32.vlgmr.msra.gmra.mxu1 %vm2477_vm4, %v3260_v13  ;;  %v3201_v25 = vpop.f32.mrf.mxu1  ;;  %v3102_v13 = vadd.f32 %v7068_v26, %v10029_v33  ;;  %v6655_v55 = vld [vmem:[%s10935_s5 + $0x1b0] sm:$0xff]  ;;  %v6653_v26 = vld [vmem:[%s10935_s5 + $0x1a0] sm:$0xff] }
 0x37e   : > { %8084 = vmatpush3.msra.mxu1 %v6602_v3  ;;  %v3202_v56 = vadd.f32 %v3201_v25, %v3072_v4  ;;  %v3107_v24 = vadd.f32 %v7071_v58, %v10029_v33  ;;  %v6650_v58 = vld [vmem:[%s10935_s5 + $0x188] sm:$0xff] }
 0x37f   : > { %8085 = vmatprep.subr.mxu1 %v6601_v35  ;;  %v3203_v43 = vpop.f32.mrf.mxu1  ;;  %v3278_v51 = vld [vmem:[#allocation4 + $0x9] sm:$0xff] }
 0x380   : > { %v3261_v54 = vld [vmem:[#allocation4 + $0x10] sm:$0xff]  ;;  %8086 = vmatpush3.msra.mxu1 %v6601_v35  ;;  %3249 = vst.msk [vmem:[#allocation4 + $0x20] sm:$0xff] %vm2477_vm4, %v3202_v56  ;;  %8007 = vmatmul.mubr.msk.f32.vlgmr.msra.gmra.mxu0 %vm2477_vm4, %v3278_v51  ;;  %v7073_v56 = vpop.f32.mrf.mxu0 }
 0x381   : > { %8040 = vmatprep.mubr.msk.f32.mxu1 %vm2477_vm4, %v3261_v54  ;;  %v3206_v34 = vpop.f32.mrf.mxu1  ;;  %8053 = vmatpush3.msra.mxu0 %v10023_v28  ;;  %v7059_v28 = vadd.f32 %v10034_v11, %v10031_v8  ;;  %v7062_v8 = vadd.f32 %v10042_v52, %v10038_v41  ;;  %v6638_v35 = vld [vmem:[%s10935_s5 + $0x178] sm:$0xff]  ;;  %v7074_v51 = vadd.f32 %v7073_v56, %v7072_v20  ;;  %v6632_v20 = vld [vmem:[%s10935_s5 + $0x148] sm:$0xff] }
 0x382   : > { %8087 = vmatprep.subr.mxu1 %v6600_v37  ;;  %v3207_v3 = vadd.f32 %v3206_v34, %v3077_v14  ;;  %8054 = vmatprep.subr.mxu0 %v6583_v45 }
 0x383   : > { %8088 = vmatpush3.msra.mxu1 %v6600_v37  ;;  %v3208_v19 = vpop.f32.mrf.mxu1  ;;  %v3279_v6 = vld [vmem:[#allocation4 + $0x11] sm:$0xff]  ;;  %8055 = vmatpush3.msra.mxu0 %v6583_v45  ;;  %v3087_v40 = vadd.f32 %v7059_v28, %v10029_v33  ;;  %v3092_v41 = vadd.f32 %v7062_v8, %v10029_v33  ;;  %v3112_v34 = vadd.f32 %v7074_v51, %v10029_v33  ;;  %v6614_v8 = vld [vmem:[%s10935_s5 + $0x108] sm:$0xff] }
 0x384   : > { %v3262_v5 = vld [vmem:[#allocation4 + $0x18] sm:$0xff]  ;;  %8089 = vmatprep.subr.mxu1 %v6599_v36  ;;  %3250 = vst.msk [vmem:[#allocation4 + $0x28] sm:$0xff] %vm2477_vm4, %v3207_v3  ;;  %8009 = vmatprep.mubr.msk.f32.mxu0 %vm2477_vm4, %v3279_v6  ;;  %v3587_v6 = vld [vmem:[#allocation4 + $0xa] sm:$0xff] }
 0x385   : > { %8056 = vmatprep.subr.mxu0 %v6582_v0  ;;  %v3211_v30 = vpop.f32.mrf.mxu1  ;;  %8041 = vmatmul.mubr.msk.f32.gmra.mxu1 %vm2477_vm4, %v3262_v5  ;;  %v3588_v28 = vld [vmem:[#allocation4 + $0x12] sm:$0xff] }
 0x386   : > { %8057 = vmatpush3.msra.mxu0 %v6582_v0  ;;  %v3212_v29 = vadd.f32 %v3211_v30, %v3082_v42  ;;  %8090 = vmatpush3.msra.mxu1 %v6599_v36  ;;  %v6619_v30 = vld [vmem:[%s10935_s5 + $0x130] sm:$0xff]  ;;  %v3935_v49 = vld [vmem:[#allocation4 + $0x13] sm:$0xff] }
 0x387   : > { %8058 = vmatprep.subr.mxu0 %v6581_v60  ;;  %v3213_v15 = vpop.f32.mrf.mxu1  ;;  %v3280_v63 = vld [vmem:[#allocation4 + $0x19] sm:$0xff]  ;;  %8091 = vmatprep.subr.mxu1 %v6598_v32 }
 0x388   : > { %8059 = vmatpush3.msra.mxu0 %v6581_v60  ;;  %v3263_v22 = vld [vmem:[#allocation4 + $0x20] sm:$0xff]  ;;  %3251 = vst.msk [vmem:[#allocation4 + $0x30] sm:$0xff] %vm2477_vm4, %v3212_v29  ;;  %8092 = vmatpush3.msra.mxu1 %v6598_v32  ;;  %v6617_v29 = vld [vmem:[%s10935_s5 + $0x120] sm:$0xff]  ;;  %v6637_v15 = vld [vmem:[%s10935_s5 + $0x170] sm:$0xff] }
 0x389   : > { %8010 = vmatmul.mubr.msk.f32.gmra.mxu0 %vm2477_vm4, %v3280_v63  ;;  %8060 = vmatprep.subr.mxu0 %v6580_v9  ;;  %v3216_v53 = vpop.f32.mrf.mxu1  ;;  %v3586_v60 = vld [vmem:[#allocation4 + $0x2] sm:$0xff]  ;;  %v3589_v32 = vld [vmem:[#allocation4 + $0x1a] sm:$0xff]  ;;  %v6616_v63 = vld [vmem:[%s10935_s5 + $0x118] sm:$0xff] }
 0x38a   : > { %8061 = vmatpush3.msra.mxu0 %v6580_v9  ;;  %8043 = vmatprep.mubr.msk.f32.mxu1 %vm2477_vm4, %v3263_v22  ;;  %v3217_v18 = vadd.f32 %v3216_v53, %v3087_v40  ;;  %v6618_v9 = vld [vmem:[%s10935_s5 + $0x128] sm:$0xff]  ;;  %v6615_v22 = vld [vmem:[%s10935_s5 + $0x110] sm:$0xff] }
 0x38b   : > { %8062 = vmatprep.subr.mxu0 %v6579_v59  ;;  %v3218_v11 = vpop.f32.mrf.mxu1  ;;  %v3281_v10 = vld [vmem:[#allocation4 + $0x21] sm:$0xff]  ;;  %8093 = vmatprep.subr.mxu1 %v6597_v31 }
 0x38c   : > { %8063 = vmatpush3.msra.mxu0 %v6579_v59  ;;  %v3264_v44 = vld [vmem:[#allocation4 + $0x28] sm:$0xff]  ;;  %3252 = vst.msk [vmem:[#allocation4 + $0x38] sm:$0xff] %vm2477_vm4, %v3217_v18  ;;  %8012 = vmatprep.mubr.msk.f32.mxu0 %vm2477_vm4, %v3281_v10  ;;  %v6636_v53 = vld [vmem:[%s10935_s5 + $0x168] sm:$0xff]  ;;  %v6656_v18 = vld [vmem:[%s10935_s5 + $0x1b8] sm:$0xff] }
 0x38d   : > { %8064 = vmatprep.subr.mxu0 %v6578_v27  ;;  %v3221_v62 = vpop.f32.mrf.mxu1  ;;  %8044 = vmatmul.mubr.msk.f32.gmra.mxu1 %vm2477_vm4, %v3264_v44  ;;  %v3590_v57 = vld [vmem:[#allocation4 + $0x22] sm:$0xff]  ;;  %v6635_v11 = vld [vmem:[%s10935_s5 + $0x160] sm:$0xff]  ;;  %v6634_v44 = vld [vmem:[%s10935_s5 + $0x158] sm:$0xff] }
 0x38e   : > { %8065 = vmatpush3.msra.mxu0 %v6578_v27  ;;  %v3222_v21 = vadd.f32 %v3221_v62, %v3092_v41  ;;  %8094 = vmatpush3.msra.mxu1 %v6597_v31  ;;  %v6613_v31 = vld [vmem:[%s10935_s5 + $0x100] sm:$0xff]  ;;  %v6633_v41 = vld [vmem:[%s10935_s5 + $0x150] sm:$0xff]  ;;  %v6654_v62 = vld [vmem:[%s10935_s5 + $0x1a8] sm:$0xff] }
 0x38f   : > { %8066 = vmatprep.subr.mxu0 %v6577_v39  ;;  %v3223_v52 = vpop.f32.mrf.mxu1  ;;  %v3282_v48 = vld [vmem:[#allocation4 + $0x29] sm:$0xff]  ;;  %8095 = vmatprep.subr.mxu1 %v6596_v16 }
 0x390   : > { %8067 = vmatpush3.msra.mxu0 %v6577_v39  ;;  %v3265_v17 = vld [vmem:[#allocation4 + $0x30] sm:$0xff]  ;;  %3253 = vst.msk [vmem:[#allocation4 + $0x40] sm:$0xff] %vm2477_vm4, %v3222_v21  ;;  %8096 = vmatpush3.msra.mxu1 %v6596_v16  ;;  %v3936_v16 = vld [vmem:[#allocation4 + $0x1b] sm:$0xff]  ;;  %v3937_v21 = vld [vmem:[#allocation4 + $0x23] sm:$0xff] }
 0x391   : > { %8013 = vmatmul.mubr.msk.f32.gmra.mxu0 %vm2477_vm4, %v3282_v48  ;;  %8114 = vmatprep.subr.mxu0 %v10121_v47  ;;  %v3226_v2 = vpop.f32.mrf.mxu1  ;;  %v3591_v59 = vld [vmem:[#allocation4 + $0x2a] sm:$0xff] }
 0x392   : > { %8046 = vmatprep.mubr.msk.f32.mxu1 %vm2477_vm4, %v3265_v17  ;;  %v3227_v46 = vadd.f32 %v3226_v2, %v3097_v7  ;;  %8097 = vmatprep.subr.mxu1 %v6595_v38  ;;  %v3934_v39 = vld [vmem:[#allocation4 + $0xb] sm:$0xff] }
 0x393   : > { %v3283_v61 = vld [vmem:[#allocation4 + $0x31] sm:$0xff]  ;;  %8098 = vmatpush3.msra.mxu1 %v6595_v38  ;;  %v3228_v25 = vpop.f32.mrf.mxu1  ;;  %v6651_v7 = vld [vmem:[%s10935_s5 + $0x190] sm:$0xff] }
 0x394   : > { %v3266_v4 = vld [vmem:[#allocation4 + $0x38] sm:$0xff]  ;;  %3254 = vst.msk [vmem:[#allocation4 + $0x48] sm:$0xff] %vm2477_vm4, %v3227_v46  ;;  %8015 = vmatprep.mubr.msk.f32.mxu0 %vm2477_vm4, %v3283_v61  ;;  %8145 = vmatprep.subr.mxu1 %v6638_v35  ;;  %v3938_v52 = vld [vmem:[#allocation4 + $0x2b] sm:$0xff] }
 0x395   : > { %8047 = vmatmul.mubr.msk.f32.gmra.mxu1 %vm2477_vm4, %v3266_v4  ;;  %v3231_v37 = vpop.f32.mrf.mxu1  ;;  %v3592_v12 = vld [vmem:[#allocation4 + $0x32] sm:$0xff]  ;;  %v4111_v51 = vld [vmem:[#allocation4 + $0x24] sm:$0xff] }
 0x396   : > { %v3232_v43 = vadd.f32 %v3231_v37, %v3102_v13  ;;  %v6652_v17 = vld [vmem:[%s10935_s5 + $0x198] sm:$0xff]  ;;  %v6631_v46 = vld [vmem:[%s10935_s5 + $0x140] sm:$0xff] }
 0x397   : > { %v3284_v45 = vld [vmem:[#allocation4 + $0x39] sm:$0xff]  ;;  %v3233_v23 = vpop.f32.mrf.mxu1  ;;  %v4108_v61 = vld [vmem:[#allocation4 + $0xc] sm:$0xff] }
 0x398   : > { %v3267_v54 = vld [vmem:[#allocation4 + $0x40] sm:$0xff]  ;;  %8016 = vmatmul.mubr.msk.f32.gmra.mxu0 %vm2477_vm4, %v3284_v45  ;;  %3255 = vst.msk [vmem:[#allocation4 + $0x50] sm:$0xff] %vm2477_vm4, %v3232_v43  ;;  %v3939_v38 = vld [vmem:[#allocation4 + $0x33] sm:$0xff]  ;;  %v6673_v45 = vld [vmem:[%s10935_s5 + $0x1f0] sm:$0xff] }
 0x399   : > { %8049 = vmatprep.mubr.msk.f32.mxu1 %vm2477_vm4, %v3267_v54  ;;  %v3236_v14 = vpop.f32.mrf.mxu1  ;;  %v3593_v40 = vld [vmem:[#allocation4 + $0x3a] sm:$0xff]  ;;  %v6674_v37 = vld [vmem:[%s10935_s5 + $0x1f8] sm:$0xff] }
 0x39a   : > { %v3237_v36 = vadd.f32 %v3236_v14, %v3107_v24  ;;  %v3940_v2 = vld [vmem:[#allocation4 + $0x3b] sm:$0xff]  ;;  %v6692_v43 = vld [vmem:[%s10935_s5 + $0x238] sm:$0xff] }
 0x39b   : > { %v3285_v0 = vld [vmem:[#allocation4 + $0x41] sm:$0xff]  ;;  %v3286_v50 = vld [vmem:[#allocation4 + $0x49] sm:$0x3f]  ;;  %v3238_v19 = vpop.f32.mrf.mxu1  ;;  %v6649_v4 = vld [vmem:[%s10935_s5 + $0x180] sm:$0xff] }
 0x39c   : > { %v3268_v3 = vld [vmem:[#allocation4 + $0x48] sm:$0x3f]  ;;  %8018 = vmatprep.mubr.msk.f32.mxu0 %vm2477_vm4, %v3285_v0  ;;  %3256 = vst.msk [vmem:[#allocation4 + $0x58] sm:$0xff] %vm2477_vm4, %v3237_v36  ;;  %v4109_v25 = vld [vmem:[#allocation4 + $0x14] sm:$0xff]  ;;  %v4283_v24 = vld [vmem:[#allocation4 + $0x1c] sm:$0xff] }
 0x39d   : > { %8050 = vmatmul.mubr.msk.f32.gmra.mxu1 %vm2477_vm4, %v3268_v3  ;;  %8019 = vmatmul.mubr.msk.f32.gmra.mxu0 %vm2477_vm4, %v3286_v50  ;;  %v3241_v5 = vpop.f32.mrf.mxu1  ;;  %v3594_v27 = vld [vmem:[#allocation4 + $0x42] sm:$0xff]  ;;  %v3595_v10 = vld [vmem:[#allocation4 + $0x4a] sm:$0x3f]  ;;  %v4113_v14 = vld [vmem:[#allocation4 + $0x34] sm:$0xff] }
 0x39e   : > { %8099 = vmatprep.mubr.msk.f32.mxu1 %vm2477_vm4, %v3587_v6  ;;  %8068 = vmatprep.mubr.msk.f32.mxu0 %vm2477_vm4, %v3586_v60  ;;  %v3242_v33 = vadd.f32 %v3241_v5, %v3112_v34  ;;  %v3941_v13 = vld [vmem:[#allocation4 + $0x43] sm:$0xff]  ;;  %v4285_v54 = vld [vmem:[#allocation4 + $0x2c] sm:$0xff]  ;;  %v6671_v34 = vld [vmem:[%s10935_s5 + $0x1e0] sm:$0xff] }
 0x39f   : > { %v3243_v42 = vpop.f32.mrf.mxu1  ;;  %v3769_v48 = vld [vmem:[#allocation4 + $0x52] sm:$0x3f]  ;;  %v6672_v23 = vld [vmem:[%s10935_s5 + $0x1e8] sm:$0xff]  ;;  %v6691_v36 = vld [vmem:[%s10935_s5 + $0x230] sm:$0xff] }
 0x3a0   : > { %3258 = vst.msk [vmem:[#allocation4 + $0x60] sm:$0xf] %vm3257_vm8, %v3242_v33  ;;  %v6690_v0 = vld [vmem:[%s10935_s5 + $0x228] sm:$0xff]  ;;  %v6670_v3 = vld [vmem:[%s10935_s5 + $0x1d8] sm:$0xff]  ;;  %v6689_v19 = vld [vmem:[%s10935_s5 + $0x220] sm:$0xff] }
 0x3a1   : > { %8100 = vmatmul.mubr.msk.f32.vlgmr.msra.gmra.mxu1 %vm2477_vm4, %v3588_v28  ;;  %8069 = vmatmul.mubr.msk.f32.vlgmr.msra.gmra.mxu0 %vm2477_vm4, %v3587_v6  ;;  %v4287_v50 = vld [vmem:[#allocation4 + $0x3c] sm:$0xff]  ;;  %v4115_v6 = vld [vmem:[#allocation4 + $0x44] sm:$0xff]  ;;  %v6688_v5 = vld [vmem:[%s10935_s5 + $0x218] sm:$0xff] }
 0x3a2   : > { %8102 = vmatprep.mubr.msk.f32.mxu1 %vm2477_vm4, %v3589_v32  ;;  %8071 = vmatprep.mubr.msk.f32.mxu0 %vm2477_vm4, %v3588_v28  ;;  %v6669_v60 = vld [vmem:[%s10935_s5 + $0x1d0] sm:$0xff]  ;;  %v6668_v28 = vld [vmem:[%s10935_s5 + $0x1c8] sm:$0xff] }
 0x3a3   : > { %8115 = vmatpush3.msra.mxu0 %v10121_v47  ;;  %8146 = vmatpush3.msra.mxu1 %v6638_v35  ;;  %v3768_v47 = vld [vmem:[#allocation4 + $0x4a] sm:$0xff]  ;;  %v3943_v56 = vld [vmem:[#allocation4 + $0x53] sm:$0x3f] }
 0x3a4   : > { %8116 = vmatprep.subr.mxu0 %v6619_v30  ;;  %8147 = vmatprep.subr.mxu1 %v6637_v15  ;;  %v3942_v35 = vld [vmem:[#allocation4 + $0x4b] sm:$0xff] }
 0x3a5   : > { %8117 = vmatpush3.msra.mxu0 %v6619_v30  ;;  %8103 = vmatmul.mubr.msk.f32.gmra.mxu1 %vm2477_vm4, %v3590_v57  ;;  %v4289_v33 = vld [vmem:[#allocation4 + $0x4c] sm:$0xff]  ;;  %v4290_v30 = vld [vmem:[#allocation4 + $0x54] sm:$0xff] }
 0x3a6   : > { %8072 = vmatmul.mubr.msk.f32.gmra.mxu0 %vm2477_vm4, %v3589_v32  ;;  %8118 = vmatprep.subr.mxu0 %v6618_v9  ;;  %v6687_v42 = vld [vmem:[%s10935_s5 + $0x210] sm:$0xff]  ;;  %v4117_v32 = vld [vmem:[#allocation4 + $0x54] sm:$0x3f] }
 0x3a7   : > { %8074 = vmatprep.mubr.msk.f32.mxu0 %vm2477_vm4, %v3590_v57  ;;  %8119 = vmatpush3.msra.mxu0 %v6618_v9  ;;  %v6667_v9 = vld [vmem:[%s10935_s5 + $0x1c0] sm:$0xff]  ;;  %v6686_v57 = vld [vmem:[%s10935_s5 + $0x208] sm:$0xff] }
 0x3a8   : > { %8120 = vmatprep.subr.mxu0 %v6617_v29  ;;  %8105 = vmatprep.mubr.msk.f32.mxu1 %vm2477_vm4, %v3591_v59 }
 0x3a9   : > { %8121 = vmatpush3.msra.mxu0 %v6617_v29  ;;  %8148 = vmatpush3.msra.mxu1 %v6637_v15  ;;  %v4291_v29 = vld [vmem:[#allocation4 + $0x5c] sm:$0x3f] }
 0x3aa   : > { %8075 = vmatmul.mubr.msk.f32.gmra.mxu0 %vm2477_vm4, %v3591_v59  ;;  %8122 = vmatprep.subr.mxu0 %v6616_v63  ;;  %v6685_v15 = vld [vmem:[%s10935_s5 + $0x200] sm:$0xff] }
 0x3ab   : > { %8077 = vmatprep.mubr.msk.f32.mxu0 %vm2477_vm4, %v3592_v12  ;;  %8123 = vmatpush3.msra.mxu0 %v6616_v63  ;;  %v4456_v63 = vld [vmem:[#allocation4 + $0x15] sm:$0xff]  ;;  %v4457_v59 = vld [vmem:[#allocation4 + $0x1d] sm:$0xff] }
 0x3ac   : > { %8124 = vmatprep.subr.mxu0 %v6615_v22  ;;  %8106 = vmatmul.mubr.msk.f32.gmra.mxu1 %vm2477_vm4, %v3592_v12  ;;  %v4631_v12 = vld [vmem:[#allocation4 + $0x1e] sm:$0xff] }
 0x3ad   : > { %8125 = vmatpush3.msra.mxu0 %v6615_v22  ;;  %8149 = vmatprep.subr.mxu1 %v6636_v53  ;;  %v4630_v22 = vld [vmem:[#allocation4 + $0x16] sm:$0xff] }
 0x3ae   : > { %8078 = vmatmul.mubr.msk.f32.gmra.mxu0 %vm2477_vm4, %v3593_v40  ;;  %8126 = vmatprep.subr.mxu0 %v6614_v8 }
 0x3af   : > { %8080 = vmatprep.mubr.msk.f32.mxu0 %vm2477_vm4, %v3594_v27  ;;  %8127 = vmatpush3.msra.mxu0 %v6614_v8  ;;  %v4458_v8 = vld [vmem:[#allocation4 + $0x25] sm:$0xff] }
 0x3b0   : > { %8128 = vmatprep.subr.mxu0 %v6613_v31  ;;  %8150 = vmatpush3.msra.mxu1 %v6636_v53  ;;  %v4460_v53 = vld [vmem:[#allocation4 + $0x35] sm:$0xff] }
 0x3b1   : > { %8129 = vmatpush3.msra.mxu0 %v6613_v31  ;;  %8151 = vmatprep.subr.mxu1 %v6635_v11  ;;  %v4459_v31 = vld [vmem:[#allocation4 + $0x2d] sm:$0xff] }
 0x3b2   : > { %8081 = vmatmul.mubr.msk.f32.gmra.mxu0 %vm2477_vm4, %v3595_v10  ;;  %8176 = vmatprep.subr.mxu0 %v6656_v18  ;;  %v4462_v10 = vld [vmem:[#allocation4 + $0x45] sm:$0xff] }
 0x3b3   : > { %8130 = vmatprep.mubr.msk.f32.mxu0 %vm2477_vm4, %v3934_v39  ;;  %8108 = vmatprep.mubr.msk.f32.mxu1 %vm2477_vm4, %v3593_v40  ;;  %v4632_v40 = vld [vmem:[#allocation4 + $0x26] sm:$0xff]  ;;  %v4635_v39 = vld [vmem:[#allocation4 + $0x3e] sm:$0xff] }
 0x3b4   : > { %8152 = vmatpush3.msra.mxu1 %v6635_v11  ;;  %v4461_v11 = vld [vmem:[#allocation4 + $0x3d] sm:$0xff] }
 0x3b5   : > { %8109 = vmatmul.mubr.msk.f32.gmra.mxu1 %vm2477_vm4, %v3594_v27  ;;  %8153 = vmatprep.subr.mxu1 %v6634_v44  ;;  %v4633_v27 = vld [vmem:[#allocation4 + $0x2e] sm:$0xff] }
 0x3b6   : > { %8131 = vmatmul.mubr.msk.f32.vlgmr.msra.gmra.mxu0 %vm2477_vm4, %v3935_v49  ;;  %8154 = vmatpush3.msra.mxu1 %v6634_v44  ;;  %v4636_v44 = vld [vmem:[#allocation4 + $0x46] sm:$0xff] }
 0x3b7   : > { %8133 = vmatprep.mubr.msk.f32.mxu0 %vm2477_vm4, %v3936_v16  ;;  %8177 = vmatpush3.msra.mxu0 %v6656_v18  ;;  %v4634_v18 = vld [vmem:[#allocation4 + $0x36] sm:$0xff]  ;;  %v4463_v49 = vld [vmem:[#allocation4 + $0x4d] sm:$0xff] }
 0x3b8   : > { %8178 = vmatprep.subr.mxu0 %v6655_v55  ;;  %8155 = vmatprep.subr.mxu1 %v6633_v41  ;;  %v4638_v16 = vld [vmem:[#allocation4 + $0x56] sm:$0xff] }
 0x3b9   : > { %8179 = vmatpush3.msra.mxu0 %v6655_v55  ;;  %8111 = vmatprep.mubr.msk.f32.mxu1 %vm2477_vm4, %v3768_v47  ;;  %v4464_v55 = vld [vmem:[#allocation4 + $0x55] sm:$0xff]  ;;  %v4639_v47 = vld [vmem:[#allocation4 + $0x5e] sm:$0x3f] }
 0x3ba   : > { %8134 = vmatmul.mubr.msk.f32.gmra.mxu0 %vm2477_vm4, %v3937_v21  ;;  %8180 = vmatprep.subr.mxu0 %v6654_v62 }
 0x3bb   : > { %8136 = vmatprep.mubr.msk.f32.mxu0 %vm2477_vm4, %v3938_v52  ;;  %8181 = vmatpush3.msra.mxu0 %v6654_v62  ;;  %v4465_v62 = vld [vmem:[#allocation4 + $0x5d] sm:$0x3f] }
 0x3bc   : > { %8182 = vmatprep.subr.mxu0 %v6653_v26  ;;  %8156 = vmatpush3.msra.mxu1 %v6633_v41  ;;  %v4637_v41 = vld [vmem:[#allocation4 + $0x4e] sm:$0xff] }
 0x3bd   : > { %8183 = vmatpush3.msra.mxu0 %v6653_v26  ;;  %8112 = vmatmul.mubr.msk.f32.gmra.mxu1 %vm2477_vm4, %v3769_v48 }
 0x3be   : > { %8137 = vmatmul.mubr.msk.f32.gmra.mxu0 %vm2477_vm4, %v3939_v38  ;;  %8184 = vmatprep.subr.mxu0 %v6652_v17 }
 0x3bf   : > { %8139 = vmatprep.mubr.msk.f32.mxu0 %vm2477_vm4, %v3940_v2  ;;  %8185 = vmatpush3.msra.mxu0 %v6652_v17 }
 0x3c0   : > { %8157 = vmatprep.subr.mxu1 %v6632_v20  ;;  %8186 = vmatprep.subr.mxu0 %v6651_v7 }
 0x3c1   : > { %8158 = vmatpush3.msra.mxu1 %v6632_v20  ;;  %8187 = vmatpush3.msra.mxu0 %v6651_v7 }
 0x3c2   : > { %8140 = vmatmul.mubr.msk.f32.gmra.mxu0 %vm2477_vm4, %v3941_v13  ;;  %8159 = vmatprep.subr.mxu1 %v6631_v46 }
 0x3c3   : > { %8142 = vmatprep.mubr.msk.f32.mxu0 %vm2477_vm4, %v3942_v35  ;;  %8188 = vmatprep.subr.mxu0 %v6650_v58 }
 0x3c4   : > { %8160 = vmatpush3.msra.mxu1 %v6631_v46  ;;  %8161 = vmatprep.mubr.msk.f32.mxu1 %vm2477_vm4, %v4108_v61 }
 0x3c5   : > { %8189 = vmatpush3.msra.mxu0 %v6650_v58  ;;  %8162 = vmatmul.mubr.msk.f32.vlgmr.msra.gmra.mxu1 %vm2477_vm4, %v4109_v25  ;;  %v4878_v58 = vld [vmem:[%s10937_s7] sm:$0xff] }
 0x3c6   : > { %8143 = vmatmul.mubr.msk.f32.gmra.mxu0 %vm2477_vm4, %v3943_v56  ;;  %8190 = vmatprep.subr.mxu0 %v6649_v4 }
 0x3c7   : > { %8191 = vmatpush3.msra.mxu0 %v6649_v4  ;;  %8192 = vmatprep.mubr.msk.f32.mxu0 %vm2477_vm4, %v4109_v25 }
 0x3c8   : > { %8164 = vmatprep.mubr.msk.f32.mxu1 %vm2477_vm4, %v4283_v24  ;;  %8207 = vmatprep.subr.mxu1 %v6674_v37 }
 0x3c9   : > { %8165 = vmatmul.mubr.msk.f32.gmra.mxu1 %vm2477_vm4, %v4111_v51  ;;  %8238 = vmatprep.subr.mxu0 %v6692_v43 }
 0x3ca   : > { %8193 = vmatmul.mubr.msk.f32.vlgmr.msra.gmra.mxu0 %vm2477_vm4, %v4283_v24  ;;  %8208 = vmatpush3.msra.mxu1 %v6674_v37 }
 0x3cb   : > { %8195 = vmatprep.mubr.msk.f32.mxu0 %vm2477_vm4, %v4111_v51  ;;  %8209 = vmatprep.subr.mxu1 %v6673_v45 }
 0x3cc   : > { %8167 = vmatprep.mubr.msk.f32.mxu1 %vm2477_vm4, %v4285_v54  ;;  %8210 = vmatpush3.msra.mxu1 %v6673_v45 }
 0x3cd   : > { %8239 = vmatpush3.msra.mxu0 %v6692_v43  ;;  %8168 = vmatmul.mubr.msk.f32.gmra.mxu1 %vm2477_vm4, %v4113_v14 }
 0x3ce   : > { %8196 = vmatmul.mubr.msk.f32.gmra.mxu0 %vm2477_vm4, %v4285_v54  ;;  %8211 = vmatprep.subr.mxu1 %v6672_v23 }
 0x3cf   : > { %8240 = vmatprep.subr.mxu0 %v6691_v36  ;;  %8198 = vmatprep.mubr.msk.f32.mxu0 %vm2477_vm4, %v4113_v14 }
 0x3d0   : > { %8212 = vmatpush3.msra.mxu1 %v6672_v23  ;;  %8241 = vmatpush3.msra.mxu0 %v6691_v36 }
 0x3d1   : > { %8213 = vmatprep.subr.mxu1 %v6671_v34  ;;  %8242 = vmatprep.subr.mxu0 %v6690_v0 }
 0x3d2   : > { %8199 = vmatmul.mubr.msk.f32.gmra.mxu0 %vm2477_vm4, %v4287_v50  ;;  %8170 = vmatprep.mubr.msk.f32.mxu1 %vm2477_vm4, %v4287_v50 }
 0x3d3   : > { %8214 = vmatpush3.msra.mxu1 %v6671_v34  ;;  %8243 = vmatpush3.msra.mxu0 %v6690_v0 }
 0x3d4   : > { %8171 = vmatmul.mubr.msk.f32.gmra.mxu1 %vm2477_vm4, %v4115_v6  ;;  %8215 = vmatprep.subr.mxu1 %v6670_v3 }
 0x3d5   : > { %8244 = vmatprep.subr.mxu0 %v6689_v19  ;;  %8201 = vmatprep.mubr.msk.f32.mxu0 %vm2477_vm4, %v4115_v6 }
 0x3d6   : > { %8216 = vmatpush3.msra.mxu1 %v6670_v3  ;;  %8245 = vmatpush3.msra.mxu0 %v6689_v19 }
 0x3d7   : > { %8202 = vmatmul.mubr.msk.f32.gmra.mxu0 %vm2477_vm4, %v4289_v33  ;;  %8217 = vmatprep.subr.mxu1 %v6669_v60 }
 0x3d8   : > { %8246 = vmatprep.subr.mxu0 %v6688_v5  ;;  %8173 = vmatprep.mubr.msk.f32.mxu1 %vm2477_vm4, %v4289_v33 }
 0x3d9   : > { %8218 = vmatpush3.msra.mxu1 %v6669_v60  ;;  %8247 = vmatpush3.msra.mxu0 %v6688_v5 }
 0x3da   : > { %8174 = vmatmul.mubr.msk.f32.gmra.mxu1 %vm2477_vm4, %v4117_v32  ;;  %8219 = vmatprep.subr.mxu1 %v6668_v28 }
 0x3db   : > { %8248 = vmatprep.subr.mxu0 %v6687_v42  ;;  %8204 = vmatprep.mubr.msk.f32.mxu0 %vm2477_vm4, %v4290_v30 }
 0x3dc   : > { %8220 = vmatpush3.msra.mxu1 %v6668_v28  ;;  %8249 = vmatpush3.msra.mxu0 %v6687_v42 }
 0x3dd   : > { %8205 = vmatmul.mubr.msk.f32.gmra.mxu0 %vm2477_vm4, %v4291_v29  ;;  %8221 = vmatprep.subr.mxu1 %v6667_v9 }
 0x3de   : > { %8250 = vmatprep.subr.mxu0 %v6686_v57  ;;  %8222 = vmatpush3.msra.mxu1 %v6667_v9 }
 0x3df   : > { %8223 = vmatprep.mubr.msk.f32.mxu1 %vm2477_vm4, %v4456_v63  ;;  %8251 = vmatpush3.msra.mxu0 %v6686_v57 }
 0x3e0   : > { %8224 = vmatmul.mubr.msk.f32.vlgmr.msra.gmra.mxu1 %vm2477_vm4, %v4457_v59  ;;  %8252 = vmatprep.subr.mxu0 %v6685_v15 }
 0x3e1   : > { %8253 = vmatpush3.msra.mxu0 %v6685_v15  ;;  %8254 = vmatprep.mubr.msk.f32.mxu0 %vm2477_vm4, %v4630_v22 }
 0x3e2   : > { %8255 = vmatmul.mubr.msk.f32.vlgmr.msra.gmra.mxu0 %vm2477_vm4, %v4631_v12  ;;  %8226 = vmatprep.mubr.msk.f32.mxu1 %vm2477_vm4, %v4458_v8 }
 0x3e3   : > { %8257 = vmatprep.mubr.msk.f32.mxu0 %vm2477_vm4, %v4632_v40  ;;  %8309 = vmatprep.subr.mxu0 %v10950_v1 }
 0x3e4   : > { %8227 = vmatmul.mubr.msk.f32.gmra.mxu1 %vm2477_vm4, %v4459_v31 }
 0x3e5   : > { %8229 = vmatprep.mubr.msk.f32.mxu1 %vm2477_vm4, %v4460_v53 }
 0x3e6   : > { %8258 = vmatmul.mubr.msk.f32.gmra.mxu0 %vm2477_vm4, %v4633_v27 }
 0x3e7   : > { %8260 = vmatprep.mubr.msk.f32.mxu0 %vm2477_vm4, %v4634_v18 }
 0x3e8   : > { %8230 = vmatmul.mubr.msk.f32.gmra.mxu1 %vm2477_vm4, %v4461_v11 }
 0x3e9   : > { %8232 = vmatprep.mubr.msk.f32.mxu1 %vm2477_vm4, %v4462_v10 }
 0x3ea   : > { %8261 = vmatmul.mubr.msk.f32.gmra.mxu0 %vm2477_vm4, %v4635_v39 }
 0x3eb   : > { %8263 = vmatprep.mubr.msk.f32.mxu0 %vm2477_vm4, %v4636_v44 }
 0x3ec   : > { %8233 = vmatmul.mubr.msk.f32.gmra.mxu1 %vm2477_vm4, %v4463_v49 }
 0x3ed   : > { %8235 = vmatprep.mubr.msk.f32.mxu1 %vm2477_vm4, %v4464_v55 }
 0x3ee   : > { %8264 = vmatmul.mubr.msk.f32.gmra.mxu0 %vm2477_vm4, %v4637_v41 }
 0x3ef   : > { %8266 = vmatprep.mubr.msk.f32.mxu0 %vm2477_vm4, %v4638_v16 }
 0x3f0   : > { %8236 = vmatmul.mubr.msk.f32.gmra.mxu1 %vm2477_vm4, %v4465_v62 }
 0x3f1   : > { %8287 = vmatprep.mubr.msk.f32.mxu1 %vm4887_vm9, %v4878_v58 }
 0x3f2   : > { %8267 = vmatmul.mubr.msk.f32.gmra.mxu0 %vm2477_vm4, %v4639_v47 }
 0x3f3   : > { %8325 = vmatprep.mubr.msk.f32.mxu0 %vm8542_vm1, %v10950_v1 }
 0x43d   : > { %v8039_v21 = vpop.f32.mrf.mxu1 }
 0x43f   : > { %v3537_v52 = vpop.f32.mrf.mxu1 }
 0x440   : > { %v8008_v26 = vpop.f32.mrf.mxu0 }
 0x441   : > { %v3543_v41 = vadd.f32 %v8039_v21, %v8008_v26 }
 0x442   : > { %v3392_v48 = vpop.f32.mrf.mxu0 }
 0x443   : > { %v3538_v47 = vadd.f32 %v3537_v52, %v3392_v48 }
 0x445   : > { %v10337_v17 = vpop.f32.mrf.mxu1 }
 0x447   : > { %v10339_v20 = vpop.f32.mrf.mxu1 }
 0x449   : > { %v8011_v38 = vpop.f32.mrf.mxu0 }
 0x44b   : > { %v10341_v7 = vpop.f32.mrf.mxu0 }
 0x44d   : > { %v10343_v2 = vpop.f32.mrf.mxu1 }
 0x44f   : > { %v10350_v13 = vpop.f32.mrf.mxu1 }
 0x451   : > { %v10345_v46 = vpop.f32.mrf.mxu0 }
 0x452   : > { %v3563_v21 = vadd.f32 %v10343_v2, %v10345_v46 }
 0x453   : > { %v10353_v35 = vpop.f32.mrf.mxu0 }
 0x455   : > { %v10355_v61 = vpop.f32.mrf.mxu1 }
 0x457   : > { %v10361_v56 = vpop.f32.mrf.mxu1 }
 0x458   : > { %v10357_v4 = vpop.f32.mrf.mxu0 }
 0x45a   : > { %v10359_v25 = vpop.f32.mrf.mxu0 }
 0x45d   : > { %v10363_v37 = vpop.f32.mrf.mxu1  ;;  %v10365_v43 = vpop.f32.mrf.mxu0 }
 0x45f   : > { %v10367_v24 = vpop.f32.mrf.mxu1  ;;  %v10369_v51 = vpop.f32.mrf.mxu0 }
 0x461   : > { %v8101_v45 = vpop.f32.mrf.mxu1  ;;  %v8070_v54 = vpop.f32.mrf.mxu0 }
 0x462   : > { %v3751_v58 = vadd.f32 %v8070_v54, %v3543_v41 }
 0x463   : > { %v3875_v23 = vpop.f32.mrf.mxu1  ;;  %v3701_v14 = vpop.f32.mrf.mxu0 }
 0x465   : > { %v8104_v36 = vpop.f32.mrf.mxu1 }
 0x466   : > { %v8073_v34 = vpop.f32.mrf.mxu0 }
 0x467   : > { %v3885_v50 = vpop.f32.mrf.mxu1 }
 0x468   : > { %v3711_v0 = vpop.f32.mrf.mxu0 }
 0x46a   : > { %v8076_v3 = vpop.f32.mrf.mxu0 }
 0x46c   : > { %v3721_v19 = vpop.f32.mrf.mxu0  ;;  %v8107_v6 = vpop.f32.mrf.mxu1 }
 0x46e   : > { %v8079_v60 = vpop.f32.mrf.mxu0  ;;  %v10373_v33 = vpop.f32.mrf.mxu1 }
 0x470   : > { %v10371_v5 = vpop.f32.mrf.mxu0 }
 0x472   : > { %v10375_v28 = vpop.f32.mrf.mxu0 }
 0x474   : > { %v10377_v42 = vpop.f32.mrf.mxu0 }
 0x475   : > { %10965 = vst [vmem:[#allocation8_spill] sm:$0xff] %v10377_v42  ;;  %v10379_v32 = vpop.f32.mrf.mxu1 }
 0x476   : > { %v8132_v30 = vpop.f32.mrf.mxu0 }
 0x477   : > { %v10381_v57 = vpop.f32.mrf.mxu1 }
 0x478   : > { %v4049_v9 = vpop.f32.mrf.mxu0  ;;  %10966 = vst [vmem:[#allocation9_spill] sm:$0xff] %v10381_v57  ;;  %v3925_v57 = vadd.f32 %v8101_v45, %v3751_v58 }
 0x47a   : > { %v8135_v29 = vpop.f32.mrf.mxu0  ;;  %v4099_v48 = vadd.f32 %v8132_v30, %v3925_v57 }
 0x47c   : > { %v4059_v15 = vpop.f32.mrf.mxu0 }
 0x47d   : > { %v10383_v63 = vpop.f32.mrf.mxu1 }
 0x47e   : > { %10967 = vst [vmem:[#allocation10_spill] sm:$0xff] %v10383_v63  ;;  %v8138_v59 = vpop.f32.mrf.mxu0 }
 0x47f   : > { %v10387_v12 = vpop.f32.mrf.mxu1 }
 0x480   : > { %v10385_v22 = vpop.f32.mrf.mxu0  ;;  %10968 = vst [vmem:[#allocation11_spill] sm:$0xff] %v10387_v12  ;;  %v3553_v12 = vadd.f32 %v10337_v17, %v8011_v38  ;;  %v3558_v17 = vadd.f32 %v10350_v13, %v10353_v35  ;;  %v3755_v38 = vadd.f32 %v8076_v3, %v3563_v21 }
 0x482   : > { %v10389_v8 = vpop.f32.mrf.mxu0  ;;  %v3754_v45 = vadd.f32 %v3721_v19, %v3558_v17  ;;  %v3929_v13 = vadd.f32 %v8107_v6, %v3755_v38 }
 0x483   : > { %10969 = vst [vmem:[#allocation12_spill] sm:$0xff] %v10389_v8  ;;  %v3753_v8 = vadd.f32 %v8073_v34, %v3553_v12  ;;  %v3568_v34 = vadd.f32 %v10361_v56, %v10359_v25  ;;  %v3578_v25 = vadd.f32 %v10367_v24, %v10369_v51 }
 0x484   : > { %v10391_v40 = vpop.f32.mrf.mxu0  ;;  %v4103_v19 = vadd.f32 %v8138_v59, %v3929_v13 }
 0x485   : > { %10970 = vst [vmem:[#allocation13_spill] sm:$0xff] %v10391_v40  ;;  %v8163_v31 = vpop.f32.mrf.mxu1  ;;  %v3750_v40 = vadd.f32 %v3701_v14, %v3538_v47  ;;  %v3927_v14 = vadd.f32 %v8104_v36, %v3753_v8 }
 0x486   : > { %v10393_v53 = vpop.f32.mrf.mxu0 }
 0x487   : > { %10971 = vst [vmem:[#allocation14_spill] sm:$0xff] %v10393_v53  ;;  %v4223_v27 = vpop.f32.mrf.mxu1  ;;  %v3924_v52 = vadd.f32 %v3875_v23, %v3750_v40  ;;  %v4101_v46 = vadd.f32 %v8135_v29, %v3927_v14  ;;  %v4273_v23 = vadd.f32 %v8163_v31, %v4099_v48  ;;  %v10978_v17 = vld [vmem:[#allocation11_spill] sm:$0xff] }
 0x488   : > { %v10395_v18 = vpop.f32.mrf.mxu0 }
 0x489   : > { %10972 = vst [vmem:[#allocation15_spill] sm:$0xff] %v10395_v18  ;;  %v8166_v11 = vpop.f32.mrf.mxu1  ;;  %v3548_v18 = vadd.f32 %v10339_v20, %v10341_v7  ;;  %v4098_v41 = vadd.f32 %v4049_v9, %v3924_v52  ;;  %v3573_v20 = vadd.f32 %v10355_v61, %v10357_v4  ;;  %v3583_v61 = vadd.f32 %v10363_v37, %v10365_v43 }
 0x48a   : > { %v8194_v10 = vpop.f32.mrf.mxu0  ;;  %v3756_v4 = vadd.f32 %v10371_v5, %v3568_v34  ;;  %v4275_v57 = vadd.f32 %v8166_v11, %v4101_v46  ;;  %v10973_v5 = vld [vmem:[#allocation8_spill] sm:$0xff] }
 0x48b   : > { %v4233_v39 = vpop.f32.mrf.mxu1  ;;  %v3752_v26 = vadd.f32 %v3711_v0, %v3548_v18  ;;  %v3757_v0 = vadd.f32 %v8079_v60, %v3573_v20  ;;  %v4272_v36 = vadd.f32 %v4223_v27, %v4098_v41  ;;  %v4447_v3 = vadd.f32 %v8194_v10, %v4273_v23  ;;  %v10975_v31 = vld [vmem:[#allocation12_spill] sm:$0xff] }
 0x48c   : > { %v4397_v44 = vpop.f32.mrf.mxu0  ;;  %v3759_v56 = vadd.f32 %v10375_v28, %v3583_v61  ;;  %v3758_v40 = vadd.f32 %v10973_v5, %v3578_v25  ;;  %v10977_v58 = vld [vmem:[#allocation13_spill] sm:$0xff] }
 0x48d   : > { %v8169_v49 = vpop.f32.mrf.mxu1  ;;  %v3926_v2 = vadd.f32 %v3885_v50, %v3752_v26  ;;  %v3928_v50 = vadd.f32 %v10373_v33, %v3754_v45  ;;  %v4446_v29 = vadd.f32 %v4397_v44, %v4272_v36  ;;  %v3931_v6 = vadd.f32 %v10379_v32, %v3757_v0  ;;  %v10974_v33 = vld [vmem:[#allocation9_spill] sm:$0xff]  ;;  %v10976_v44 = vld [vmem:[#allocation10_spill] sm:$0xff] }
 0x48e   : > { %v8197_v55 = vpop.f32.mrf.mxu0  ;;  %v3930_v59 = vadd.f32 %v10974_v33, %v3756_v4  ;;  %v4277_v10 = vadd.f32 %v8169_v49, %v4103_v19  ;;  %v3933_v32 = vadd.f32 %v10976_v44, %v3759_v56  ;;  %v3932_v38 = vadd.f32 %v10978_v17, %v3758_v40  ;;  %v10979_v14 = vld [vmem:[#allocation14_spill] sm:$0xff] }
 0x48f   : > { %v10397_v62 = vpop.f32.mrf.mxu1  ;;  %v4100_v35 = vadd.f32 %v4059_v15, %v3926_v2  ;;  %v4102_v15 = vadd.f32 %v10385_v22, %v3928_v50  ;;  %v4449_v37 = vadd.f32 %v8197_v55, %v4275_v57  ;;  %v4105_v27 = vadd.f32 %v10975_v31, %v3931_v6 }
 0x490   : > { %v4407_v16 = vpop.f32.mrf.mxu0  ;;  %v4104_v21 = vadd.f32 %v10977_v58, %v3930_v59  ;;  %v4107_v49 = vadd.f32 %v10979_v14, %v3933_v32 }
 0x491   : > { %v4274_v8 = vadd.f32 %v4233_v39, %v4100_v35  ;;  %v4276_v55 = vadd.f32 %v10397_v62, %v4102_v15  ;;  %v10980_v62 = vld [vmem:[#allocation15_spill] sm:$0xff] }
 0x492   : > { %v8200_v1 = vpop.f32.mrf.mxu0 }
 0x493   : > { %v4448_v24 = vadd.f32 %v4407_v16, %v4274_v8  ;;  %v4451_v26 = vadd.f32 %v8200_v1, %v4277_v10  ;;  %v4106_v1 = vadd.f32 %v10980_v62, %v3932_v38 }
 0x494   : > { %v10400_v53 = vpop.f32.mrf.mxu1  ;;  %v10402_v63 = vpop.f32.mrf.mxu0 }
 0x495   : > { %v4279_v20 = vadd.f32 %v10400_v53, %v4105_v27  ;;  %v4450_v45 = vadd.f32 %v10402_v63, %v4276_v55 }
 0x496   : > { %v10406_v42 = vpop.f32.mrf.mxu1 }
 0x497   : > { %v10410_v54 = vpop.f32.mrf.mxu0  ;;  %v4278_v0 = vadd.f32 %v10406_v42, %v4104_v21 }
 0x498   : > { %v4453_v13 = vadd.f32 %v10410_v54, %v4279_v20 }
 0x499   : > { %v10414_v47 = vpop.f32.mrf.mxu0 }
 0x49a   : > { %v10418_v7 = vpop.f32.mrf.mxu1  ;;  %v4452_v61 = vadd.f32 %v10414_v47, %v4278_v0 }
 0x49b   : > { %v4281_v63 = vadd.f32 %v10418_v7, %v4107_v49 }
 0x49c   : > { %v10422_v30 = vpop.f32.mrf.mxu1 }
 0x49d   : > { %v8206_v9 = vpop.f32.mrf.mxu0  ;;  %v4280_v42 = vadd.f32 %v10422_v30, %v4106_v1 }
 0x49f   : > { %v4437_v12 = vpop.f32.mrf.mxu0 }
 0x4a0   : > { %v8225_v60 = vpop.f32.mrf.mxu1 }
 0x4a1   : > { %v4621_v43 = vadd.f32 %v8225_v60, %v4447_v3  ;;  %v4454_v60 = vadd.f32 %v4437_v12, %v4280_v42 }
 0x4a2   : > { %v4571_v18 = vpop.f32.mrf.mxu1  ;;  %v8256_v11 = vpop.f32.mrf.mxu0 }
 0x4a3   : > { %v4620_v51 = vadd.f32 %v4571_v18, %v4446_v29  ;;  %v4795_v28 = vadd.f32 %v8256_v11, %v4621_v43  ;;  %v4455_v29 = vadd.f32 %v8206_v9, %v4281_v63 }
 0x4a4   : > { %v8228_v22 = vpop.f32.mrf.mxu1  ;;  %v4745_v39 = vpop.f32.mrf.mxu0 }
 0x4a5   : > { %4805 = vst.msk [vmem:[#allocation3 + $0x8] sm:$0xff] %vm2477_vm4, %v4795_v28  ;;  %v4623_v52 = vadd.f32 %v8228_v22, %v4449_v37  ;;  %v4794_v48 = vadd.f32 %v4745_v39, %v4620_v51 }
 0x4a6   : > { %v4581_v16 = vpop.f32.mrf.mxu1  ;;  %v8259_v41 = vpop.f32.mrf.mxu0 }
 0x4a7   : > { %4804 = vst.msk [vmem:[#allocation3] sm:$0xff] %vm2477_vm4, %v4794_v48  ;;  %v4622_v2 = vadd.f32 %v4581_v16, %v4448_v24  ;;  %v4797_v46 = vadd.f32 %v8259_v41, %v4623_v52 }
 0x4a8   : > { %v8231_v23 = vpop.f32.mrf.mxu1  ;;  %v4755_v34 = vpop.f32.mrf.mxu0 }
 0x4a9   : > { %4807 = vst.msk [vmem:[#allocation3 + $0x18] sm:$0xff] %vm2477_vm4, %v4797_v46  ;;  %v4625_v35 = vadd.f32 %v8231_v23, %v4451_v26  ;;  %v4796_v36 = vadd.f32 %v4755_v34, %v4622_v2 }
 0x4aa   : > { %v4591_v3 = vpop.f32.mrf.mxu1  ;;  %v8262_v53 = vpop.f32.mrf.mxu0 }
 0x4ab   : > { %4806 = vst.msk [vmem:[#allocation3 + $0x10] sm:$0xff] %vm2477_vm4, %v4796_v36  ;;  %v4624_v4 = vadd.f32 %v4591_v3, %v4450_v45  ;;  %v4799_v50 = vadd.f32 %v8262_v53, %v4625_v35 }
 0x4ac   : > { %v8234_v19 = vpop.f32.mrf.mxu1  ;;  %v4765_v57 = vpop.f32.mrf.mxu0 }
 0x4ad   : > { %4809 = vst.msk [vmem:[#allocation3 + $0x28] sm:$0xff] %vm2477_vm4, %v4799_v50  ;;  %v4627_v54 = vadd.f32 %v8234_v19, %v4453_v13  ;;  %v4798_v25 = vadd.f32 %v4765_v57, %v4624_v4 }
 0x4ae   : > { %v4601_v56 = vpop.f32.mrf.mxu1  ;;  %v8265_v6 = vpop.f32.mrf.mxu0 }
 0x4af   : > { %4808 = vst.msk [vmem:[#allocation3 + $0x20] sm:$0xff] %vm2477_vm4, %v4798_v25  ;;  %v4626_v7 = vadd.f32 %v4601_v56, %v4452_v61  ;;  %v4801_v47 = vadd.f32 %v8265_v6, %v4627_v54  ;;  %v4816_v56 = vld [vmem:[#allocation3 + $0x8] sm:$0xff] }
 0x4b0   : > { %v8237_v15 = vpop.f32.mrf.mxu1  ;;  %v4775_v8 = vpop.f32.mrf.mxu0  ;;  %v4818_v35 = vld [vmem:[#allocation3 + $0x18] sm:$0xff] }
 0x4b1   : > { %4811 = vst.msk [vmem:[#allocation3 + $0x38] sm:$0xff] %vm2477_vm4, %v4801_v47  ;;  %v4629_v37 = vadd.f32 %v8237_v15, %v4455_v29  ;;  %v4800_v43 = vadd.f32 %v4775_v8, %v4626_v7 }
 0x4b2   : > { %v4611_v5 = vpop.f32.mrf.mxu1  ;;  %v8268_v30 = vpop.f32.mrf.mxu0  ;;  %v4817_v50 = vld [vmem:[#allocation3 + $0x10] sm:$0xff] }
 0x4b3   : > { %4810 = vst.msk [vmem:[#allocation3 + $0x30] sm:$0xff] %vm2477_vm4, %v4800_v43  ;;  %v4628_v9 = vadd.f32 %v4611_v5, %v4454_v60  ;;  %v4803_v40 = vadd.f32 %v8268_v30, %v4629_v37  ;;  %v4826_v19 = vld [vmem:[#allocation3 + $0x11] sm:$0xff]  ;;  %v4825_v57 = vld [vmem:[#allocation3 + $0x9] sm:$0xff]  ;;  %v4815_v37 = vld [vmem:[#allocation3] sm:$0xff] }
 0x4b4   : > { %v4785_v33 = vpop.f32.mrf.mxu0  ;;  %v4820_v14 = vld [vmem:[#allocation3 + $0x28] sm:$0xff]  ;;  %v4843_v42 = vld [vmem:[#allocation3 + $0x12] sm:$0xff]  ;;  %v4835_v47 = vmax.f32 %v4817_v50, %v4826_v19  ;;  %v4834_v15 = vmax.f32 %v4816_v56, %v4825_v57 }
 0x4b5   : > { %4814 = vst.msk [vmem:[#allocation3 + $0x48] sm:$0x3f] %vm4813_vm10, %v4803_v40  ;;  %v4802_v12 = vadd.f32 %v4785_v33, %v4628_v9  ;;  %v4852_v29 = vld [vmem:[#allocation3 + $0x13] sm:$0xff]  ;;  %v4842_v6 = vld [vmem:[#allocation3 + $0xa] sm:$0xff]  ;;  %v4824_v43 = vld [vmem:[#allocation3 + $0x1] sm:$0xff] }
 0x4b6   : > { %v4819_v46 = vld [vmem:[#allocation3 + $0x20] sm:$0xff]  ;;  %v4851_v60 = vld [vmem:[#allocation3 + $0xb] sm:$0xff]  ;;  %v4861_v8 = vmax.f32 %v4843_v42, %v4852_v29  ;;  %v4833_v40 = vmax.f32 %v4815_v37, %v4824_v43  ;;  %v6751_v57 = vld [vmem:[%s10938_s8 + $0x178] sm:$0xff] }
 0x4b7   : > { %4812 = vst.msk [vmem:[#allocation3 + $0x40] sm:$0xff] %vm2477_vm4, %v4802_v12  ;;  %v4828_v62 = vld [vmem:[#allocation3 + $0x21] sm:$0xff]  ;;  %v4827_v1 = vld [vmem:[#allocation3 + $0x19] sm:$0xff]  ;;  %v4860_v30 = vmax.f32 %v4842_v6, %v4851_v60  ;;  %v6741_v50 = vld [vmem:[%s10938_s8 + $0x130] sm:$0xff] }
 0x4b8   : > { %v4822_v27 = vld [vmem:[#allocation3 + $0x38] sm:$0xff]  ;;  %v4845_v23 = vld [vmem:[#allocation3 + $0x22] sm:$0xff]  ;;  %v4837_v63 = vmax.f32 %v4819_v46, %v4828_v62  ;;  %v4836_v61 = vmax.f32 %v4818_v35, %v4827_v1  ;;  %v4870_v9 = vmax.f32 %v4834_v15, %v4861_v8  ;;  %v6728_v35 = vld [vmem:[%s10938_s8 + $0xd0] sm:$0xff] }
 0x4b9   : > { %v4854_v34 = vld [vmem:[#allocation3 + $0x23] sm:$0xff]  ;;  %v4844_v36 = vld [vmem:[#allocation3 + $0x1a] sm:$0xff]  ;;  %v4869_v33 = vmax.f32 %v4833_v40, %v4860_v30  ;;  %v6737_v6 = vld [vmem:[%s10938_s8 + $0x110] sm:$0xff] }
 0x4ba   : > { %v4821_v24 = vld [vmem:[#allocation3 + $0x30] sm:$0xff]  ;;  %v4853_v3 = vld [vmem:[#allocation3 + $0x1b] sm:$0xff]  ;;  %v4863_v4 = vmax.f32 %v4845_v23, %v4854_v34  ;;  %v4879_v12 = vld [vmem:[%s10937_s7 + $0x8] sm:$0xff] }
 0x4bb   : > { %v4830_v51 = vld [vmem:[#allocation3 + $0x31] sm:$0xff]  ;;  %v4829_v28 = vld [vmem:[#allocation3 + $0x29] sm:$0xff]  ;;  %v4862_v25 = vmax.f32 %v4844_v36, %v4853_v3  ;;  %v6721_v1 = vld [vmem:[%s10938_s8 + $0xa0] sm:$0xff] }
 0x4bc   : > { %v4850_v59 = vld [vmem:[#allocation3 + $0x4a] sm:$0x7]  ;;  %v4847_v52 = vld [vmem:[#allocation3 + $0x32] sm:$0xff]  ;;  %v4839_v20 = vmax.f32 %v4821_v24, %v4830_v51  ;;  %v4838_v45 = vmax.f32 %v4820_v14, %v4829_v28  ;;  %v4872_v7 = vmax.f32 %v4836_v61, %v4863_v4  ;;  %v6707_v28 = vld [vmem:[%s10938_s8 + $0x40] sm:$0xff] }
 0x4bd   : > { %v4859_v31 = vld [vmem:[#allocation3 + $0x4b] sm:$0x7]  ;;  %v4856_v48 = vld [vmem:[#allocation3 + $0x33] sm:$0xff]  ;;  %v4871_v5 = vmax.f32 %v4835_v47, %v4862_v25  ;;  %v6730_v23 = vld [vmem:[%s10938_s8 + $0xe0] sm:$0xff] }
 0x4be   : > { %v4823_v18 = vld [vmem:[#allocation3 + $0x40] sm:$0x7]  ;;  %v4868_v32 = vmax.f32 %v4850_v59, %v4859_v31  ;;  %v4858_v22 = vld [vmem:[#allocation3 + $0x43] sm:$0xff]  ;;  %v4855_v16 = vld [vmem:[#allocation3 + $0x2b] sm:$0xff]  ;;  %v4865_v2 = vmax.f32 %v4847_v52, %v4856_v48  ;;  %v10981_v31 = vmov 0.0  }
 0x4bf   : > { %v4832_v11 = vld [vmem:[#allocation3 + $0x41] sm:$0x7]  ;;  %v4831_v10 = vld [vmem:[#allocation3 + $0x39] sm:$0xff]  ;;  %v4846_v49 = vld [vmem:[#allocation3 + $0x2a] sm:$0xff] }
 0x4c0   : > { %v4841_v44 = vmax.f32 %v4823_v18, %v4832_v11  ;;  %v4840_v58 = vmax.f32 %v4822_v27, %v4831_v10  ;;  %v4849_v21 = vld [vmem:[#allocation3 + $0x42] sm:$0xff]  ;;  %v4848_v39 = vld [vmem:[#allocation3 + $0x3a] sm:$0xff]  ;;  %v4864_v13 = vmax.f32 %v4846_v49, %v4855_v16  ;;  %v4874_v53 = vmax.f32 %v4838_v45, %v4865_v2  ;;  %v6713_v27 = vld [vmem:[%s10938_s8 + $0x70] sm:$0xff] }
 0x4c1   : > { %v4867_v55 = vmax.f32 %v4849_v21, %v4858_v22  ;;  %v4857_v26 = vld [vmem:[#allocation3 + $0x3b] sm:$0xff]  ;;  %v6712_v18 = vld [vmem:[%s10938_s8 + $0x68] sm:$0xff]  ;;  %v6709_v24 = vld [vmem:[%s10938_s8 + $0x50] sm:$0xff] }
 0x4c2   : > { %v4877_v17 = vmax.f32 %v4841_v44, %v4868_v32  ;;  %v4866_v38 = vmax.f32 %v4848_v39, %v4857_v26  ;;  %v4873_v54 = vmax.f32 %v4837_v63, %v4864_v13  ;;  %v6714_v59 = vld [vmem:[%s10938_s8 + $0x78] sm:$0xff]  ;;  %v6711_v11 = vld [vmem:[%s10938_s8 + $0x60] sm:$0xff]  ;;  %v6708_v51 = vld [vmem:[%s10938_s8 + $0x48] sm:$0xff] }
 0x4c3   : > { %v4876_v41 = vmax.f32 %v4840_v58, %v4867_v55  ;;  %v6710_v10 = vld [vmem:[%s10938_s8 + $0x58] sm:$0xff]  ;;  %v4982_v32 = vld [vmem:[%s10938_s8 + $0x30] sm:$0xff]  ;;  %v4981_v58 = vld [vmem:[%s10938_s8 + $0x28] sm:$0xff] }
 0x4c4   : > { %8269 = vmatprep.subr.msk.mxu1 %vm4894_vm11, %v4877_v17  ;;  %v4875_v0 = vmax.f32 %v4839_v20, %v4866_v38  ;;  %v4983_v44 = vld [vmem:[%s10938_s8 + $0x38] sm:$0xff]  ;;  %v4980_v21 = vld [vmem:[%s10938_s8 + $0x20] sm:$0xff]  ;;  %v4978_v39 = vld [vmem:[%s10938_s8 + $0x10] sm:$0xff] }
 0x4c5   : > { %8270 = vmatpush3.msk.msra.mxu1 %vm4894_vm11, %v4877_v17  ;;  %8310 = vmatpush3.msra.mxu0 %v4983_v44  ;;  %v4979_v22 = vld [vmem:[%s10938_s8 + $0x18] sm:$0xff]  ;;  %v4977_v55 = vld [vmem:[%s10938_s8 + $0x8] sm:$0xff]  ;;  %v4976_v26 = vld [vmem:[%s10938_s8] sm:$0xff] }
 0x4c6   : > { %8271 = vmatprep.subr.mxu1 %v4876_v41  ;;  %8311 = vmatprep.subr.mxu0 %v10981_v31  ;;  %v6703_v52 = vld [vmem:[%s10936_s6] ss:$0 sm:$0xff]  ;;  %v6724_v49 = vld [vmem:[%s10938_s8 + $0xb8] sm:$0xff]  ;;  %v6723_v45 = vld [vmem:[%s10938_s8 + $0xb0] sm:$0xff] }
 0x4c7   : > { %8272 = vmatpush3.msra.mxu1 %v4876_v41  ;;  %8312 = vmatpush3.msra.mxu0 %v4982_v32  ;;  %v6733_v20 = vld [vmem:[%s10938_s8 + $0xf8] sm:$0xff]  ;;  %v6732_v2 = vld [vmem:[%s10938_s8 + $0xf0] sm:$0xff]  ;;  %v6722_v46 = vld [vmem:[%s10938_s8 + $0xa8] sm:$0xff] }
 0x4c8   : > { %8273 = vmatprep.subr.mxu1 %v4875_v0  ;;  %8313 = vmatprep.subr.mxu0 %v10981_v31  ;;  %v6731_v62 = vld [vmem:[%s10938_s8 + $0xe8] sm:$0xff]  ;;  %v6720_v34 = vld [vmem:[%s10938_s8 + $0x98] sm:$0xff]  ;;  %v6719_v13 = vld [vmem:[%s10938_s8 + $0x90] sm:$0xff] }
 0x4c9   : > { %8274 = vmatpush3.msra.mxu1 %v4875_v0  ;;  %8314 = vmatpush3.msra.mxu0 %v4981_v58  ;;  %v6729_v0 = vld [vmem:[%s10938_s8 + $0xd8] sm:$0xff]  ;;  %v6718_v36 = vld [vmem:[%s10938_s8 + $0x88] sm:$0xff]  ;;  %v6726_v61 = vld [vmem:[%s10938_s8 + $0xc0] sm:$0xff] }
 0x4ca   : > { %8275 = vmatprep.subr.mxu1 %v4874_v53  ;;  %8315 = vmatprep.subr.mxu0 %v10981_v31  ;;  %v6727_v3 = vld [vmem:[%s10938_s8 + $0xc8] sm:$0xff]  ;;  %v6742_v63 = vld [vmem:[%s10938_s8 + $0x138] sm:$0xff]  ;;  %v6739_v42 = vld [vmem:[%s10938_s8 + $0x120] sm:$0xff] }
 0x4cb   : > { %8276 = vmatpush3.msra.mxu1 %v4874_v53  ;;  %8316 = vmatpush3.msra.mxu0 %v4980_v21  ;;  %v6717_v53 = vld [vmem:[%s10938_s8 + $0x80] sm:$0xff]  ;;  %v6740_v19 = vld [vmem:[%s10938_s8 + $0x128] sm:$0xff]  ;;  %v6738_v25 = vld [vmem:[%s10938_s8 + $0x118] sm:$0xff] }
 0x4cc   : > { %8277 = vmatprep.subr.mxu1 %v4873_v54  ;;  %8317 = vmatprep.subr.mxu0 %v10981_v31  ;;  %v6749_v56 = vld [vmem:[%s10938_s8 + $0x168] sm:$0xff]  ;;  %v6748_v60 = vld [vmem:[%s10938_s8 + $0x160] sm:$0xff]  ;;  %v6747_v47 = vld [vmem:[%s10938_s8 + $0x158] sm:$0xff] }
 0x4cd   : > { %8278 = vmatpush3.msra.mxu1 %v4873_v54  ;;  %8318 = vmatpush3.msra.mxu0 %v4979_v22  ;;  %v6750_v54 = vld [vmem:[%s10938_s8 + $0x170] sm:$0xff]  ;;  %v6735_v15 = vld [vmem:[%s10938_s8 + $0x100] sm:$0xff]  ;;  %v6760_v8 = vld [vmem:[%s10938_s8 + $0x1b8] sm:$0xff] }
 0x4ce   : > { %8279 = vmatprep.subr.mxu1 %v4872_v7  ;;  %8319 = vmatprep.subr.mxu0 %v10981_v31  ;;  %v6746_v37 = vld [vmem:[%s10938_s8 + $0x150] sm:$0xff]  ;;  %v6745_v30 = vld [vmem:[%s10938_s8 + $0x148] sm:$0xff]  ;;  %v6744_v40 = vld [vmem:[%s10938_s8 + $0x140] sm:$0xff] }
 0x4cf   : > { %8280 = vmatpush3.msra.mxu1 %v4872_v7  ;;  %8320 = vmatpush3.msra.mxu0 %v4978_v39  ;;  %v6736_v7 = vld [vmem:[%s10938_s8 + $0x108] sm:$0xff]  ;;  %v6766_v44 = vld [vmem:[%s10938_s8 + $0x1e0] sm:$0xff]  ;;  %v6777_v58 = vld [vmem:[%s10938_s8 + $0x230] sm:$0xff] }
 0x4d0   : > { %8281 = vmatprep.subr.mxu1 %v4871_v5  ;;  %8321 = vmatprep.subr.mxu0 %v10981_v31  ;;  %v6765_v21 = vld [vmem:[%s10938_s8 + $0x1d8] sm:$0xff]  ;;  %v6776_v22 = vld [vmem:[%s10938_s8 + $0x228] sm:$0xff]  ;;  %v6764_v39 = vld [vmem:[%s10938_s8 + $0x1d0] sm:$0xff] }
 0x4d1   : > { %8282 = vmatpush3.msra.mxu1 %v4871_v5  ;;  %8322 = vmatpush3.msra.mxu0 %v4977_v55  ;;  %v6759_v5 = vld [vmem:[%s10938_s8 + $0x1b0] sm:$0xff]  ;;  %v6775_v55 = vld [vmem:[%s10938_s8 + $0x220] sm:$0xff] }
 0x4d2   : > { %8283 = vmatprep.subr.mxu1 %v4870_v9  ;;  %8323 = vmatprep.subr.mxu0 %v10981_v31 }
 0x4d3   : > { %8284 = vmatpush3.msra.mxu1 %v4870_v9  ;;  %8324 = vmatpush3.msra.mxu0 %v4976_v26  ;;  %v6758_v9 = vld [vmem:[%s10938_s8 + $0x1a8] sm:$0xff] }
 0x4d4   : > { %8285 = vmatprep.subr.mxu1 %v4869_v33  ;;  %8347 = vmatprep.subr.mxu0 %v10981_v31  ;;  %v6763_v26 = vld [vmem:[%s10938_s8 + $0x1c8] sm:$0xff] }
 0x4d5   : > { %8286 = vmatpush3.msra.mxu1 %v4869_v33  ;;  %v6757_v33 = vld [vmem:[%s10938_s8 + $0x1a0] sm:$0xff] }
 0x4d6   : > { %8288 = vmatmul.mubr.msk.f32.vlgmr.msra.gmra.mxu1 %vm4887_vm9, %v4879_v12  ;;  %8290 = vmatprep.subr.mxu1 %v10981_v31  ;;  %v6756_v12 = vld [vmem:[%s10938_s8 + $0x198] sm:$0xff] }
 0x4d7   : > { %8291 = vmatpush3.msra.mxu1 %v6714_v59  ;;  %8306 = vmatprep.mubr.msk.f32.mxu1 %vm8542_vm1, %v10981_v31  ;;  %v6769_v59 = vld [vmem:[%s10938_s8 + $0x1f8] sm:$0xff] }
 0x4d8   : > { %8292 = vmatprep.subr.mxu1 %v10981_v31 }
 0x4d9   : > { %8293 = vmatpush3.msra.mxu1 %v6713_v27  ;;  %v6755_v27 = vld [vmem:[%s10938_s8 + $0x190] sm:$0xff] }
 0x4da   : > { %8294 = vmatprep.subr.mxu1 %v10981_v31 }
 0x4db   : > { %8295 = vmatpush3.msra.mxu1 %v6712_v18 }
 0x4dc   : > { %8296 = vmatprep.subr.mxu1 %v10981_v31 }
 0x4dd   : > { %8297 = vmatpush3.msra.mxu1 %v6711_v11  ;;  %v6768_v11 = vld [vmem:[%s10938_s8 + $0x1f0] sm:$0xff] }
 0x4de   : > { %8298 = vmatprep.subr.mxu1 %v10981_v31 }
 0x4df   : > { %8299 = vmatpush3.msra.mxu1 %v6710_v10  ;;  %v6754_v10 = vld [vmem:[%s10938_s8 + $0x188] sm:$0xff] }
 0x4e0   : > { %8300 = vmatprep.subr.mxu1 %v10981_v31 }
 0x4e1   : > { %8301 = vmatpush3.msra.mxu1 %v6709_v24  ;;  %v6767_v24 = vld [vmem:[%s10938_s8 + $0x1e8] sm:$0xff] }
 0x4e2   : > { %8302 = vmatprep.subr.mxu1 %v10981_v31 }
 0x4e3   : > { %8303 = vmatpush3.msra.mxu1 %v6708_v51  ;;  %v6753_v51 = vld [vmem:[%s10938_s8 + $0x180] sm:$0xff] }
 0x4e4   : > { %8304 = vmatprep.subr.mxu1 %v10981_v31 }
 0x4e5   : > { %8305 = vmatpush3.msra.mxu1 %v6707_v28  ;;  %v6778_v28 = vld [vmem:[%s10938_s8 + $0x238] sm:$0xff] }
 0x4e6   : > { %8328 = vmatprep.subr.mxu1 %v10981_v31 }
 0x596   : > { %v8289_v48 = vpop.f32.mrf.mxu1 }
 0x597   : > { %v4970_v17 = vadd.f32 %v8289_v48, %v6703_v52  ;;  %v6762_v48 = vld [vmem:[%s10938_s8 + $0x1c0] sm:$0xff] }
 0x598   : > { %v4964_v38 = vpop.f32.mrf.mxu1 }
 0x599   : > { %4974 = vst.msk [vmem:[#allocation5 + $0x8] sm:$0xff] %vm2477_vm4, %v4970_v17  ;;  %v4965_v14 = vadd.f32 %v6703_v52, %v4964_v38  ;;  %v6774_v52 = vld [vmem:[%s10938_s8 + $0x218] sm:$0xff]  ;;  %v6773_v17 = vld [vmem:[%s10938_s8 + $0x210] sm:$0xff]  ;;  %v6772_v38 = vld [vmem:[%s10938_s8 + $0x208] sm:$0xff] }
 0x59b   : > { %4973 = vst.msk [vmem:[#allocation5] sm:$0xff] %vm2477_vm4, %v4965_v14 }
 0x5a0   : > { %v5476_v32 = vld [vmem:[#allocation5 + $0x8] sm:$0x3f] }
 0x5a1   : > { %v5560_v14 = vld [vmem:[#allocation5 + $0x9] sm:$0x3f] }
 0x5a2   : > { %v4984_v16 = vld [vmem:[#allocation5 + $0x1] sm:$0x3f] }
 0x5a3   : > { %v4975_v41 = vld [vmem:[#allocation5] sm:$0x3f]  ;;  %8307 = vmatmul.mubr.msk.f32.vlgmr.msra.gmra.mxu1 %vm2477_vm4, %v4984_v16  ;;  %v5392_v18 = vld [vmem:[#allocation5 + $0x6] sm:$0x3f] }
 0x5a4   : > { %8326 = vmatmul.mubr.msk.f32.vlgmr.msra.gmra.mxu0 %vm2477_vm4, %v4975_v41  ;;  %8329 = vmatpush3.msra.mxu1 %v6724_v49  ;;  %v5140_v4 = vld [vmem:[#allocation5 + $0x2] sm:$0x3f]  ;;  %v6771_v49 = vld [vmem:[%s10938_s8 + $0x200] sm:$0xff]  ;;  %v5644_v16 = vld [vmem:[#allocation5 + $0xa] sm:$0x3f] }
 0x5a5   : > { %8344 = vmatprep.mubr.msk.f32.mxu1 %vm8542_vm1, %v10981_v31  ;;  %8330 = vmatprep.subr.mxu1 %v10981_v31  ;;  %v5224_v29 = vld [vmem:[#allocation5 + $0x4] sm:$0x3f] }
 0x5a6   : > { %8348 = vmatpush3.msra.mxu0 %v6733_v20  ;;  %8331 = vmatpush3.msra.mxu1 %v6723_v45  ;;  %v5308_v43 = vld [vmem:[#allocation5 + $0x5] sm:$0x3f] }
 0x5a7   : > { %8349 = vmatprep.subr.mxu0 %v10981_v31  ;;  %8332 = vmatprep.subr.mxu1 %v10981_v31 }
 0x5a8   : > { %8350 = vmatpush3.msra.mxu0 %v6732_v2  ;;  %8333 = vmatpush3.msra.mxu1 %v6722_v46 }
 0x5a9   : > { %8351 = vmatprep.subr.mxu0 %v10981_v31  ;;  %8334 = vmatprep.subr.mxu1 %v10981_v31 }
 0x5aa   : > { %8352 = vmatpush3.msra.mxu0 %v6731_v62  ;;  %8335 = vmatpush3.msra.mxu1 %v6721_v1 }
 0x5ab   : > { %8353 = vmatprep.subr.mxu0 %v10981_v31  ;;  %8336 = vmatprep.subr.mxu1 %v10981_v31 }
 0x5ac   : > { %8354 = vmatpush3.msra.mxu0 %v6730_v23  ;;  %8337 = vmatpush3.msra.mxu1 %v6720_v34 }
 0x5ad   : > { %8355 = vmatprep.subr.mxu0 %v10981_v31  ;;  %8338 = vmatprep.subr.mxu1 %v10981_v31 }
 0x5ae   : > { %8356 = vmatpush3.msra.mxu0 %v6729_v0  ;;  %8339 = vmatpush3.msra.mxu1 %v6719_v13 }
 0x5af   : > { %8357 = vmatprep.subr.mxu0 %v10981_v31  ;;  %8340 = vmatprep.subr.mxu1 %v10981_v31 }
 0x5b0   : > { %8358 = vmatpush3.msra.mxu0 %v6728_v35  ;;  %8341 = vmatpush3.msra.mxu1 %v6718_v36 }
 0x5b1   : > { %8359 = vmatprep.subr.mxu0 %v10981_v31  ;;  %8342 = vmatprep.subr.mxu1 %v10981_v31 }
 0x5b2   : > { %8360 = vmatpush3.msra.mxu0 %v6727_v3  ;;  %8343 = vmatpush3.msra.mxu1 %v6717_v53 }
 0x5b3   : > { %8361 = vmatprep.subr.mxu0 %v10981_v31  ;;  %8366 = vmatprep.subr.mxu1 %v10981_v31 }
 0x5b4   : > { %8345 = vmatmul.mubr.msk.f32.vlgmr.msra.gmra.mxu1 %vm2477_vm4, %v5140_v4  ;;  %8362 = vmatpush3.msra.mxu0 %v6726_v61 }
 0x5b5   : > { %8367 = vmatpush3.msra.mxu1 %v6742_v63  ;;  %8363 = vmatprep.mubr.msk.f32.mxu0 %vm8542_vm1, %v10981_v31 }
 0x5b6   : > { %8368 = vmatprep.subr.mxu1 %v10981_v31  ;;  %8382 = vmatprep.mubr.msk.f32.mxu1 %vm8542_vm1, %v10981_v31 }
 0x5b7   : > { %8369 = vmatpush3.msra.mxu1 %v6741_v50  ;;  %8385 = vmatprep.subr.mxu0 %v10981_v31 }
 0x5b8   : > { %8370 = vmatprep.subr.mxu1 %v10981_v31  ;;  %8364 = vmatmul.mubr.msk.f32.vlgmr.msra.gmra.mxu0 %vm2477_vm4, %v5224_v29 }
 0x5b9   : > { %8371 = vmatpush3.msra.mxu1 %v6740_v19  ;;  %8386 = vmatpush3.msra.mxu0 %v6751_v57 }
 0x5ba   : > { %8372 = vmatprep.subr.mxu1 %v10981_v31  ;;  %8387 = vmatprep.subr.mxu0 %v10981_v31 }
 0x5bb   : > { %8373 = vmatpush3.msra.mxu1 %v6739_v42  ;;  %8388 = vmatpush3.msra.mxu0 %v6750_v54 }
 0x5bc   : > { %8374 = vmatprep.subr.mxu1 %v10981_v31  ;;  %8389 = vmatprep.subr.mxu0 %v10981_v31 }
 0x5bd   : > { %8375 = vmatpush3.msra.mxu1 %v6738_v25  ;;  %8390 = vmatpush3.msra.mxu0 %v6749_v56 }
 0x5be   : > { %8376 = vmatprep.subr.mxu1 %v10981_v31  ;;  %8391 = vmatprep.subr.mxu0 %v10981_v31 }
 0x5bf   : > { %8377 = vmatpush3.msra.mxu1 %v6737_v6  ;;  %8392 = vmatpush3.msra.mxu0 %v6748_v60 }
 0x5c0   : > { %8378 = vmatprep.subr.mxu1 %v10981_v31  ;;  %8393 = vmatprep.subr.mxu0 %v10981_v31 }
 0x5c1   : > { %8379 = vmatpush3.msra.mxu1 %v6736_v7  ;;  %8394 = vmatpush3.msra.mxu0 %v6747_v47 }
 0x5c2   : > { %8380 = vmatprep.subr.mxu1 %v10981_v31  ;;  %8395 = vmatprep.subr.mxu0 %v10981_v31 }
 0x5c3   : > { %8381 = vmatpush3.msra.mxu1 %v6735_v15  ;;  %8396 = vmatpush3.msra.mxu0 %v6746_v37 }
 0x5c4   : > { %8404 = vmatprep.subr.mxu1 %v10981_v31  ;;  %8383 = vmatmul.mubr.msk.f32.vlgmr.msra.gmra.mxu1 %vm2477_vm4, %v5308_v43 }
 0x5c5   : > { %8405 = vmatpush3.msra.mxu1 %v6760_v8  ;;  %8397 = vmatprep.subr.mxu0 %v10981_v31  ;;  %v5737_v8 = vld [vmem:[%s10939_s9] sm:$0x1] }
 0x5c6   : > { %8406 = vmatprep.subr.mxu1 %v10981_v31  ;;  %8398 = vmatpush3.msra.mxu0 %v6745_v30  ;;  %v8543_v30 = vmov (%p63_p0), 0.0  }
 0x5c7   : > { %8407 = vmatpush3.msra.mxu1 %v6759_v5  ;;  %8399 = vmatprep.subr.mxu0 %v10981_v31  ;;  %v5748_v5 = vld [vmem:[%s10942_s12 + $0x18] sm:$0xff] (%p63_p0) }
 0x5c8   : > { %8408 = vmatprep.subr.mxu1 %v10981_v31  ;;  %8400 = vmatpush3.msra.mxu0 %v6744_v40  ;;  %v5743_v40 = vld [vmem:[%s10941_s11] sm:$0xff] (%p63_p0) }
 0x5c9   : > { %8409 = vmatpush3.msra.mxu1 %v6758_v9  ;;  %8401 = vmatprep.mubr.msk.f32.mxu0 %vm8542_vm1, %v10981_v31  ;;  %v5747_v9 = vld [vmem:[%s10942_s12 + $0x10] sm:$0xff] (%p63_p0) }
 0x5ca   : > { %8410 = vmatprep.subr.mxu1 %v10981_v31  ;;  %8420 = vmatprep.mubr.msk.f32.mxu1 %vm8542_vm1, %v10981_v31 }
 0x5cb   : > { %8411 = vmatpush3.msra.mxu1 %v6757_v33  ;;  %8423 = vmatprep.subr.mxu0 %v10981_v31  ;;  %v5742_v33 = vld [vmem:[%s10982_s0] sm:$0xff] (%p63_p0) }
 0x5cc   : > { %8412 = vmatprep.subr.mxu1 %v10981_v31  ;;  %8402 = vmatmul.mubr.msk.f32.vlgmr.msra.gmra.mxu0 %vm2477_vm4, %v5392_v18  ;;  %v5909_v18 = vld [vmem:[%s10944_s14 + $0x18] sm:$0xff] (%p63_p0) }
 0x5cd   : > { %8413 = vmatpush3.msra.mxu1 %v6756_v12  ;;  %8424 = vmatpush3.msra.mxu0 %v6769_v59  ;;  %v5746_v12 = vld [vmem:[%s10942_s12 + $0x8] sm:$0xff] (%p63_p0)  ;;  %v5745_v59 = vld [vmem:[%s10942_s12] sm:$0xff] (%p63_p0) }
 0x5ce   : > { %8414 = vmatprep.subr.mxu1 %v10981_v31  ;;  %8425 = vmatprep.subr.mxu0 %v10981_v31 }
 0x5cf   : > { %8415 = vmatpush3.msra.mxu1 %v6755_v27  ;;  %8426 = vmatpush3.msra.mxu0 %v6768_v11  ;;  %v5908_v11 = vld [vmem:[%s10944_s14 + $0x10] sm:$0xff] (%p63_p0) }
 0x5d0   : > { %8416 = vmatprep.subr.mxu1 %v10981_v31  ;;  %8427 = vmatprep.subr.mxu0 %v10981_v31 }
 0x5d1   : > { %8417 = vmatpush3.msra.mxu1 %v6754_v10  ;;  %8428 = vmatpush3.msra.mxu0 %v6767_v24  ;;  %v5907_v10 = vld [vmem:[%s10944_s14 + $0x8] sm:$0xff] (%p63_p0)  ;;  %v5906_v24 = vld [vmem:[%s10944_s14] sm:$0xff] (%p63_p0) }
 0x5d2   : > { %8418 = vmatprep.subr.mxu1 %v10981_v31  ;;  %8429 = vmatprep.subr.mxu0 %v10981_v31 }
 0x5d3   : > { %8419 = vmatpush3.msra.mxu1 %v6753_v51  ;;  %8430 = vmatpush3.msra.mxu0 %v6766_v44  ;;  %v6007_v51 = vld [vmem:[%s10946_s16 + $0x80] sm:$0xff] (%p63_p0)  ;;  %v6009_v44 = vld [vmem:[%s10946_s16 + $0x90] sm:$0xff] (%p63_p0) }
 0x5d4   : > { %8442 = vmatprep.subr.mxu1 %v10981_v31  ;;  %8421 = vmatmul.mubr.msk.f32.vlgmr.msra.gmra.mxu1 %vm2477_vm4, %v5476_v32  ;;  %v6002_v32 = vld [vmem:[%s10946_s16 + $0x58] sm:$0xff] (%p63_p0) }
 0x5d5   : > { %8443 = vmatpush3.msra.mxu1 %v6778_v28  ;;  %8431 = vmatprep.subr.mxu0 %v10981_v31  ;;  %v6006_v28 = vld [vmem:[%s10946_s16 + $0x78] sm:$0xff] (%p63_p0) }
 0x5d6   : > { %8444 = vmatprep.subr.mxu1 %v10981_v31  ;;  %8432 = vmatpush3.msra.mxu0 %v6765_v21 }
 0x5d7   : > { %8445 = vmatpush3.msra.mxu1 %v6777_v58  ;;  %8433 = vmatprep.subr.mxu0 %v10981_v31  ;;  %v6001_v58 = vld [vmem:[%s10946_s16 + $0x50] sm:$0xff] (%p63_p0) }
 0x5d8   : > { %8446 = vmatprep.subr.mxu1 %v10981_v31  ;;  %8434 = vmatpush3.msra.mxu0 %v6764_v39 }
 0x5d9   : > { %8447 = vmatpush3.msra.mxu1 %v6776_v22  ;;  %8435 = vmatprep.subr.mxu0 %v10981_v31 }
 0x5da   : > { %8448 = vmatprep.subr.mxu1 %v10981_v31  ;;  %8436 = vmatpush3.msra.mxu0 %v6763_v26 }
 0x5db   : > { %8449 = vmatpush3.msra.mxu1 %v6775_v55  ;;  %8437 = vmatprep.subr.mxu0 %v10981_v31  ;;  %v6782_v55 = vld [vmem:[%s10943_s13] ss:$0 sm:$0xff] (%p63_p0) }
 0x5dc   : > { %8450 = vmatprep.subr.mxu1 %v10981_v31  ;;  %8438 = vmatpush3.msra.mxu0 %v6762_v48 }
 0x5dd   : > { %8451 = vmatpush3.msra.mxu1 %v6774_v52  ;;  %8439 = vmatprep.mubr.msk.f32.mxu0 %vm8542_vm1, %v10981_v31 }
 0x5de   : > { %8452 = vmatprep.subr.mxu1 %v10981_v31  ;;  %8458 = vmatprep.mubr.msk.f32.mxu1 %vm8542_vm1, %v10981_v31 }
 0x5df   : > { %8453 = vmatpush3.msra.mxu1 %v6773_v17  ;;  %8440 = vmatmul.mubr.msk.f32.vlgmr.msra.gmra.mxu0 %vm2477_vm4, %v5560_v14  ;;  %v6004_v14 = vld [vmem:[%s10946_s16 + $0x68] sm:$0xff] (%p63_p0) }
 0x5e0   : > { %8454 = vmatprep.subr.mxu1 %v10981_v31  ;;  %8461 = vmatprep.subr.mxu0 (%p63_p0), %v8543_v30 }
 0x5e1   : > { %8455 = vmatpush3.msra.mxu1 %v6772_v38  ;;  %8462 = vmatpush3.msra.mxu0 (%p63_p0), %v5748_v5  ;;  %v6008_v38 = vld [vmem:[%s10946_s16 + $0x88] sm:$0xff] (%p63_p0) }
 0x5e2   : > { %8456 = vmatprep.subr.mxu1 %v10981_v31  ;;  %8463 = vmatprep.subr.mxu0 (%p63_p0), %v8543_v30 }
 0x5e3   : > { %8457 = vmatpush3.msra.mxu1 %v6771_v49  ;;  %8464 = vmatpush3.msra.mxu0 (%p63_p0), %v5747_v9  ;;  %v5997_v49 = vld [vmem:[%s10946_s16 + $0x30] sm:$0xff] (%p63_p0) }
 0x5e4   : > { %8459 = vmatmul.mubr.msk.f32.vlgmr.msra.gmra.mxu1 %vm2477_vm4, %v5644_v16  ;;  %8472 = vmatprep.subr.mxu1 (%p63_p0), %v8543_v30  ;;  %v6003_v16 = vld [vmem:[%s10946_s16 + $0x60] sm:$0xff] (%p63_p0) }
 0x5e5   :  { %8473 = vmatpush3.msra.mxu1 (%p63_p0), %v5743_v40  ;;  %8474 = vmatprep.mubr.msk.f32.mxu1 (%p63_p0), %vm8544_vm15, %v8543_v30 }
 0x5e6   :  { %8465 = vmatprep.subr.mxu0 (%p63_p0), %v8543_v30  ;;  %8469 = vmatprep.mubr.msk.f32.mxu0 (%p63_p0), %vm8544_vm15, %v8543_v30 }
 0x5e7   :  { %8466 = vmatpush3.msra.mxu0 (%p63_p0), %v5746_v12  ;;  %8477 = vmatprep.subr.mxu1 (%p63_p0), %v8543_v30 }
 0x5e8   :  { %8475 = vmatmul.mubr.msk.f32.vlgmr.msra.gmra.mxu1 (%p63_p0), %vm5823_vm14, %v5742_v33  ;;  %8467 = vmatprep.subr.mxu0 (%p63_p0), %v8543_v30 }
 0x5e9   :  { %8485 = vmatprep.mubr.msk.f32.mxu1 (%p63_p0), %vm8544_vm15, %v8543_v30  ;;  %8468 = vmatpush3.msra.mxu0 (%p63_p0), %v5745_v59 }
 0x5ea   :  { %8478 = vmatpush3.msra.mxu1 (%p63_p0), %v5909_v18  ;;  %6065 = vmatprep.subr.mxu0 (%p63_p0), %v6007_v51 }
 0x5eb   :  { %8479 = vmatprep.subr.mxu1 (%p63_p0), %v8543_v30 }
 0x5ec   :  { %8480 = vmatpush3.msra.mxu1 (%p63_p0), %v5908_v11 }
 0x5ed   :  { %8481 = vmatprep.subr.mxu1 (%p63_p0), %v8543_v30 }
 0x5ee   :  { %8482 = vmatpush3.msra.mxu1 (%p63_p0), %v5907_v10 }
 0x5ef   :  { %8483 = vmatprep.subr.mxu1 (%p63_p0), %v8543_v30 }
 0x5f0   :  { %8484 = vmatpush3.msra.mxu1 (%p63_p0), %v5906_v24 }
 0x5f1   :  { %6136 = vmatprep.subr.mxu1 (%p63_p0), %v6009_v44 }
 0x663   : > { %v5063_v41 = vpop.f32.mrf.mxu1 }
 0x664   : > { %v5136_v20 = vpop.f32.mrf.mxu0 }
 0x665   : > { %v8308_v45 = vpop.f32.mrf.mxu1  ;;  %v5137_v36 = vadd.f32 %v5136_v20, %v5063_v41  ;;  %v5996_v41 = vld [vmem:[%s10946_s16 + $0x28] sm:$0xff] (%p63_p0)  ;;  %v5999_v20 = vld [vmem:[%s10946_s16 + $0x40] sm:$0xff] (%p63_p0) }
 0x666   : > { %v8327_v2 = vpop.f32.mrf.mxu0  ;;  %v5992_v45 = vld [vmem:[%s10946_s16 + $0x8] sm:$0xff] (%p63_p0) }
 0x667   :  { %v5998_v2 = vld [vmem:[%s10946_s16 + $0x38] sm:$0xff] (%p63_p0) }
 0x674   : > { %v5219_v46 = vpop.f32.mrf.mxu1 }
 0x675   : > { %v5223_v3 = vadd.f32 %v5219_v46, %v5137_v36  ;;  %v5991_v46 = vld [vmem:[%s10946_s16] sm:$0xff] (%p63_p0)  ;;  %v6010_v36 = vld [vmem:[%s10946_s16 + $0x98] sm:$0xff] (%p63_p0) }
 0x676   : > { %v8346_v62 = vpop.f32.mrf.mxu1 }
 0x677   :  { %v5994_v62 = vld [vmem:[%s10946_s16 + $0x18] sm:$0xff] (%p63_p0) }
 0x678   : > { %v5303_v1 = vpop.f32.mrf.mxu0 }
 0x679   : > { %v5307_v63 = vadd.f32 %v5303_v1, %v5223_v3  ;;  %v5993_v1 = vld [vmem:[%s10946_s16 + $0x10] sm:$0xff] (%p63_p0) }
 0x67a   : > { %v8365_v23 = vpop.f32.mrf.mxu0  ;;  %v6005_v3 = vld [vmem:[%s10946_s16 + $0x70] sm:$0xff] (%p63_p0) }
 0x67b   :  { %v6783_v23 = vld [vmem:[%s10945_s15] ss:$0 sm:$0xff] (%p63_p0) }
 0x684   : > { %v5387_v34 = vpop.f32.mrf.mxu1 }
 0x685   : > { %v5391_v61 = vadd.f32 %v5387_v34, %v5307_v63  ;;  %v6013_v63 = vlaneseq (%p63_p0) }
 0x686   : > { %v8384_v0 = vpop.f32.mrf.mxu1 }
 0x68c   : > { %v5471_v13 = vpop.f32.mrf.mxu0 }
 0x68d   : > { %v5475_v4 = vadd.f32 %v5471_v13, %v5391_v61  ;;  %v6014_v61 = vshrl.u32 (%p63_p0), %v6013_v63, 7 }
 0x68e   : > { %v8403_v35 = vpop.f32.mrf.mxu0 }
 0x694   : > { %v5555_v53 = vpop.f32.mrf.mxu1 }
 0x695   : > { %v5559_v50 = vadd.f32 %v5555_v53, %v5475_v4  ;;  %v6000_v53 = vld [vmem:[%s10946_s16 + $0x48] sm:$0xff] (%p63_p0)  ;;  %v6015_v4 = vsub.s32 (%p63_p0), 0, %v6014_v61 }
 0x696   : > { %v8422_v31 = vpop.f32.mrf.mxu1 }
 0x697   :  { %v5995_v31 = vld [vmem:[%s10946_s16 + $0x20] sm:$0xff] (%p63_p0) }
 0x69f   : > { %v5639_v19 = vpop.f32.mrf.mxu0 }
 0x6a0   : > { %v5643_v42 = vadd.f32 %v5639_v19, %v5559_v50  ;;  %v6023_v50 = vsub.s32 (%p63_p0), 2, %v6014_v61  ;;  %v6011_v19 = vld [vmem:[%s10947_s17] sm:$0x1f] (%p63_p0) }
 0x6a1   : > { %v8441_v57 = vpop.f32.mrf.mxu0 }
 0x6a2   :  { %v6019_v57 = vsub.s32 (%p63_p0), 1, %v6014_v61 }
 0x6a4   : > { %v5723_v29 = vpop.f32.mrf.mxu1 }
 0x6a5   : > { %v5727_v54 = vadd.f32 %v5723_v29, %v5643_v42  ;;  %v6016_v42 = vrot.slane (%p63_p0), %v6011_v19, %v6015_v4  ;;  %v6024_v29 = vrot.slane (%p63_p0), %v6011_v19, %v6023_v50 }
 0x6a6   : > { %v8460_v25 = vpop.f32.mrf.mxu1 }
 0x6a7   : > { %5729 = vst.msk [vmem:[#allocation3] sm:$0x3f] %vm5728_vm12, %v5727_v54  ;;  %v6027_v54 = vsub.s32 (%p63_p0), 3, %v6014_v61 }
 0x6a8   :  { %v5893_v21 = vpop.f32.mrf.mxu1 (%p63_p0) }
 0x6aa   :  { %v8476_v22 = vpop.f32.mrf.mxu1 (%p63_p0) }
 0x6ae   : > { %v5730_v56 = vld [vmem:[#allocation3] sm:$0x1]  ;;  %v5731_v6 = vld [vmem:[#allocation3 + $0x1] sm:$0x1]  ;;  %v5733_v60 = vld [vmem:[#allocation3 + $0x4] sm:$0x1] }
 0x6af   : > { %v5732_v7 = vmax.f32 %v5730_v56, %v5731_v6  ;;  %v5734_v47 = vld [vmem:[#allocation3 + $0x5] sm:$0x1]  ;;  %v6020_v6 = vrot.slane (%p63_p0), %v6011_v19, %v6019_v57 }
 0x6b0   : > { %v5735_v15 = vmax.f32 %v5733_v60, %v5734_v47  ;;  %v6028_v47 = vrot.slane (%p63_p0), %v6011_v19, %v6027_v54 }
 0x6b2   : > { %v5736_v37 = vmax.f32 %v5732_v7, %v5735_v15  ;;  %65 = sbr.rel (!%p63_p0) target bundleno = 4 (0x4), region = 120  ;;  %v6031_v15 = vsub.s32 (%p63_p0), 4, %v6014_v61 }
 0x6b4   : > { %v5738_v43 = vadd.f32 %v5737_v8, %v5736_v37 }
 0x6b6   : > { %5741 = vst.msk [vmem:[%s5739_s2] sm:$0x1] %vm5740_vm13, %v5738_v43 }
 0x6bd   :  { %v5744_v27 = vld [vmem:[#allocation6] sm:$0xff] }
 0x6be   :  { %8470 = vmatmul.mubr.msk.f32.vlgmr.msra.gmra.mxu0 %vm5749_vm0, %v5744_v27 }
 0x6bf   :  { %6105 = vmatprep.mubr.f32.mxu0 %v8543_v30  ;;  %6066 = vmatpush1.msra.mxu0 %v6006_v28 }
 0x6c0   :  { %6067 = vmatprep.subr.mxu0 %v6002_v32 }
 0x6c1   :  { %6068 = vmatpush1.msra.mxu0 %v6001_v58 }
 0x6c2   :  { %6069 = vmatprep.subr.mxu0 %v5997_v49 }
 0x6c3   :  { %6070 = vmatpush1.msra.mxu0 %v5996_v41 }
 0x6c4   :  { %6071 = vmatprep.subr.mxu0 %v5992_v45 }
 0x6c5   :  { %6072 = vmatpush1.msra.mxu0 %v5991_v46 }
 0x6c6   :  { %8488 = vmatprep.subr.mxu0 %v8543_v30 }
 0x77e   :  { %v5819_v39 = vpop.f32.mrf.mxu0 }
 0x77f   :  { %v5894_v26 = vadd.f32 %v5893_v21, %v5819_v39 }
 0x780   :  { %v8471_v52 = vpop.f32.mrf.mxu0 }
 0x781   :  { %v5904_v48 = vadd.f32 %v6782_v55, %v5894_v26 }
 0x783   :  { %v5905_v17 = vmax.f32 %v5904_v48, 0.0 }
 0x785   :  { %8486 = vmatmul.mubr.msk.f32.vlgmr.msra.gmra.mxu1 %vm5749_vm0, %v5905_v17 }
 0x786   :  { %6137 = vmatpush1.msra.mxu1 %v6008_v38  ;;  %6176 = vmatprep.mubr.f32.mxu1 %v8543_v30 }
 0x787   :  { %6138 = vmatprep.subr.mxu1 %v6004_v14 }
 0x788   :  { %6139 = vmatpush1.msra.mxu1 %v6003_v16 }
 0x789   :  { %6140 = vmatprep.subr.mxu1 %v5999_v20 }
 0x78a   :  { %6141 = vmatpush1.msra.mxu1 %v5998_v2 }
 0x78b   :  { %6142 = vmatprep.subr.mxu1 %v5994_v62 }
 0x78c   :  { %6143 = vmatpush1.msra.mxu1 %v5993_v1 }
 0x845   :  { %v5986_v34 = vpop.f32.mrf.mxu1 }
 0x846   :  { %v5987_v0 = vadd.f32 %v6783_v23, %v5986_v34 }
 0x847   :  { %v8487_v13 = vpop.f32.mrf.mxu1 }
 0x848   :  { %v5990_v35 = vmax.f32 %v5987_v0, 0.0 }
 0x84a   :  { %6785 = vmatmul.mubr.msk.f32.vlgmr.msra.gmra.mxu0 %vm5749_vm0, %v5990_v35  ;;  %6786 = vmatmul.mubr.msk.f32.vlgmr.msra.gmra.mxu1 %vm5749_vm0, %v5990_v35 }
 0x84b   :  { %8489 = vmatpush3.msra.mxu0 %v6010_v36  ;;  %8496 = vmatprep.mubr.msk.f32.mxu0 %vm8544_vm15, %v8543_v30 }
 0x84c   :  { %8490 = vmatprep.subr.mxu0 %v8543_v30 }
 0x84d   :  { %8491 = vmatpush3.msra.mxu0 %v6005_v3 }
 0x84e   :  { %8492 = vmatprep.subr.mxu0 %v8543_v30 }
 0x84f   :  { %8493 = vmatpush3.msra.mxu0 %v6000_v53 }
 0x850   :  { %8494 = vmatprep.subr.mxu0 %v8543_v30  ;;  %v6032_v30 = vrot.slane %v6011_v19, %v6031_v15 }
 0x851   :  { %8495 = vmatpush3.msra.mxu0 %v5995_v31 }
 0x852   :  { %8497 = vmatmul.mubr.msk.f32.vlgmr.msra.gmra.mxu0 %vm5749_vm0, %v5990_v35 }
 0x90a   :  { %v6107_v25 = vpop.f32.mrf.mxu0  ;;  %v6178_v56 = vpop.f32.mrf.mxu1 }
 0x90b   :  { %v6108_v60 = vadd.f32 %v6107_v25, %v6016_v42  ;;  %v6179_v7 = vadd.f32 %v6178_v56, %v6024_v29 }
 0x90c   :  { %v6109_v8 = vpop.f32.mrf.mxu0  ;;  %v6180_v37 = vpop.f32.mrf.mxu1 }
 0x90d   :  { %6253 = vmax.xlane.f32.xlu0 %v6108_v60  ;;  %6273 = vmax.xlane.f32.xlu1 %v6179_v7  ;;  %v6110_v43 = vadd.f32 %v6109_v8, %v6020_v6  ;;  %v6181_v5 = vadd.f32 %v6180_v37, %v6028_v47 }
 0x911   :  { %6263 = vmax.xlane.f32.xlu0 %v6110_v43  ;;  %6283 = vmax.xlane.f32.xlu1 %v6181_v5 }
 0x912   :  { %v6249_v9 = vpop.f32.mrf.mxu0 }
 0x913   :  { %v6250_v40 = vadd.f32 %v6249_v9, %v6032_v30 }
 0x914   :  { %v8498_v33 = vpop.f32.mrf.mxu0 }
 0x915   :  { %6293 = vmax.xlane.f32.xlu0 %v6250_v40 }
 0x996   :  { %v6254_v12 = vpop.xlane.xlu0 %6253  ;;  %v6274_v59 = vpop.xlane.xlu1 %6273 }
 0x997   :  { %v6255_v27 = vsub.f32 %v6108_v60, %v6254_v12  ;;  %v6275_v18 = vsub.f32 %v6179_v7, %v6274_v59 }
 0x999   :  { %v6256_v11 = vmul.f32 1.442695, %v6255_v27  ;;  %v6276_v10 = vmul.f32 1.442695, %v6275_v18 }
 0x99a   :  { %v6264_v24 = vpop.xlane.xlu0 %6263  ;;  %v6284_v51 = vpop.xlane.xlu1 %6283 }
 0x99b   :  { %8513 = vpow2.f32 %v6256_v11  ;;  %v6265_v28 = vsub.f32 %v6110_v43, %v6264_v24  ;;  %v6285_v44 = vsub.f32 %v6181_v5, %v6284_v51 }
 0x99c   :  { %8515 = vpow2.f32 %v6276_v10 }
 0x99d   :  { %v6266_v32 = vmul.f32 1.442695, %v6265_v28  ;;  %v6286_v58 = vmul.f32 1.442695, %v6285_v44 }
 0x99e   :  { %v6294_v21 = vpop.xlane.xlu0 %6293 }
 0x99f   :  { %8517 = vpow2.f32 %v6266_v32  ;;  %v6295_v22 = vsub.f32 %v6250_v40, %v6294_v21 }
 0x9a0   :  { %8519 = vpow2.f32 %v6286_v58 }
 0x9a1   :  { %v6296_v39 = vmul.f32 1.442695, %v6295_v22 }
 0x9a3   :  { %8521 = vpow2.f32 %v6296_v39 }
 0x9a8   :  { %v8514_v55 = vpop.eup %8513 }
 0x9a9   :  { %6258 = vadd.xlane.f32.xlu1 %v8514_v55  ;;  %v8516_v26 = vpop.eup %8515 }
 0x9ac   :  { %v8518_v52 = vpop.eup %8517 }
 0x9ad   :  { %6268 = vadd.xlane.f32.xlu0 %v8518_v52  ;;  %6278 = vadd.xlane.f32.xlu1 %v8516_v26  ;;  %v8520_v48 = vpop.eup %8519 }
 0x9b0   :  { %v8522_v17 = vpop.eup %8521 }
 0x9b1   :  { %6298 = vadd.xlane.f32.xlu1 %v8522_v17  ;;  %6288 = vadd.xlane.f32.xlu0 %v8520_v48 }
 0xa32   :  { %v6259_v38 = vpop.xlane.xlu1 %6258 }
 0xa33   :  { %8523 = vrcp.f32 %v6259_v38 }
 0xa36   :  { %v6269_v14 = vpop.xlane.xlu0 %6268  ;;  %v6279_v49 = vpop.xlane.xlu1 %6278 }
 0xa37   :  { %8525 = vrcp.f32 %v6269_v14 }
 0xa38   :  { %8527 = vrcp.f32 %v6279_v49 }
 0xa3a   :  { %v6289_v16 = vpop.xlane.xlu0 %6288  ;;  %v6299_v41 = vpop.xlane.xlu1 %6298 }
 0xa3b   :  { %8529 = vrcp.f32 %v6289_v16 }
 0xa3c   :  { %8531 = vrcp.f32 %v6299_v41 }
 0xa40   :  { %v8524_v20 = vpop.eup %8523 }
 0xa41   :  { %v6261_v45 = vmul.f32 %v8524_v20, %v8514_v55 }
 0xa43   :  { %6262 = vst [vmem:[%s10948_s18] sm:$0xff] %v6261_v45 }
 0xa44   :  { %v8526_v2 = vpop.eup %8525 }
 0xa45   :  { %v8528_v46 = vpop.eup %8527  ;;  %v6271_v62 = vmul.f32 %v8526_v2, %v8518_v52 }
 0xa46   :  { %v6281_v1 = vmul.f32 %v8528_v46, %v8516_v26 }
 0xa47   :  { %6272 = vst [vmem:[%s10948_s18 + $0x8] sm:$0xff] %v6271_v62 }
 0xa48   :  { %v8530_v23 = vpop.eup %8529  ;;  %6282 = vst [vmem:[%s10948_s18 + $0x10] sm:$0xff] %v6281_v1 }
 0xa49   :  { %v8532_v34 = vpop.eup %8531  ;;  %v6291_v0 = vmul.f32 %v8530_v23, %v8520_v48 }
 0xa4a   :  { %v6301_v13 = vmul.f32 %v8532_v34, %v8522_v17 }
 0xa4b   :  { %6292 = vst [vmem:[%s10948_s18 + $0x18] sm:$0xff] %v6291_v0 }
 0xa4c   :  { %6302 = vst [vmem:[%s10948_s18 + $0x20] sm:$0xff] %v6301_v13 }

</bundles_post_ra>
